<compile_context>
chip_gen: v7x
topology: tpu7x:2x2x1
jax: 0.10.0
libtpu: 0.0.40
codegen_flags: <defaults>
</compile_context>

<pallas_src>
import functools

import jax
import jax.numpy as jnp
from jax.experimental import pallas as pl
from jax.experimental.pallas import tpu as pltpu


# ----------------------------- Pallas kernels ------------------------------ #
def _conv_mm_t_kernel(w_ref, x_ref, s_ref, b_ref, o_ref, *, relu):
    """o[N, TM] = maybe_relu( (W[N,K] @ X^T[K,TM]) * s[N,1] + b[N,1] )."""
    acc = jnp.dot(w_ref[...], x_ref[...], preferred_element_type=jnp.float32)
    y = acc * s_ref[...] + b_ref[...]          # f32 epilogue on the accumulator
    if relu:
        y = jnp.maximum(y, 0.0)
    o_ref[...] = y.astype(o_ref.dtype)


def _pick_tm(m):
    """Lane-tile over M: full block if tiny, else multiple of 128 with >=2 steps."""
    if m <= 128:
        return m
    half = pl.cdiv(m, 2)
    tm = pl.cdiv(half, 128) * 128
    return min(tm, 1024)


def fused_matmul_t(w, x_t, scale, bias, relu, out_dtype=jnp.bfloat16):
    """W:(N,K) bf16, X^T:(K,M) bf16, scale/bias:(N,) f32 -> (N,M) out_dtype."""
    N, K = w.shape
    K2, M = x_t.shape
    assert K == K2
    tm = _pick_tm(M)
    kernel = functools.partial(_conv_mm_t_kernel, relu=relu)
    return pl.pallas_call(
        kernel,
        out_shape=jax.ShapeDtypeStruct((N, M), out_dtype),
        grid=(pl.cdiv(M, tm),),
        in_specs=[
            pl.BlockSpec((N, K), lambda i: (0, 0)),    # full weight, resident
            pl.BlockSpec((K, tm), lambda i: (0, i)),   # X^T lane tile
            pl.BlockSpec((N, 1), lambda i: (0, 0)),    # folded BN scale
            pl.BlockSpec((N, 1), lambda i: (0, 0)),    # folded BN+conv bias
        ],
        out_specs=pl.BlockSpec((N, tm), lambda i: (0, i)),
        compiler_params=pltpu.CompilerParams(dimension_semantics=("parallel",)),
    )(w, x_t, scale.reshape(N, 1), bias.reshape(N, 1))


def _mlp_tail_kernel(z_ref, w1_ref, b1_ref, w2_ref, b2_ref, w3_ref, b3_ref, o_ref):
    z = z_ref[...]
    h = jnp.dot(z, w1_ref[...], preferred_element_type=jnp.float32) + b1_ref[...]
    h = jnp.maximum(h, 0.0)
    h = jnp.dot(h, w2_ref[...], preferred_element_type=jnp.float32) + b2_ref[...]
    h = jnp.maximum(h, 0.0)
    o = jnp.dot(h, w3_ref[...], preferred_element_type=jnp.float32) + b3_ref[...]
    o_ref[...] = o.astype(o_ref.dtype)


def mlp_tail(z, l1, l2, l3, act_dim):
    """Fused Linear(128,128)+ReLU -> Linear(128,100)+ReLU -> Linear(100,act)."""
    B, _ = z.shape
    Bp = max(8, ((B + 7) // 8) * 8)           # pad tiny row count to one sublane tile
    zp = jnp.pad(z, ((0, Bp - B), (0, 0)))
    (w1, b1), (w2, b2), (w3, b3) = l1, l2, l3
    out = pl.pallas_call(
        _mlp_tail_kernel,
        out_shape=jax.ShapeDtypeStruct((Bp, act_dim), jnp.float32),
    )(zp, w1.T, b1.reshape(1, -1), w2.T, b2.reshape(1, -1), w3.T, b3.reshape(1, -1))
    return out[:B]


# ------------------------------ glue (JAX) --------------------------------- #
def im2col_t(x, k, s):
    """x: (C, B, H, W) -> (C*k*k, B*OH*OW); row order (C, kh, kw) = PyTorch weight order."""
    C, B, H, W = x.shape
    OH = (H - k) // s + 1
    OW = (W - k) // s + 1
    cols = []
    for di in range(k):
        for dj in range(k):
            cols.append(x[:, :, di:di + s * OH:s, dj:dj + s * OW:s])  # (C,B,OH,OW)
    p = jnp.stack(cols, axis=1)                                       # (C,k*k,B,OH,OW)
    return p.reshape(C * k * k, B * OH * OW), OH, OW


def conv_bn_relu_t(x_t, B, H, W, conv_params, bn_params, stride=2, eps=1e-5):
    """x_t: (C, B*H*W) bf16 channel-major activation -> (OC, B*OH*OW) bf16."""
    wc, bc = conv_params                 # wc: (OC, IC, k, k), bc: (OC,)
    gamma, beta, mean, var = bn_params   # each (OC,)
    OC, IC, k, _ = wc.shape
    x4 = x_t.reshape(IC, B, H, W)
    cols_t, OH, OW = im2col_t(x4, k, stride)                 # (IC*k*k, B*OH*OW) bf16
    wmat = wc.reshape(OC, IC * k * k).astype(jnp.bfloat16)   # no weight transpose needed
    scale = gamma / jnp.sqrt(var + eps)
    bias = beta + (bc - mean) * scale
    y_t = fused_matmul_t(wmat, cols_t, scale, bias, relu=True)
    return y_t, OH, OW


# --------------------------- parameter init -------------------------------- #
def _conv_init(key, oc, ic, k):
    k1, k2 = jax.random.split(key)
    bound = 1.0 / jnp.sqrt(ic * k * k)
    w = jax.random.uniform(k1, (oc, ic, k, k), jnp.float32, -bound, bound)
    b = jax.random.uniform(k2, (oc,), jnp.float32, -bound, bound)
    return w, b


def _bn_init(key, c):
    k1, k2, k3, k4 = jax.random.split(key, 4)
    gamma = 1.0 + 0.1 * jax.random.normal(k1, (c,), jnp.float32)
    beta = 0.1 * jax.random.normal(k2, (c,), jnp.float32)
    mean = 0.1 * jax.random.normal(k3, (c,), jnp.float32)
    var = jax.random.uniform(k4, (c,), jnp.float32, 0.5, 1.5)
    return gamma, beta, mean, var


def _lin_init(key, out_d, in_d):
    k1, k2 = jax.random.split(key)
    bound = 1.0 / jnp.sqrt(in_d)
    w = jax.random.uniform(k1, (out_d, in_d), jnp.float32, -bound, bound)
    b = jax.random.uniform(k2, (out_d,), jnp.float32, -bound, bound)
    return w, b


def init_params(key, input_dim, act_dim):
    ks = jax.random.split(key, 11)
    return {
        "c1": _conv_init(ks[0], 32, input_dim * 2, 4), "bn1": _bn_init(ks[1], 32),
        "c2": _conv_init(ks[2], 64, 32, 4),            "bn2": _bn_init(ks[3], 64),
        "c3": _conv_init(ks[4], 64, 64, 4),            "bn3": _bn_init(ks[5], 64),
        "c4": _conv_init(ks[6], 32, 64, 4),            "bn4": _bn_init(ks[7], 32),
        "l1": _lin_init(ks[8], 128, 128),
        "l2": _lin_init(ks[9], 100, 128),
        "l3": _lin_init(ks[10], act_dim, 100),
    }


# ------------------------------- forward ----------------------------------- #
def advantage_forward(params, img, goal, act_dim):
    x, x_prime = jnp.broadcast_arrays(img, goal)
    cat = jnp.concatenate([x, x_prime], axis=-3)          # concat along channel
    *b, C, H, W = cat.shape
    z = cat.reshape(-1, C, H, W)
    B = z.shape[0]

    # channel-major bf16 layout for the whole conv stack: (C, B*H*W)
    zt = z.transpose(1, 0, 2, 3).reshape(C, B * H * W).astype(jnp.bfloat16)
    zt, H, W = conv_bn_relu_t(zt, B, H, W, params["c1"], params["bn1"])
    zt, H, W = conv_bn_relu_t(zt, B, H, W, params["c2"], params["bn2"])
    zt, H, W = conv_bn_relu_t(zt, B, H, W, params["c3"], params["bn3"])
    zt, H, W = conv_bn_relu_t(zt, B, H, W, params["c4"], params["bn4"])

    # View(128): NCHW flatten order (32 * 2 * 2) -- tiny relayout.
    oc = zt.shape[0]
    feat = zt.reshape(oc, B, H, W).transpose(1, 0, 2, 3).reshape(B, oc * H * W)
    feat = feat.astype(jnp.float32)

    out = mlp_tail(feat, params["l1"], params["l2"], params["l3"], act_dim)
    return out.reshape(*b, act_dim)


if __name__ == "__main__":
    key = jax.random.PRNGKey(0)
    kp, ki, kg = jax.random.split(key, 3)

    input_dim, act_dim, B = 1, 8, 2       # spatial must be 64x64 (View(128))
    params = init_params(kp, input_dim, act_dim)
    img = jax.random.normal(ki, (B, input_dim, 64, 64), jnp.float32)
    goal = jax.random.normal(kg, (B, input_dim, 64, 64), jnp.float32)

    fwd = jax.jit(functools.partial(advantage_forward, act_dim=act_dim))
    out = fwd(params, img, goal)
    out = jax.block_until_ready(out)
    assert out.shape == (B, act_dim), out.shape
    assert bool(jnp.all(jnp.isfinite(out)))
    print("KERNEL_OK")
</pallas_src>

<mosaic_0001>
module attributes {stable_mosaic.version = 11 : i64} {
  func.func @_conv_mm_t_kernel(%arg0: i32, %arg1: memref<32x32xbf16, #tpu.memory_space<vmem>>, %arg2: memref<32x1024xbf16, #tpu.memory_space<vmem>>, %arg3: memref<32x1xf32, #tpu.memory_space<vmem>>, %arg4: memref<32x1xf32, #tpu.memory_space<vmem>>, %arg5: memref<32x1024xbf16, #tpu.memory_space<vmem>>) attributes {dimension_semantics = [#tpu.dimension_semantics<parallel>], iteration_bounds = array<i64: 2>, scalar_prefetch = 0 : i64, scratch_operands = 0 : i64, tpu.core_type = #tpu.core_type<tc>, window_params = [{pipeline_mode = #tpu.pipeline_mode<synchronous>, transform_indices = @transform_0, window_bounds = array<i64: 32, 32>}, {transform_indices = @transform_1, window_bounds = array<i64: 32, 1024>}, {pipeline_mode = #tpu.pipeline_mode<synchronous>, transform_indices = @transform_2, window_bounds = array<i64: 32, 1>}, {pipeline_mode = #tpu.pipeline_mode<synchronous>, transform_indices = @transform_3, window_bounds = array<i64: 32, 1>}, {transform_indices = @transform_4, window_bounds = array<i64: 32, 1024>}]} {
    %c0 = arith.constant 0 : index
    %c0_0 = arith.constant 0 : index
    %0 = vector.load %arg1[%c0, %c0_0] : memref<32x32xbf16, #tpu.memory_space<vmem>>, vector<32x32xbf16>
    %c0_1 = arith.constant 0 : index
    %c0_2 = arith.constant 0 : index
    %1 = vector.load %arg2[%c0_1, %c0_2] : memref<32x1024xbf16, #tpu.memory_space<vmem>>, vector<32x1024xbf16>
    %cst = arith.constant dense<0.000000e+00> : vector<32x1024xf32>
    %2 = tpu.matmul %0, %1, %cst {dimension_numbers = #tpu.dot_dimension_numbers<[1], [0], [0], [1], [0, 0, 1, 1], [], []>} : vector<32x32xbf16>, vector<32x1024xbf16>, vector<32x1024xf32> -> vector<32x1024xf32>
    %c0_3 = arith.constant 0 : index
    %c0_4 = arith.constant 0 : index
    %3 = vector.load %arg3[%c0_3, %c0_4] : memref<32x1xf32, #tpu.memory_space<vmem>>, vector<32x1xf32>
    %4 = vector.broadcast %3 : vector<32x1xf32> to vector<32x1024xf32>
    %5 = arith.mulf %2, %4 : vector<32x1024xf32>
    %c0_5 = arith.constant 0 : index
    %c0_6 = arith.constant 0 : index
    %6 = vector.load %arg4[%c0_5, %c0_6] : memref<32x1xf32, #tpu.memory_space<vmem>>, vector<32x1xf32>
    %7 = vector.broadcast %6 : vector<32x1xf32> to vector<32x1024xf32>
    %8 = arith.addf %5, %7 : vector<32x1024xf32>
    %cst_7 = arith.constant 0.000000e+00 : f32
    %9 = vector.broadcast %cst_7 : f32 to vector<32x1024xf32>
    %10 = arith.maximumf %8, %9 : vector<32x1024xf32>
    %11 = arith.truncf %10 : vector<32x1024xf32> to vector<32x1024xbf16>
    %c0_8 = arith.constant 0 : index
    %c0_9 = arith.constant 0 : index
    %12 = vector.load %arg5[%c0_8, %c0_9] : memref<32x1024xbf16, #tpu.memory_space<vmem>>, vector<32x1024xbf16>
    tpu.vector_store %arg5[%c0_8, %c0_9], %11 {strides = array<i32>} : memref<32x1024xbf16, #tpu.memory_space<vmem>>, vector<32x1024xbf16>,
    return
  }
  func.func @transform_0(%arg0: i32) -> (i32, i32) {
    %c0_i32 = arith.constant 0 : i32
    %c0_i32_0 = arith.constant 0 : i32
    %c0_i32_1 = arith.constant 0 : i32
    return %c0_i32, %c0_i32_0 : i32, i32
  }
  func.func @transform_1(%arg0: i32) -> (i32, i32) {
    %c0_i32 = arith.constant 0 : i32
    %c0_i32_0 = arith.constant 0 : i32
    return %c0_i32, %arg0 : i32, i32
  }
  func.func @transform_2(%arg0: i32) -> (i32, i32) {
    %c0_i32 = arith.constant 0 : i32
    %c0_i32_0 = arith.constant 0 : i32
    %c0_i32_1 = arith.constant 0 : i32
    return %c0_i32, %c0_i32_0 : i32, i32
  }
  func.func @transform_3(%arg0: i32) -> (i32, i32) {
    %c0_i32 = arith.constant 0 : i32
    %c0_i32_0 = arith.constant 0 : i32
    %c0_i32_1 = arith.constant 0 : i32
    return %c0_i32, %c0_i32_0 : i32, i32
  }
  func.func @transform_4(%arg0: i32) -> (i32, i32) {
    %c0_i32 = arith.constant 0 : i32
    %c0_i32_0 = arith.constant 0 : i32
    return %c0_i32, %arg0 : i32, i32
  }
}

module attributes {stable_mosaic.version = 11 : i64} {
  func.func @_conv_mm_t_kernel(%arg0: i32, %arg1: memref<64x512xbf16, #tpu.memory_space<vmem>>, %arg2: memref<512x256xbf16, #tpu.memory_space<vmem>>, %arg3: memref<64x1xf32, #tpu.memory_space<vmem>>, %arg4: memref<64x1xf32, #tpu.memory_space<vmem>>, %arg5: memref<64x256xbf16, #tpu.memory_space<vmem>>) attributes {dimension_semantics = [#tpu.dimension_semantics<parallel>], iteration_bounds = array<i64: 2>, scalar_prefetch = 0 : i64, scratch_operands = 0 : i64, tpu.core_type = #tpu.core_type<tc>, window_params = [{pipeline_mode = #tpu.pipeline_mode<synchronous>, transform_indices = @transform_0, window_bounds = array<i64: 64, 512>}, {transform_indices = @transform_1, window_bounds = array<i64: 512, 256>}, {pipeline_mode = #tpu.pipeline_mode<synchronous>, transform_indices = @transform_2, window_bounds = array<i64: 64, 1>}, {pipeline_mode = #tpu.pipeline_mode<synchronous>, transform_indices = @transform_3, window_bounds = array<i64: 64, 1>}, {transform_indices = @transform_4, window_bounds = array<i64: 64, 256>}]} {
    %c0 = arith.constant 0 : index
    %c0_0 = arith.constant 0 : index
    %0 = vector.load %arg1[%c0, %c0_0] : memref<64x512xbf16, #tpu.memory_space<vmem>>, vector<64x512xbf16>
    %c0_1 = arith.constant 0 : index
    %c0_2 = arith.constant 0 : index
    %1 = vector.load %arg2[%c0_1, %c0_2] : memref<512x256xbf16, #tpu.memory_space<vmem>>, vector<512x256xbf16>
    %cst = arith.constant dense<0.000000e+00> : vector<64x256xf32>
    %2 = tpu.matmul %0, %1, %cst {dimension_numbers = #tpu.dot_dimension_numbers<[1], [0], [0], [1], [0, 0, 1, 1], [], []>} : vector<64x512xbf16>, vector<512x256xbf16>, vector<64x256xf32> -> vector<64x256xf32>
    %c0_3 = arith.constant 0 : index
    %c0_4 = arith.constant 0 : index
    %3 = vector.load %arg3[%c0_3, %c0_4] : memref<64x1xf32, #tpu.memory_space<vmem>>, vector<64x1xf32>
    %4 = vector.broadcast %3 : vector<64x1xf32> to vector<64x256xf32>
    %5 = arith.mulf %2, %4 : vector<64x256xf32>
    %c0_5 = arith.constant 0 : index
    %c0_6 = arith.constant 0 : index
    %6 = vector.load %arg4[%c0_5, %c0_6] : memref<64x1xf32, #tpu.memory_space<vmem>>, vector<64x1xf32>
    %7 = vector.broadcast %6 : vector<64x1xf32> to vector<64x256xf32>
    %8 = arith.addf %5, %7 : vector<64x256xf32>
    %cst_7 = arith.constant 0.000000e+00 : f32
    %9 = vector.broadcast %cst_7 : f32 to vector<64x256xf32>
    %10 = arith.maximumf %8, %9 : vector<64x256xf32>
    %11 = arith.truncf %10 : vector<64x256xf32> to vector<64x256xbf16>
    %c0_8 = arith.constant 0 : index
    %c0_9 = arith.constant 0 : index
    %12 = vector.load %arg5[%c0_8, %c0_9] : memref<64x256xbf16, #tpu.memory_space<vmem>>, vector<64x256xbf16>
    tpu.vector_store %arg5[%c0_8, %c0_9], %11 {strides = array<i32>} : memref<64x256xbf16, #tpu.memory_space<vmem>>, vector<64x256xbf16>,
    return
  }
  func.func @transform_0(%arg0: i32) -> (i32, i32) {
    %c0_i32 = arith.constant 0 : i32
    %c0_i32_0 = arith.constant 0 : i32
    %c0_i32_1 = arith.constant 0 : i32
    return %c0_i32, %c0_i32_0 : i32, i32
  }
  func.func @transform_1(%arg0: i32) -> (i32, i32) {
    %c0_i32 = arith.constant 0 : i32
    %c0_i32_0 = arith.constant 0 : i32
    return %c0_i32, %arg0 : i32, i32
  }
  func.func @transform_2(%arg0: i32) -> (i32, i32) {
    %c0_i32 = arith.constant 0 : i32
    %c0_i32_0 = arith.constant 0 : i32
    %c0_i32_1 = arith.constant 0 : i32
    return %c0_i32, %c0_i32_0 : i32, i32
  }
  func.func @transform_3(%arg0: i32) -> (i32, i32) {
    %c0_i32 = arith.constant 0 : i32
    %c0_i32_0 = arith.constant 0 : i32
    %c0_i32_1 = arith.constant 0 : i32
    return %c0_i32, %c0_i32_0 : i32, i32
  }
  func.func @transform_4(%arg0: i32) -> (i32, i32) {
    %c0_i32 = arith.constant 0 : i32
    %c0_i32_0 = arith.constant 0 : i32
    return %c0_i32, %arg0 : i32, i32
  }
}

module attributes {stable_mosaic.version = 11 : i64} {
  func.func @_conv_mm_t_kernel(%arg0: i32, %arg1: memref<64x1024xbf16, #tpu.memory_space<vmem>>, %arg2: memref<1024x72xbf16, #tpu.memory_space<vmem>>, %arg3: memref<64x1xf32, #tpu.memory_space<vmem>>, %arg4: memref<64x1xf32, #tpu.memory_space<vmem>>, %arg5: memref<64x72xbf16, #tpu.memory_space<vmem>>) attributes {dimension_semantics = [#tpu.dimension_semantics<parallel>], iteration_bounds = array<i64: 1>, scalar_prefetch = 0 : i64, scratch_operands = 0 : i64, tpu.core_type = #tpu.core_type<tc>, window_params = [{pipeline_mode = #tpu.pipeline_mode<synchronous>, transform_indices = @transform_0, window_bounds = array<i64: 64, 1024>}, {transform_indices = @transform_1, window_bounds = array<i64: 1024, 72>}, {pipeline_mode = #tpu.pipeline_mode<synchronous>, transform_indices = @transform_2, window_bounds = array<i64: 64, 1>}, {pipeline_mode = #tpu.pipeline_mode<synchronous>, transform_indices = @transform_3, window_bounds = array<i64: 64, 1>}, {transform_indices = @transform_4, window_bounds = array<i64: 64, 72>}]} {
    %c0 = arith.constant 0 : index
    %c0_0 = arith.constant 0 : index
    %0 = vector.load %arg1[%c0, %c0_0] : memref<64x1024xbf16, #tpu.memory_space<vmem>>, vector<64x1024xbf16>
    %c0_1 = arith.constant 0 : index
    %c0_2 = arith.constant 0 : index
    %1 = vector.load %arg2[%c0_1, %c0_2] : memref<1024x72xbf16, #tpu.memory_space<vmem>>, vector<1024x72xbf16>
    %cst = arith.constant dense<0.000000e+00> : vector<64x72xf32>
    %2 = tpu.matmul %0, %1, %cst {dimension_numbers = #tpu.dot_dimension_numbers<[1], [0], [0], [1], [0, 0, 1, 1], [], []>} : vector<64x1024xbf16>, vector<1024x72xbf16>, vector<64x72xf32> -> vector<64x72xf32>
    %c0_3 = arith.constant 0 : index
    %c0_4 = arith.constant 0 : index
    %3 = vector.load %arg3[%c0_3, %c0_4] : memref<64x1xf32, #tpu.memory_space<vmem>>, vector<64x1xf32>
    %4 = vector.broadcast %3 : vector<64x1xf32> to vector<64x72xf32>
    %5 = arith.mulf %2, %4 : vector<64x72xf32>
    %c0_5 = arith.constant 0 : index
    %c0_6 = arith.constant 0 : index
    %6 = vector.load %arg4[%c0_5, %c0_6] : memref<64x1xf32, #tpu.memory_space<vmem>>, vector<64x1xf32>
    %7 = vector.broadcast %6 : vector<64x1xf32> to vector<64x72xf32>
    %8 = arith.addf %5, %7 : vector<64x72xf32>
    %cst_7 = arith.constant 0.000000e+00 : f32
    %9 = vector.broadcast %cst_7 : f32 to vector<64x72xf32>
    %10 = arith.maximumf %8, %9 : vector<64x72xf32>
    %11 = arith.truncf %10 : vector<64x72xf32> to vector<64x72xbf16>
    %c0_8 = arith.constant 0 : index
    %c0_9 = arith.constant 0 : index
    %12 = vector.load %arg5[%c0_8, %c0_9] : memref<64x72xbf16, #tpu.memory_space<vmem>>, vector<64x72xbf16>
    tpu.vector_store %arg5[%c0_8, %c0_9], %11 {strides = array<i32>} : memref<64x72xbf16, #tpu.memory_space<vmem>>, vector<64x72xbf16>,
    return
  }
  func.func @transform_0(%arg0: i32) -> (i32, i32) {
    %c0_i32 = arith.constant 0 : i32
    %c0_i32_0 = arith.constant 0 : i32
    %c0_i32_1 = arith.constant 0 : i32
    return %c0_i32, %c0_i32_0 : i32, i32
  }
  func.func @transform_1(%arg0: i32) -> (i32, i32) {
    %c0_i32 = arith.constant 0 : i32
    %c0_i32_0 = arith.constant 0 : i32
    return %c0_i32, %arg0 : i32, i32
  }
  func.func @transform_2(%arg0: i32) -> (i32, i32) {
    %c0_i32 = arith.constant 0 : i32
    %c0_i32_0 = arith.constant 0 : i32
    %c0_i32_1 = arith.constant 0 : i32
    return %c0_i32, %c0_i32_0 : i32, i32
  }
  func.func @transform_3(%arg0: i32) -> (i32, i32) {
    %c0_i32 = arith.constant 0 : i32
    %c0_i32_0 = arith.constant 0 : i32
    %c0_i32_1 = arith.constant 0 : i32
    return %c0_i32, %c0_i32_0 : i32, i32
  }
  func.func @transform_4(%arg0: i32) -> (i32, i32) {
    %c0_i32 = arith.constant 0 : i32
    %c0_i32_0 = arith.constant 0 : i32
    return %c0_i32, %arg0 : i32, i32
  }
}

module attributes {stable_mosaic.version = 11 : i64} {
  func.func @_conv_mm_t_kernel(%arg0: i32, %arg1: memref<32x1024xbf16, #tpu.memory_space<vmem>>, %arg2: memref<1024x8xbf16, #tpu.memory_space<vmem>>, %arg3: memref<32x1xf32, #tpu.memory_space<vmem>>, %arg4: memref<32x1xf32, #tpu.memory_space<vmem>>, %arg5: memref<32x8xbf16, #tpu.memory_space<vmem>>) attributes {dimension_semantics = [#tpu.dimension_semantics<parallel>], iteration_bounds = array<i64: 1>, scalar_prefetch = 0 : i64, scratch_operands = 0 : i64, tpu.core_type = #tpu.core_type<tc>, window_params = [{pipeline_mode = #tpu.pipeline_mode<synchronous>, transform_indices = @transform_0, window_bounds = array<i64: 32, 1024>}, {transform_indices = @transform_1, window_bounds = array<i64: 1024, 8>}, {pipeline_mode = #tpu.pipeline_mode<synchronous>, transform_indices = @transform_2, window_bounds = array<i64: 32, 1>}, {pipeline_mode = #tpu.pipeline_mode<synchronous>, transform_indices = @transform_3, window_bounds = array<i64: 32, 1>}, {transform_indices = @transform_4, window_bounds = array<i64: 32, 8>}]} {
    %c0 = arith.constant 0 : index
    %c0_0 = arith.constant 0 : index
    %0 = vector.load %arg1[%c0, %c0_0] : memref<32x1024xbf16, #tpu.memory_space<vmem>>, vector<32x1024xbf16>
    %c0_1 = arith.constant 0 : index
    %c0_2 = arith.constant 0 : index
    %1 = vector.load %arg2[%c0_1, %c0_2] : memref<1024x8xbf16, #tpu.memory_space<vmem>>, vector<1024x8xbf16>
    %cst = arith.constant dense<0.000000e+00> : vector<32x8xf32>
    %2 = tpu.matmul %0, %1, %cst {dimension_numbers = #tpu.dot_dimension_numbers<[1], [0], [0], [1], [0, 0, 1, 1], [], []>} : vector<32x1024xbf16>, vector<1024x8xbf16>, vector<32x8xf32> -> vector<32x8xf32>
    %c0_3 = arith.constant 0 : index
    %c0_4 = arith.constant 0 : index
    %3 = vector.load %arg3[%c0_3, %c0_4] : memref<32x1xf32, #tpu.memory_space<vmem>>, vector<32x1xf32>
    %4 = vector.broadcast %3 : vector<32x1xf32> to vector<32x8xf32>
    %5 = arith.mulf %2, %4 : vector<32x8xf32>
    %c0_5 = arith.constant 0 : index
    %c0_6 = arith.constant 0 : index
    %6 = vector.load %arg4[%c0_5, %c0_6] : memref<32x1xf32, #tpu.memory_space<vmem>>, vector<32x1xf32>
    %7 = vector.broadcast %6 : vector<32x1xf32> to vector<32x8xf32>
    %8 = arith.addf %5, %7 : vector<32x8xf32>
    %cst_7 = arith.constant 0.000000e+00 : f32
    %9 = vector.broadcast %cst_7 : f32 to vector<32x8xf32>
    %10 = arith.maximumf %8, %9 : vector<32x8xf32>
    %11 = arith.truncf %10 : vector<32x8xf32> to vector<32x8xbf16>
    %c0_8 = arith.constant 0 : index
    %c0_9 = arith.constant 0 : index
    %12 = vector.load %arg5[%c0_8, %c0_9] : memref<32x8xbf16, #tpu.memory_space<vmem>>, vector<32x8xbf16>
    tpu.vector_store %arg5[%c0_8, %c0_9], %11 {strides = array<i32>} : memref<32x8xbf16, #tpu.memory_space<vmem>>, vector<32x8xbf16>,
    return
  }
  func.func @transform_0(%arg0: i32) -> (i32, i32) {
    %c0_i32 = arith.constant 0 : i32
    %c0_i32_0 = arith.constant 0 : i32
    %c0_i32_1 = arith.constant 0 : i32
    return %c0_i32, %c0_i32_0 : i32, i32
  }
  func.func @transform_1(%arg0: i32) -> (i32, i32) {
    %c0_i32 = arith.constant 0 : i32
    %c0_i32_0 = arith.constant 0 : i32
    return %c0_i32, %arg0 : i32, i32
  }
  func.func @transform_2(%arg0: i32) -> (i32, i32) {
    %c0_i32 = arith.constant 0 : i32
    %c0_i32_0 = arith.constant 0 : i32
    %c0_i32_1 = arith.constant 0 : i32
    return %c0_i32, %c0_i32_0 : i32, i32
  }
  func.func @transform_3(%arg0: i32) -> (i32, i32) {
    %c0_i32 = arith.constant 0 : i32
    %c0_i32_0 = arith.constant 0 : i32
    %c0_i32_1 = arith.constant 0 : i32
    return %c0_i32, %c0_i32_0 : i32, i32
  }
  func.func @transform_4(%arg0: i32) -> (i32, i32) {
    %c0_i32 = arith.constant 0 : i32
    %c0_i32_0 = arith.constant 0 : i32
    return %c0_i32, %arg0 : i32, i32
  }
}

module attributes {stable_mosaic.version = 11 : i64} {
  func.func @_mlp_tail_kernel(%arg0: memref<8x128xf32, #tpu.memory_space<vmem>>, %arg1: memref<128x128xf32, #tpu.memory_space<vmem>>, %arg2: memref<1x128xf32, #tpu.memory_space<vmem>>, %arg3: memref<128x100xf32, #tpu.memory_space<vmem>>, %arg4: memref<1x100xf32, #tpu.memory_space<vmem>>, %arg5: memref<100x8xf32, #tpu.memory_space<vmem>>, %arg6: memref<1x8xf32, #tpu.memory_space<vmem>>, %arg7: memref<8x8xf32, #tpu.memory_space<vmem>>) attributes {dimension_semantics = [], scalar_prefetch = 0 : i64, scratch_operands = 0 : i64, tpu.core_type = #tpu.core_type<tc>} {
    %c0 = arith.constant 0 : index
    %c0_0 = arith.constant 0 : index
    %0 = vector.load %arg0[%c0, %c0_0] : memref<8x128xf32, #tpu.memory_space<vmem>>, vector<8x128xf32>
    %c0_1 = arith.constant 0 : index
    %c0_2 = arith.constant 0 : index
    %1 = vector.load %arg1[%c0_1, %c0_2] : memref<128x128xf32, #tpu.memory_space<vmem>>, vector<128x128xf32>
    %cst = arith.constant dense<0.000000e+00> : vector<8x128xf32>
    %2 = tpu.matmul %0, %1, %cst {dimension_numbers = #tpu.dot_dimension_numbers<[1], [0], [0], [1], [0, 0, 1, 1], [], []>} : vector<8x128xf32>, vector<128x128xf32>, vector<8x128xf32> -> vector<8x128xf32>
    %c0_3 = arith.constant 0 : index
    %c0_4 = arith.constant 0 : index
    %3 = vector.load %arg2[%c0_3, %c0_4] : memref<1x128xf32, #tpu.memory_space<vmem>>, vector<1x128xf32>
    %4 = vector.broadcast %3 : vector<1x128xf32> to vector<8x128xf32>
    %5 = arith.addf %2, %4 : vector<8x128xf32>
    %cst_5 = arith.constant 0.000000e+00 : f32
    %6 = vector.broadcast %cst_5 : f32 to vector<8x128xf32>
    %7 = arith.maximumf %5, %6 : vector<8x128xf32>
    %c0_6 = arith.constant 0 : index
    %c0_7 = arith.constant 0 : index
    %8 = vector.load %arg3[%c0_6, %c0_7] : memref<128x100xf32, #tpu.memory_space<vmem>>, vector<128x100xf32>
    %cst_8 = arith.constant dense<0.000000e+00> : vector<8x100xf32>
    %9 = tpu.matmul %7, %8, %cst_8 {dimension_numbers = #tpu.dot_dimension_numbers<[1], [0], [0], [1], [0, 0, 1, 1], [], []>} : vector<8x128xf32>, vector<128x100xf32>, vector<8x100xf32> -> vector<8x100xf32>
    %c0_9 = arith.constant 0 : index
    %c0_10 = arith.constant 0 : index
    %10 = vector.load %arg4[%c0_9, %c0_10] : memref<1x100xf32, #tpu.memory_space<vmem>>, vector<1x100xf32>
    %11 = vector.broadcast %10 : vector<1x100xf32> to vector<8x100xf32>
    %12 = arith.addf %9, %11 : vector<8x100xf32>
    %cst_11 = arith.constant 0.000000e+00 : f32
    %13 = vector.broadcast %cst_11 : f32 to vector<8x100xf32>
    %14 = arith.maximumf %12, %13 : vector<8x100xf32>
    %c0_12 = arith.constant 0 : index
    %c0_13 = arith.constant 0 : index
    %15 = vector.load %arg5[%c0_12, %c0_13] : memref<100x8xf32, #tpu.memory_space<vmem>>, vector<100x8xf32>
    %cst_14 = arith.constant dense<0.000000e+00> : vector<8x8xf32>
    %16 = tpu.matmul %14, %15, %cst_14 {dimension_numbers = #tpu.dot_dimension_numbers<[1], [0], [0], [1], [0, 0, 1, 1], [], []>} : vector<8x100xf32>, vector<100x8xf32>, vector<8x8xf32> -> vector<8x8xf32>
    %c0_15 = arith.constant 0 : index
    %c0_16 = arith.constant 0 : index
    %17 = vector.load %arg6[%c0_15, %c0_16] : memref<1x8xf32, #tpu.memory_space<vmem>>, vector<1x8xf32>
    %18 = vector.broadcast %17 : vector<1x8xf32> to vector<8x8xf32>
    %19 = arith.addf %16, %18 : vector<8x8xf32>
    %c0_17 = arith.constant 0 : index
    %c0_18 = arith.constant 0 : index
    %20 = vector.load %arg7[%c0_17, %c0_18] : memref<8x8xf32, #tpu.memory_space<vmem>>, vector<8x8xf32>
    tpu.vector_store %arg7[%c0_17, %c0_18], %19 {strides = array<i32>} : memref<8x8xf32, #tpu.memory_space<vmem>>, vector<8x8xf32>,
    return
  }
}

</mosaic_0001>

<bundles_post_ra>
// kernel: advantage_forward.5
= control target key start
LH: loop header
LB: loop body
LE: loop exit
PB: predicated region body
PF: predicated region fallthrough
CT: control target
= control target key end

     0   :  { %s1097_s15 = smov 0   ;;  %s1099_s16 = smov 0   ;;  %s1359_s0 = inlined_call_operand.vmem [shape: bf16[32,32], index: 0, kind: input, shape index: {}]   ;;  %s1360_s1 = inlined_call_operand.vmem [shape: bf16[32,1922], index: 1, kind: input, shape index: {}]   ;;  %s1361_s2 = inlined_call_operand.vmem [shape: f32[32,1], index: 2, kind: input, shape index: {}]   ;;  %s1362_s3 = inlined_call_operand.vmem [shape: f32[32,1], index: 3, kind: input, shape index: {}]   ;;  %s1363_s4 = inlined_call_operand.vmem [shape: bf16[32,1922], index: 4, kind: output, shape index: {}]  }
   0x1   :  { %s1101_s17 = smov 0  }
   0x2 LB: > { %s943_s18 = sadd.s32 4294967295, %s1069_s17   ;;  %s1114_s19 = sadd.s32 1, %s1069_s17   ;;  %s1069_s17 = sphi %s1101_s17, %s1367_s17   ;;  %s1065_s16 = sphi %s1099_s16, %s1366_s16   ;;  %s1061_s15 = sphi %s1097_s15, %s1365_s15  }
   0x3   : > { %s39_s20 = ssub.s32 %s1069_s17, %s1114_s19  ;;  %s42_s21 = sadd.s32 1, %s1065_s16 }
   0x4   : > { %p40_p0 = scmp.eq.s32.totalorder %s39_s20, 0  ;;  %p49_p1 = scmp.ne.s32.totalorder %s1065_s16, %s1061_s15 }
   0x5   : > { %p50_p2 = scmp.eq.s32.totalorder %s1069_s17, 0  ;;  %p121_p3 = scmp.eq.s32.totalorder %s943_s18, 1 }
   0x6   : > { %s1125_s22 = scalar_select %p40_p0, %s1065_s16, %s42_s21  }
   0x7   : > { %p51_p4 = por %p50_p2, %p49_p1  ;;  %p1127_p5 = por %p121_p3, %p49_p1 }
   0x8   : > { %p946_p6 = scmp.ge.s32.totalorder %s1069_s17, 2 }
   0xa   : > { %152 = sbr.rel (%p946_p6) target bundleno = 29 (0x1d), region = 28 }
  0x11   : > { %155 = sbr.rel (!%p51_p4) target bundleno = 29 (0x1d), region = 32  ;;  %s157_s24 = sand.u32 (%p51_p4), 1, %s1065_s16  }
  0x12   : > { %s1000_s25 = sshll.u32 (%p51_p4), %s1069_s17, 5  ;;  %s947_s26 = sshll.u32 (%p51_p4), %s157_s24, 7 }
  0x13   : > { %s1137_s29 = scalar_lea.vmem (%p51_p4), %s1360_s1, %s1000_s25  ;;  %s159_s30 = scalar_lea.vmem (%p51_p4), [#allocation2], %s947_s26 }
  0x14   : > { %v175_v0 = vld [vmem:[%s1137_s29] sm:$0xff] (%p51_p4)  ;;  %v177_v1 = vld [vmem:[%s1137_s29 + $0x8] sm:$0xff] (%p51_p4)  ;;  %v179_v2 = vld [vmem:[%s1137_s29 + $0x10] sm:$0xff] (%p51_p4) }
  0x15   : > { %176 = vst [vmem:[%s159_s30] sm:$0xff] (%p51_p4), %v175_v0  ;;  %178 = vst [vmem:[%s159_s30 + $0x8] sm:$0xff] (%p51_p4), %v177_v1  ;;  %v181_v3 = vld [vmem:[%s1137_s29 + $0x18] sm:$0xff] (%p51_p4)  ;;  %v183_v4 = vld [vmem:[%s1137_s29 + $0x40] sm:$0xff] (%p51_p4) }
  0x16   : > { %180 = vst [vmem:[%s159_s30 + $0x10] sm:$0xff] (%p51_p4), %v179_v2  ;;  %v185_v5 = vld [vmem:[%s1137_s29 + $0x48] sm:$0xff] (%p51_p4)  ;;  %182 = vst [vmem:[%s159_s30 + $0x18] sm:$0xff] (%p51_p4), %v181_v3  ;;  %v187_v6 = vld [vmem:[%s1137_s29 + $0x50] sm:$0xff] (%p51_p4) }
  0x17   : > { %184 = vst [vmem:[%s159_s30 + $0x20] sm:$0xff] (%p51_p4), %v183_v4  ;;  %186 = vst [vmem:[%s159_s30 + $0x28] sm:$0xff] (%p51_p4), %v185_v5  ;;  %v189_v7 = vld [vmem:[%s1137_s29 + $0x58] sm:$0xff] (%p51_p4)  ;;  %v191_v8 = vld [vmem:[%s1137_s29 + $0x80] sm:$0xff] (%p51_p4) }
  0x18   : > { %188 = vst [vmem:[%s159_s30 + $0x30] sm:$0xff] %v187_v6  ;;  %190 = vst [vmem:[%s159_s30 + $0x38] sm:$0xff] %v189_v7  ;;  %v193_v9 = vld [vmem:[%s1137_s29 + $0x88] sm:$0xff]  ;;  %v195_v10 = vld [vmem:[%s1137_s29 + $0x90] sm:$0xff] }
  0x19   : > { %192 = vst [vmem:[%s159_s30 + $0x40] sm:$0xff] %v191_v8  ;;  %v197_v11 = vld [vmem:[%s1137_s29 + $0x98] sm:$0xff]  ;;  %194 = vst [vmem:[%s159_s30 + $0x48] sm:$0xff] %v193_v9  ;;  %v199_v12 = vld [vmem:[%s1137_s29 + $0xc0] sm:$0xff] }
  0x1a   : > { %196 = vst [vmem:[%s159_s30 + $0x50] sm:$0xff] %v195_v10  ;;  %198 = vst [vmem:[%s159_s30 + $0x58] sm:$0xff] %v197_v11  ;;  %v201_v13 = vld [vmem:[%s1137_s29 + $0xc8] sm:$0xff]  ;;  %v203_v14 = vld [vmem:[%s1137_s29 + $0xd0] sm:$0xff] }
  0x1b   : > { %200 = vst [vmem:[%s159_s30 + $0x60] sm:$0xff] %v199_v12  ;;  %202 = vst [vmem:[%s159_s30 + $0x68] sm:$0xff] %v201_v13  ;;  %v205_v15 = vld [vmem:[%s1137_s29 + $0xd8] sm:$0xff] }
  0x1c   : > { %204 = vst [vmem:[%s159_s30 + $0x70] sm:$0xff] %v203_v14  ;;  %206 = vst [vmem:[%s159_s30 + $0x78] sm:$0xff] %v205_v15 }
  0x1d PF: > { %p950_p7 = scmp.ge.s32.totalorder %s1069_s17, 1  ;;  %p211_p8 = scmp.lt.s32.totalorder %s1069_s17, 3 }
  0x1f   : > { %p212_p9 = pnand %p950_p7, %p211_p8 }
  0x20   : > { %s218_s5 = sand.u32 (!%p212_p9), 1, %s1061_s15   ;;  %v1071_v16 = vmov (!%p212_p9), 0   ;;  %v574_v17 = vld [vmem:[%s1361_s2] sm:$0xff] (!%p212_p9)  ;;  %v576_v18 = vld [vmem:[%s1361_s2 + $0x10] sm:$0xff] (!%p212_p9)  ;;  %v575_v40 = vld [vmem:[%s1361_s2 + $0x8] sm:$0xff] (!%p212_p9)  ;;  %vm355_vm0 = vcmask (!%p212_p9), 261120  }
  0x21   : > { %215 = sbr.rel (%p212_p9) target bundleno = 304 (0x130), region = 55  ;;  %s1158_s6 = sshll.u32 (!%p212_p9), %s218_s5, 7  ;;  %394 = vmatprep.mubr.bf16.mxu0 (!%p212_p9), %v1071_v16  ;;  %447 = vmatprep.mubr.bf16.mxu1 (!%p212_p9), %v1071_v16  ;;  %v577_v41 = vld [vmem:[%s1361_s2 + $0x18] sm:$0xff] (!%p212_p9)  ;;  %v1045_v42 = vld [vmem:[%s1359_s0] sm:$0xff] (!%p212_p9)   ;;  %v631_v50 = vld [vmem:[%s1362_s3 + $0x8] sm:$0xff] (!%p212_p9) }
  0x22   : > { %1043 = vset.pattern.permute.xlu0 (!%p212_p9), %v1071_v16  ;;  %1044 = vset.pattern.permute.xlu1 (!%p212_p9), %v1071_v16  ;;  %s1171_s11 = scalar_lea.vmem (!%p212_p9), [#allocation2], %s1158_s6  ;;  %v630_v46 = vld [vmem:[%s1362_s3] sm:$0xff] (!%p212_p9)  ;;  %v632_v55 = vld [vmem:[%s1362_s3 + $0x10] sm:$0xff] (!%p212_p9)  ;;  %v633_v57 = vld [vmem:[%s1362_s3 + $0x18] sm:$0xff] (!%p212_p9)  ;;  %s1261_s9 = scalar_lea.vmem (!%p212_p9), [#allocation3], %s1158_s6 }
  0x23   : > { %v249_v19 = vld [vmem:[%s1171_s11] sm:$0xff] (!%p212_p9)  ;;  %v250_v21 = vld [vmem:[%s1171_s11 + $0x8] sm:$0xff] (!%p212_p9)  ;;  %580 = vperm.xlu0 (!%p212_p9), %1043, %v574_v17   ;;  %590 = vperm.xlu1 (!%p212_p9), %1044, %v576_v18   ;;  %v251_v32 = vld [vmem:[%s1171_s11 + $0x10] sm:$0xff] (!%p212_p9) }
  0x24   : > { %v253_v20 = vld [vmem:[%s1171_s11 + $0x20] sm:$0xff] (!%p212_p9)  ;;  %v254_v23 = vld [vmem:[%s1171_s11 + $0x28] sm:$0xff] (!%p212_p9)  ;;  %v255_v34 = vld [vmem:[%s1171_s11 + $0x30] sm:$0xff] (!%p212_p9) }
  0x25   : > { %v956_v22 = vcombine.high (!%p212_p9), %v249_v19, %v253_v20  ;;  %v955_v24 = vcombine.low (!%p212_p9), %v249_v19, %v253_v20  ;;  %v257_v25 = vld [vmem:[%s1171_s11 + $0x40] sm:$0xff] (!%p212_p9)  ;;  %v958_v27 = vcombine.high (!%p212_p9), %v250_v21, %v254_v23  ;;  %v957_v28 = vcombine.low (!%p212_p9), %v250_v21, %v254_v23  ;;  %v258_v30 = vld [vmem:[%s1171_s11 + $0x48] sm:$0xff] (!%p212_p9)  ;;  %v252_v35 = vld [vmem:[%s1171_s11 + $0x18] sm:$0xff] (!%p212_p9) }
  0x26   : > { %v261_v26 = vld [vmem:[%s1171_s11 + $0x60] sm:$0xff] (!%p212_p9)  ;;  %v262_v31 = vld [vmem:[%s1171_s11 + $0x68] sm:$0xff] (!%p212_p9)  ;;  %v256_v36 = vld [vmem:[%s1171_s11 + $0x38] sm:$0xff] (!%p212_p9)  ;;  %v960_v39 = vcombine.high (!%p212_p9), %v251_v32, %v255_v34  ;;  %v959_v47 = vcombine.low (!%p212_p9), %v251_v32, %v255_v34 }
  0x27   : > { %v964_v29 = vcombine.high (!%p212_p9), %v257_v25, %v261_v26  ;;  %362 = vmatprep.subr.bf16.mxu0 (!%p212_p9), %v956_v22  ;;  %v966_v33 = vcombine.high (!%p212_p9), %v258_v30, %v262_v31  ;;  %415 = vmatprep.subr.bf16.mxu1 (!%p212_p9), %v958_v27  ;;  %v963_v37 = vcombine.low (!%p212_p9), %v257_v25, %v261_v26  ;;  %v259_v44 = vld [vmem:[%s1171_s11 + $0x50] sm:$0xff] (!%p212_p9)  ;;  %v260_v48 = vld [vmem:[%s1171_s11 + $0x58] sm:$0xff] (!%p212_p9)  ;;  %v1046_v58 = vld [vmem:[%s1359_s0 + $0x8] sm:$0xff] (!%p212_p9)  }
  0x28   : > { %363 = vmatpush1.bf16.msra.mxu0 %v955_v24  ;;  %416 = vmatpush1.bf16.msra.mxu1 %v957_v28  ;;  %v965_v38 = vcombine.low %v258_v30, %v262_v31  ;;  %v962_v43 = vcombine.high %v252_v35, %v256_v36  ;;  %v263_v45 = vld [vmem:[%s1171_s11 + $0x70] sm:$0xff]  ;;  %v264_v49 = vld [vmem:[%s1171_s11 + $0x78] sm:$0xff]  ;;  %v961_v51 = vcombine.low %v252_v35, %v256_v36  ;;  %s1017_s6 = sshll.u32 (%p1127_p5), %s943_s18, 5 }
  0x29   : > { %364 = vmatprep.subr.bf16.mxu0 %v964_v29  ;;  %417 = vmatprep.subr.bf16.mxu1 %v966_v33  ;;  %v968_v52 = vcombine.high %v259_v44, %v263_v45  ;;  %v970_v53 = vcombine.high %v260_v48, %v264_v49  ;;  %v967_v54 = vcombine.low %v259_v44, %v263_v45  ;;  %s839_s23 = scalar_lea.vmem (%p1127_p5), %s1363_s4, %s1017_s6 }
  0x2a   : > { %585 = vperm.xlu0 %1043, %v575_v40   ;;  %595 = vperm.xlu1 %1044, %v577_v41   ;;  %v969_v56 = vcombine.low %v260_v48, %v264_v49 }
  0x2c   : > { %365 = vmatpush1.bf16.msra.mxu0 %v963_v37  ;;  %418 = vmatpush1.bf16.msra.mxu1 %v965_v38 }
  0x2d   : > { %468 = vmatprep.subr.bf16.mxu0 %v960_v39  ;;  %521 = vmatprep.subr.bf16.mxu1 %v962_v43 }
  0x2e   : > { %636 = vperm.xlu0 %1043, %v630_v46   ;;  %641 = vperm.xlu1 %1044, %v631_v50  }
  0x2f   : > { %971 = vmatmul.mubr.msk.bf16.vlgmr.msra.gmra.mrb[0].mxu0 %vm355_vm0, %v1045_v42  ;;  %973 = vmatmul.mubr.msk.bf16.vlgmr.msra.gmra.mrb[0].mxu1 %vm355_vm0, %v1045_v42 }
  0x30   : > { %469 = vmatpush1.bf16.msra.mxu0 %v959_v47  ;;  %522 = vmatpush1.bf16.msra.mxu1 %v961_v51 }
  0x31   : > { %404 = vmatprep.mubr.bf16.mxu0 %v1071_v16  ;;  %457 = vmatprep.mubr.bf16.mxu1 %v1071_v16 }
  0x32   : > { %470 = vmatprep.subr.bf16.mxu0 %v968_v52  ;;  %523 = vmatprep.subr.bf16.mxu1 %v970_v53 }
  0x33   : > { %646 = vperm.xlu0 %1043, %v632_v55   ;;  %651 = vperm.xlu1 %1044, %v633_v57  }
  0x34   : > { %471 = vmatpush1.bf16.msra.mxu0 %v967_v54  ;;  %524 = vmatpush1.bf16.msra.mxu1 %v969_v56 }
  0x37   : > { %972 = vmatmul.mubr.msk.bf16.gmra.mrb[4].mxu0 %vm355_vm0, %v1046_v58  ;;  %974 = vmatmul.mubr.msk.bf16.gmra.mrb[4].mxu1 %vm355_vm0, %v1046_v58 }
  0x38   : > { %500 = vmatprep.mubr.bf16.mxu0 %v1071_v16  ;;  %553 = vmatprep.mubr.bf16.mxu1 %v1071_v16 }
  0x3f   : > { %975 = vmatmul.mubr.msk.bf16.vlgmr.msra.gmra.mrb[8].mxu0 %vm355_vm0, %v1045_v42  ;;  %977 = vmatmul.mubr.msk.bf16.vlgmr.msra.gmra.mrb[8].mxu1 %vm355_vm0, %v1045_v42 }
  0x40   : > { %510 = vmatprep.mubr.bf16.mxu0 %v1071_v16  ;;  %563 = vmatprep.mubr.bf16.mxu1 %v1071_v16 }
  0x47   : > { %976 = vmatmul.mubr.msk.bf16.gmra.mrb[12].mxu0 %vm355_vm0, %v1046_v58  ;;  %978 = vmatmul.mubr.msk.bf16.gmra.mrb[12].mxu1 %vm355_vm0, %v1046_v58 }
  0xa2   : > { %v1227_v59 = vpop.permute.xlu0 %580  ;;  %v1229_v60 = vpop.permute.xlu1 %590 }
  0xa9   : > { %v1231_v61 = vpop.permute.xlu0 %585  ;;  %v1233_v62 = vpop.permute.xlu1 %595 }
  0xad   : > { %v1235_v63 = vpop.permute.xlu0 %636  ;;  %v1237_v1 = vpop.permute.xlu1 %641 }
  0xb2   : > { %v1255_v30 = vpop.permute.xlu0 %646  ;;  %v1257_v35 = vpop.permute.xlu1 %651 }
 0x102   : > { %v396_v0 = vpop.f32.mrb[0].mxu0  ;;  %v449_v3 = vpop.f32.mrb[0].mxu1 }
 0x103   : > { %v598_v2 = vmul.f32 %v1227_v59, %v396_v0  ;;  %v398_v4 = vpop.f32.mrb[1].mxu0  ;;  %v600_v5 = vmul.f32 %v1227_v59, %v449_v3  ;;  %v451_v7 = vpop.f32.mrb[1].mxu1 }
 0x104   : > { %v599_v6 = vmul.f32 %v1227_v59, %v398_v4  ;;  %v400_v8 = vpop.f32.mrb[2].mxu0  ;;  %v601_v9 = vmul.f32 %v1227_v59, %v451_v7  ;;  %v453_v11 = vpop.f32.mrb[2].mxu1 }
 0x105   : > { %v606_v10 = vmul.f32 %v1231_v61, %v400_v8  ;;  %v654_v12 = vadd.f32 %v1235_v63, %v598_v2  ;;  %v402_v13 = vpop.f32.mrb[3].mxu0  ;;  %v608_v14 = vmul.f32 %v1231_v61, %v453_v11  ;;  %v656_v16 = vadd.f32 %v1235_v63, %v600_v5  ;;  %v455_v18 = vpop.f32.mrb[3].mxu1 }
 0x106   : > { %v655_v15 = vadd.f32 %v1235_v63, %v599_v6  ;;  %v607_v17 = vmul.f32 %v1231_v61, %v402_v13  ;;  %v657_v19 = vadd.f32 %v1235_v63, %v601_v9  ;;  %v609_v21 = vmul.f32 %v1231_v61, %v455_v18 }
 0x107   : > { %v686_v20 = vmax.f32 %v654_v12, 0.0  ;;  %v662_v22 = vadd.f32 %v1237_v1, %v606_v10  ;;  %v688_v24 = vmax.f32 %v656_v16, 0.0  ;;  %v664_v26 = vadd.f32 %v1237_v1, %v608_v14 }
 0x108   : > { %v687_v23 = vmax.f32 %v655_v15, 0.0  ;;  %v663_v25 = vadd.f32 %v1237_v1, %v607_v17  ;;  %v689_v27 = vmax.f32 %v657_v19, 0.0  ;;  %v665_v28 = vadd.f32 %v1237_v1, %v609_v21 }
 0x109   : > { %v694_v29 = vmax.f32 %v662_v22, 0.0  ;;  %v696_v33 = vmax.f32 %v664_v26, 0.0 }
 0x10a   : > { %v1001_v31 = vpack.c.bf16 %v687_v23, %v686_v20  ;;  %v695_v32 = vmax.f32 %v663_v25, 0.0  ;;  %v406_v34 = vpop.f32.mrb[4].mxu0  ;;  %v1002_v36 = vpack.c.bf16 %v689_v27, %v688_v24  ;;  %v697_v37 = vmax.f32 %v665_v28, 0.0  ;;  %v459_v39 = vpop.f32.mrb[4].mxu1 }
 0x10b   : > { %v614_v38 = vmul.f32 %v1229_v60, %v406_v34  ;;  %v408_v40 = vpop.f32.mrb[5].mxu0  ;;  %v616_v42 = vmul.f32 %v1229_v60, %v459_v39  ;;  %v461_v44 = vpop.f32.mrb[5].mxu1 }
 0x10c   : > { %814 = vst [vmem:[%s1261_s9] sm:$0xff] %v1001_v31  ;;  %v1005_v41 = vpack.c.bf16 %v695_v32, %v694_v29  ;;  %v615_v43 = vmul.f32 %v1229_v60, %v408_v40  ;;  %v410_v45 = vpop.f32.mrb[6].mxu0  ;;  %815 = vst [vmem:[%s1261_s9 + $0x8] sm:$0xff] %v1002_v36  ;;  %v1006_v46 = vpack.c.bf16 %v697_v37, %v696_v33  ;;  %v463_v49 = vpop.f32.mrb[6].mxu1 }
 0x10d   : > { %v617_v47 = vmul.f32 %v1229_v60, %v461_v44  ;;  %v622_v48 = vmul.f32 %v1233_v62, %v410_v45  ;;  %v670_v50 = vadd.f32 %v1255_v30, %v614_v38  ;;  %v412_v51 = vpop.f32.mrb[7].mxu0  ;;  %v624_v52 = vmul.f32 %v1233_v62, %v463_v49  ;;  %v465_v56 = vpop.f32.mrb[7].mxu1 }
 0x10e   : > { %818 = vst [vmem:[%s1261_s9 + $0x20] sm:$0xff] %v1005_v41  ;;  %v671_v53 = vadd.f32 %v1255_v30, %v615_v43  ;;  %v672_v54 = vadd.f32 %v1255_v30, %v616_v42  ;;  %v623_v55 = vmul.f32 %v1233_v62, %v412_v51  ;;  %819 = vst [vmem:[%s1261_s9 + $0x28] sm:$0xff] %v1006_v46 }
 0x10f   : > { %v673_v57 = vadd.f32 %v1255_v30, %v617_v47  ;;  %v702_v58 = vmax.f32 %v670_v50, 0.0  ;;  %v625_v0 = vmul.f32 %v1233_v62, %v465_v56  ;;  %v678_v2 = vadd.f32 %v1257_v35, %v622_v48 }
 0x110   : > { %v703_v3 = vmax.f32 %v671_v53, 0.0  ;;  %v704_v4 = vmax.f32 %v672_v54, 0.0  ;;  %v679_v5 = vadd.f32 %v1257_v35, %v623_v55  ;;  %v680_v6 = vadd.f32 %v1257_v35, %v624_v52 }
 0x111   : > { %v705_v7 = vmax.f32 %v673_v57, 0.0  ;;  %v681_v8 = vadd.f32 %v1257_v35, %v625_v0  ;;  %v710_v9 = vmax.f32 %v678_v2, 0.0 }
 0x112   : > { %v1009_v10 = vpack.c.bf16 %v703_v3, %v702_v58  ;;  %v711_v11 = vmax.f32 %v679_v5, 0.0  ;;  %v712_v12 = vmax.f32 %v680_v6, 0.0  ;;  %v502_v13 = vpop.f32.mrb[8].mxu0  ;;  %v555_v17 = vpop.f32.mrb[8].mxu1 }
 0x113   : > { %v1010_v14 = vpack.c.bf16 %v705_v7, %v704_v4  ;;  %v713_v15 = vmax.f32 %v681_v8, 0.0  ;;  %v602_v16 = vmul.f32 %v1227_v59, %v502_v13  ;;  %v504_v18 = vpop.f32.mrb[9].mxu0  ;;  %v604_v20 = vmul.f32 %v1227_v59, %v555_v17  ;;  %v557_v22 = vpop.f32.mrb[9].mxu1 }
 0x114   : > { %822 = vst [vmem:[%s1261_s9 + $0x40] sm:$0xff] %v1009_v10  ;;  %v1013_v19 = vpack.c.bf16 %v711_v11, %v710_v9  ;;  %v603_v21 = vmul.f32 %v1227_v59, %v504_v18  ;;  %v506_v23 = vpop.f32.mrb[10].mxu0  ;;  %v605_v26 = vmul.f32 %v1227_v59, %v557_v22  ;;  %v559_v28 = vpop.f32.mrb[10].mxu1 }
 0x115   : > { %823 = vst [vmem:[%s1261_s9 + $0x48] sm:$0xff] %v1010_v14  ;;  %v1014_v24 = vpack.c.bf16 %v713_v15, %v712_v12  ;;  %v658_v25 = vadd.f32 %v1235_v63, %v602_v16  ;;  %v610_v27 = vmul.f32 %v1231_v61, %v506_v23  ;;  %v508_v29 = vpop.f32.mrb[11].mxu0  ;;  %v660_v31 = vadd.f32 %v1235_v63, %v604_v20  ;;  %v561_v36 = vpop.f32.mrb[11].mxu1 }
 0x116   : > { %826 = vst [vmem:[%s1261_s9 + $0x60] sm:$0xff] %v1013_v19  ;;  %v659_v32 = vadd.f32 %v1235_v63, %v603_v21  ;;  %v612_v33 = vmul.f32 %v1231_v61, %v559_v28  ;;  %v611_v34 = vmul.f32 %v1231_v61, %v508_v29  ;;  %v661_v38 = vadd.f32 %v1235_v63, %v605_v26  ;;  %v854_v26 = vld [vmem:[%s1261_s9 + $0x8] sm:$0xff] (%p1127_p5)  ;;  %v860_v29 = vld [vmem:[%s1261_s9 + $0x20] sm:$0xff] (%p1127_p5) }
 0x117   : > { %827 = vst [vmem:[%s1261_s9 + $0x68] sm:$0xff] %v1014_v24  ;;  %v690_v37 = vmax.f32 %v658_v25, 0.0  ;;  %v666_v59 = vadd.f32 %v1237_v1, %v610_v27  ;;  %v613_v39 = vmul.f32 %v1231_v61, %v561_v36  ;;  %v692_v40 = vmax.f32 %v660_v31, 0.0  ;;  %v862_v31 = vld [vmem:[%s1261_s9 + $0x28] sm:$0xff] (%p1127_p5)  ;;  %855 = vst [vmem:[%s839_s23 + $0x8] sm:$0xff] (%p1127_p5), %v854_v26 }
 0x118   : > { %v691_v41 = vmax.f32 %v659_v32, 0.0  ;;  %v668_v42 = vadd.f32 %v1237_v1, %v612_v33  ;;  %v667_v43 = vadd.f32 %v1237_v1, %v611_v34  ;;  %v693_v44 = vmax.f32 %v661_v38, 0.0  ;;  %861 = vst [vmem:[%s839_s23 + $0x40] sm:$0xff] (%p1127_p5), %v860_v29  ;;  %863 = vst [vmem:[%s839_s23 + $0x48] sm:$0xff] (%p1127_p5), %v862_v31 }
 0x119   : > { %v698_v45 = vmax.f32 %v666_v59, 0.0  ;;  %v669_v46 = vadd.f32 %v1237_v1, %v613_v39 }
 0x11a   : > { %v1003_v47 = vpack.c.bf16 %v691_v41, %v690_v37  ;;  %v700_v48 = vmax.f32 %v668_v42, 0.0  ;;  %v699_v49 = vmax.f32 %v667_v43, 0.0  ;;  %v512_v63 = vpop.f32.mrb[12].mxu0  ;;  %v1004_v50 = vpack.c.bf16 %v693_v44, %v692_v40  ;;  %v565_v52 = vpop.f32.mrb[12].mxu1 }
 0x11b   : > { %v701_v51 = vmax.f32 %v669_v46, 0.0  ;;  %v618_v61 = vmul.f32 %v1229_v60, %v512_v63  ;;  %v514_v53 = vpop.f32.mrb[13].mxu0  ;;  %v620_v55 = vmul.f32 %v1229_v60, %v565_v52  ;;  %v567_v1 = vpop.f32.mrb[13].mxu1  ;;  %v868_v34 = vld [vmem:[%s1261_s9 + $0x40] sm:$0xff] (%p1127_p5) }
 0x11c   : > { %816 = vst [vmem:[%s1261_s9 + $0x10] sm:$0xff] %v1003_v47  ;;  %v1007_v54 = vpack.c.bf16 %v699_v49, %v698_v45  ;;  %v619_v56 = vmul.f32 %v1229_v60, %v514_v53  ;;  %v516_v57 = vpop.f32.mrb[14].mxu0  ;;  %817 = vst [vmem:[%s1261_s9 + $0x18] sm:$0xff] %v1004_v50  ;;  %v621_v2 = vmul.f32 %v1229_v60, %v567_v1  ;;  %v569_v4 = vpop.f32.mrb[14].mxu1  ;;  %v870_v36 = vld [vmem:[%s1261_s9 + $0x48] sm:$0xff] (%p1127_p5) }
 0x11d   : > { %v1008_v58 = vpack.c.bf16 %v701_v51, %v700_v48  ;;  %v674_v0 = vadd.f32 %v1255_v30, %v618_v61  ;;  %v626_v3 = vmul.f32 %v1233_v62, %v516_v57  ;;  %v518_v5 = vpop.f32.mrb[15].mxu0  ;;  %v676_v6 = vadd.f32 %v1255_v30, %v620_v55  ;;  %v571_v10 = vpop.f32.mrb[15].mxu1  ;;  %869 = vst [vmem:[%s839_s23 + $0x80] sm:$0xff] (%p1127_p5), %v868_v34  ;;  %v876_v59 = vld [vmem:[%s1261_s9 + $0x60] sm:$0xff] (%p1127_p5) }
 0x11e   : > { %820 = vst [vmem:[%s1261_s9 + $0x30] sm:$0xff] %v1007_v54  ;;  %v675_v7 = vadd.f32 %v1255_v30, %v619_v56  ;;  %v628_v8 = vmul.f32 %v1233_v62, %v569_v4  ;;  %v627_v9 = vmul.f32 %v1233_v62, %v518_v5  ;;  %v677_v12 = vadd.f32 %v1255_v30, %v621_v2  ;;  %v878_v39 = vld [vmem:[%s1261_s9 + $0x68] sm:$0xff] (%p1127_p5) }
 0x11f   : > { %821 = vst [vmem:[%s1261_s9 + $0x38] sm:$0xff] %v1008_v58  ;;  %v706_v11 = vmax.f32 %v674_v0, 0.0  ;;  %v682_v60 = vadd.f32 %v1257_v35, %v626_v3  ;;  %v629_v13 = vmul.f32 %v1233_v62, %v571_v10  ;;  %v708_v14 = vmax.f32 %v676_v6, 0.0  ;;  %871 = vst [vmem:[%s839_s23 + $0x88] sm:$0xff] (%p1127_p5), %v870_v36 }
 0x120   : > { %v707_v15 = vmax.f32 %v675_v7, 0.0  ;;  %v684_v16 = vadd.f32 %v1257_v35, %v628_v8  ;;  %v683_v17 = vadd.f32 %v1257_v35, %v627_v9  ;;  %v709_v18 = vmax.f32 %v677_v12, 0.0  ;;  %877 = vst [vmem:[%s839_s23 + $0xc0] sm:$0xff] (%p1127_p5), %v876_v59  ;;  %879 = vst [vmem:[%s839_s23 + $0xc8] sm:$0xff] (%p1127_p5), %v878_v39 }
 0x121   : > { %v714_v19 = vmax.f32 %v682_v60, 0.0  ;;  %v685_v20 = vadd.f32 %v1257_v35, %v629_v13  ;;  %836 = sbr.rel (!%p1127_p5) target bundleno = 304 (0x130), region = 63  ;;  %v852_v35 = vld [vmem:[%s1261_s9] sm:$0xff] (%p1127_p5) }
 0x122   : > { %v1011_v21 = vpack.c.bf16 %v707_v15, %v706_v11  ;;  %v716_v22 = vmax.f32 %v684_v16, 0.0  ;;  %v715_v30 = vmax.f32 %v683_v17, 0.0  ;;  %v1012_v23 = vpack.c.bf16 %v709_v18, %v708_v14  ;;  %853 = vst [vmem:[%s839_s23] sm:$0xff] (%p1127_p5), %v852_v35 }
 0x123   : > { %v717_v24 = vmax.f32 %v685_v20, 0.0  ;;  %v856_v27 = vld [vmem:[%s1261_s9 + $0x10] sm:$0xff] (%p1127_p5)  ;;  %v858_v28 = vld [vmem:[%s1261_s9 + $0x18] sm:$0xff] (%p1127_p5) }
 0x124   : > { %824 = vst [vmem:[%s1261_s9 + $0x50] sm:$0xff] %v1011_v21  ;;  %v1015_v25 = vpack.c.bf16 %v715_v30, %v714_v19  ;;  %825 = vst [vmem:[%s1261_s9 + $0x58] sm:$0xff] %v1012_v23 }
 0x125   : > { %v1016_v62 = vpack.c.bf16 %v717_v24, %v716_v22  ;;  %857 = vst [vmem:[%s839_s23 + $0x10] sm:$0xff] (%p1127_p5), %v856_v27  ;;  %859 = vst [vmem:[%s839_s23 + $0x18] sm:$0xff] (%p1127_p5), %v858_v28  ;;  %v864_v32 = vld [vmem:[%s1261_s9 + $0x30] sm:$0xff] (%p1127_p5) }
 0x126   : > { %828 = vst [vmem:[%s1261_s9 + $0x70] sm:$0xff] %v1015_v25  ;;  %v866_v33 = vld [vmem:[%s1261_s9 + $0x38] sm:$0xff] (%p1127_p5)  ;;  %865 = vst [vmem:[%s839_s23 + $0x50] sm:$0xff] (%p1127_p5), %v864_v32 }
 0x127   : > { %829 = vst [vmem:[%s1261_s9 + $0x78] sm:$0xff] %v1016_v62  ;;  %867 = vst [vmem:[%s839_s23 + $0x58] sm:$0xff] (%p1127_p5), %v866_v33 }
 0x12b   : > { %v872_v37 = vld [vmem:[%s1261_s9 + $0x50] sm:$0xff]  ;;  %v874_v38 = vld [vmem:[%s1261_s9 + $0x58] sm:$0xff] }
 0x12c   : > { %873 = vst [vmem:[%s839_s23 + $0x90] sm:$0xff] %v872_v37  ;;  %875 = vst [vmem:[%s839_s23 + $0x98] sm:$0xff] %v874_v38 }
 0x12d   : > { %v880_v40 = vld [vmem:[%s1261_s9 + $0x70] sm:$0xff] }
 0x12e   : > { %881 = vst [vmem:[%s839_s23 + $0xd0] sm:$0xff] %v880_v40  ;;  %v882_v41 = vld [vmem:[%s1261_s9 + $0x78] sm:$0xff] }
 0x12f   : > { %883 = vst [vmem:[%s839_s23 + $0xd8] sm:$0xff] %v882_v41 }
 0x130 PF: > { %p11_p10 = scmp.ge.s32.totalorder %s1114_s19, 4   ;;  %s1365_s15 = smov %s1065_s16 }
 0x131   : > { %s1366_s16 = smov %s1125_s22  ;;  %s1367_s17 = smov %s1114_s19 }
 0x132   :  { %13 = sbr.rel (!%p11_p10) target bundleno = 2 (0x2), region = 117 }

// kernel: advantage_forward.6
= control target key start
LH: loop header
LB: loop body
LE: loop exit
PB: predicated region body
PF: predicated region fallthrough
CT: control target
= control target key end

     0   :  { %s1759_s15 = smov 0   ;;  %s1761_s16 = smov 0   ;;  %s2151_s0 = inlined_call_operand.vmem [shape: bf16[64,512], index: 0, kind: input, shape index: {}]   ;;  %s2152_s1 = inlined_call_operand.vmem [shape: bf16[512,392], index: 1, kind: input, shape index: {}]   ;;  %s2153_s2 = inlined_call_operand.vmem [shape: f32[64,1], index: 2, kind: input, shape index: {}]   ;;  %s2154_s3 = inlined_call_operand.vmem [shape: f32[64,1], index: 3, kind: input, shape index: {}]   ;;  %s2155_s4 = inlined_call_operand.vmem [shape: bf16[64,392], index: 4, kind: output, shape index: {}]  }
   0x1   :  { %s1763_s17 = smov 0  }
   0x2 LB: > { %s1433_s18 = sadd.s32 4294967295, %s1731_s17   ;;  %s1776_s19 = sadd.s32 1, %s1731_s17   ;;  %s1731_s17 = sphi %s1763_s17, %s2159_s17   ;;  %s1727_s16 = sphi %s1761_s16, %s2158_s16   ;;  %s1723_s15 = sphi %s1759_s15, %s2157_s15  }
   0x3   : > { %s39_s20 = ssub.s32 %s1731_s17, %s1776_s19  ;;  %s42_s21 = sadd.s32 1, %s1727_s16 }
   0x4   : > { %p40_p0 = scmp.eq.s32.totalorder %s39_s20, 0  ;;  %p49_p1 = scmp.ne.s32.totalorder %s1727_s16, %s1723_s15 }
   0x5   : > { %p50_p2 = scmp.eq.s32.totalorder %s1731_s17, 0  ;;  %p121_p3 = scmp.eq.s32.totalorder %s1433_s18, 1 }
   0x6   : > { %s1787_s22 = scalar_select %p40_p0, %s1727_s16, %s42_s21  }
   0x7   : > { %p51_p4 = por %p50_p2, %p49_p1  ;;  %p1789_p5 = por %p121_p3, %p49_p1 }
   0x8   : > { %p1436_p6 = scmp.ge.s32.totalorder %s1731_s17, 2 }
   0xa   : > { %152 = sbr.rel (%p1436_p6) target bundleno = 53 (0x35), region = 28 }
  0x11   : > { %155 = sbr.rel (!%p51_p4) target bundleno = 53 (0x35), region = 32  ;;  %s157_s24 = sand.u32 (%p51_p4), 1, %s1727_s16  }
  0x12   : > { %s1536_s25 = sshll.u32 (%p51_p4), %s1731_s17, 3  ;;  %s1437_s26 = sshll.u32 (%p51_p4), %s157_s24, 9 }
  0x13   : > { %s1799_s29 = scalar_lea.vmem (%p51_p4), %s2152_s1, %s1536_s25  ;;  %s1804_s30 = scalar_lea.vmem (%p51_p4), [#allocation2], %s1437_s26 }
  0x14   : > { %v316_v0 = vld [vmem:[%s1799_s29] sm:$0xff] (%p51_p4)  ;;  %v318_v1 = vld [vmem:[%s1799_s29 + $0x10] sm:$0xff] (%p51_p4) }
  0x15   : > { %v320_v2 = vld [vmem:[%s1799_s29 + $0x20] sm:$0xff] (%p51_p4)  ;;  %317 = vst [vmem:[%s1804_s30] sm:$0xff] (%p51_p4), %v316_v0  ;;  %319 = vst [vmem:[%s1804_s30 + $0x8] sm:$0xff] (%p51_p4), %v318_v1  ;;  %v322_v3 = vld [vmem:[%s1799_s29 + $0x30] sm:$0xff] (%p51_p4) }
  0x16   : > { %321 = vst [vmem:[%s1804_s30 + $0x10] sm:$0xff] (%p51_p4), %v320_v2  ;;  %v324_v4 = vld [vmem:[%s1799_s29 + $0x40] sm:$0xff] (%p51_p4)  ;;  %v326_v5 = vld [vmem:[%s1799_s29 + $0x50] sm:$0xff] (%p51_p4)  ;;  %323 = vst [vmem:[%s1804_s30 + $0x18] sm:$0xff] (%p51_p4), %v322_v3 }
  0x17   : > { %325 = vst [vmem:[%s1804_s30 + $0x20] sm:$0xff] (%p51_p4), %v324_v4  ;;  %327 = vst [vmem:[%s1804_s30 + $0x28] sm:$0xff] (%p51_p4), %v326_v5  ;;  %v328_v6 = vld [vmem:[%s1799_s29 + $0x60] sm:$0xff] (%p51_p4)  ;;  %v330_v7 = vld [vmem:[%s1799_s29 + $0x70] sm:$0xff] (%p51_p4) }
  0x18   : > { %v332_v8 = vld [vmem:[%s1799_s29 + $0x80] sm:$0xff]  ;;  %329 = vst [vmem:[%s1804_s30 + $0x30] sm:$0xff] %v328_v6  ;;  %331 = vst [vmem:[%s1804_s30 + $0x38] sm:$0xff] %v330_v7  ;;  %v334_v9 = vld [vmem:[%s1799_s29 + $0x90] sm:$0xff] }
  0x19   : > { %333 = vst [vmem:[%s1804_s30 + $0x40] sm:$0xff] %v332_v8  ;;  %v336_v10 = vld [vmem:[%s1799_s29 + $0xa0] sm:$0xff]  ;;  %v338_v11 = vld [vmem:[%s1799_s29 + $0xb0] sm:$0xff]  ;;  %335 = vst [vmem:[%s1804_s30 + $0x48] sm:$0xff] %v334_v9 }
  0x1a   : > { %337 = vst [vmem:[%s1804_s30 + $0x50] sm:$0xff] %v336_v10  ;;  %339 = vst [vmem:[%s1804_s30 + $0x58] sm:$0xff] %v338_v11  ;;  %v340_v12 = vld [vmem:[%s1799_s29 + $0xc0] sm:$0xff]  ;;  %v342_v13 = vld [vmem:[%s1799_s29 + $0xd0] sm:$0xff] }
  0x1b   : > { %v344_v14 = vld [vmem:[%s1799_s29 + $0xe0] sm:$0xff]  ;;  %341 = vst [vmem:[%s1804_s30 + $0x60] sm:$0xff] %v340_v12  ;;  %343 = vst [vmem:[%s1804_s30 + $0x68] sm:$0xff] %v342_v13  ;;  %v346_v15 = vld [vmem:[%s1799_s29 + $0xf0] sm:$0xff] }
  0x1c   : > { %345 = vst [vmem:[%s1804_s30 + $0x70] sm:$0xff] %v344_v14  ;;  %v348_v16 = vld [vmem:[%s1799_s29 + $0x100] sm:$0xff]  ;;  %v350_v17 = vld [vmem:[%s1799_s29 + $0x110] sm:$0xff]  ;;  %347 = vst [vmem:[%s1804_s30 + $0x78] sm:$0xff] %v346_v15 }
  0x1d   : > { %349 = vst [vmem:[%s1804_s30 + $0x80] sm:$0xff] %v348_v16  ;;  %351 = vst [vmem:[%s1804_s30 + $0x88] sm:$0xff] %v350_v17  ;;  %v352_v18 = vld [vmem:[%s1799_s29 + $0x120] sm:$0xff]  ;;  %v354_v19 = vld [vmem:[%s1799_s29 + $0x130] sm:$0xff] }
  0x1e   : > { %v356_v20 = vld [vmem:[%s1799_s29 + $0x140] sm:$0xff]  ;;  %353 = vst [vmem:[%s1804_s30 + $0x90] sm:$0xff] %v352_v18  ;;  %355 = vst [vmem:[%s1804_s30 + $0x98] sm:$0xff] %v354_v19  ;;  %v358_v21 = vld [vmem:[%s1799_s29 + $0x150] sm:$0xff] }
  0x1f   : > { %357 = vst [vmem:[%s1804_s30 + $0xa0] sm:$0xff] %v356_v20  ;;  %v360_v22 = vld [vmem:[%s1799_s29 + $0x160] sm:$0xff]  ;;  %v362_v23 = vld [vmem:[%s1799_s29 + $0x170] sm:$0xff]  ;;  %359 = vst [vmem:[%s1804_s30 + $0xa8] sm:$0xff] %v358_v21 }
  0x20   : > { %361 = vst [vmem:[%s1804_s30 + $0xb0] sm:$0xff] %v360_v22  ;;  %363 = vst [vmem:[%s1804_s30 + $0xb8] sm:$0xff] %v362_v23  ;;  %v364_v24 = vld [vmem:[%s1799_s29 + $0x180] sm:$0xff]  ;;  %v366_v25 = vld [vmem:[%s1799_s29 + $0x190] sm:$0xff] }
  0x21   : > { %v368_v26 = vld [vmem:[%s1799_s29 + $0x1a0] sm:$0xff]  ;;  %365 = vst [vmem:[%s1804_s30 + $0xc0] sm:$0xff] %v364_v24  ;;  %367 = vst [vmem:[%s1804_s30 + $0xc8] sm:$0xff] %v366_v25  ;;  %v370_v27 = vld [vmem:[%s1799_s29 + $0x1b0] sm:$0xff] }
  0x22   : > { %369 = vst [vmem:[%s1804_s30 + $0xd0] sm:$0xff] %v368_v26  ;;  %v372_v28 = vld [vmem:[%s1799_s29 + $0x1c0] sm:$0xff]  ;;  %v374_v29 = vld [vmem:[%s1799_s29 + $0x1d0] sm:$0xff]  ;;  %371 = vst [vmem:[%s1804_s30 + $0xd8] sm:$0xff] %v370_v27 }
  0x23   : > { %373 = vst [vmem:[%s1804_s30 + $0xe0] sm:$0xff] %v372_v28  ;;  %375 = vst [vmem:[%s1804_s30 + $0xe8] sm:$0xff] %v374_v29  ;;  %v376_v30 = vld [vmem:[%s1799_s29 + $0x1e0] sm:$0xff]  ;;  %v378_v31 = vld [vmem:[%s1799_s29 + $0x1f0] sm:$0xff] }
  0x24   : > { %v380_v32 = vld [vmem:[%s1799_s29 + $0x200] sm:$0xff]  ;;  %377 = vst [vmem:[%s1804_s30 + $0xf0] sm:$0xff] %v376_v30  ;;  %379 = vst [vmem:[%s1804_s30 + $0xf8] sm:$0xff] %v378_v31  ;;  %v382_v33 = vld [vmem:[%s1799_s29 + $0x210] sm:$0xff] }
  0x25   : > { %381 = vst [vmem:[%s1804_s30 + $0x100] sm:$0xff] %v380_v32  ;;  %v384_v34 = vld [vmem:[%s1799_s29 + $0x220] sm:$0xff]  ;;  %v386_v35 = vld [vmem:[%s1799_s29 + $0x230] sm:$0xff]  ;;  %383 = vst [vmem:[%s1804_s30 + $0x108] sm:$0xff] %v382_v33 }
  0x26   : > { %385 = vst [vmem:[%s1804_s30 + $0x110] sm:$0xff] %v384_v34  ;;  %387 = vst [vmem:[%s1804_s30 + $0x118] sm:$0xff] %v386_v35  ;;  %v388_v36 = vld [vmem:[%s1799_s29 + $0x240] sm:$0xff]  ;;  %v390_v37 = vld [vmem:[%s1799_s29 + $0x250] sm:$0xff] }
  0x27   : > { %v392_v38 = vld [vmem:[%s1799_s29 + $0x260] sm:$0xff]  ;;  %389 = vst [vmem:[%s1804_s30 + $0x120] sm:$0xff] %v388_v36  ;;  %391 = vst [vmem:[%s1804_s30 + $0x128] sm:$0xff] %v390_v37  ;;  %v394_v39 = vld [vmem:[%s1799_s29 + $0x270] sm:$0xff] }
  0x28   : > { %393 = vst [vmem:[%s1804_s30 + $0x130] sm:$0xff] %v392_v38  ;;  %v396_v40 = vld [vmem:[%s1799_s29 + $0x280] sm:$0xff]  ;;  %v398_v41 = vld [vmem:[%s1799_s29 + $0x290] sm:$0xff]  ;;  %395 = vst [vmem:[%s1804_s30 + $0x138] sm:$0xff] %v394_v39 }
  0x29   : > { %397 = vst [vmem:[%s1804_s30 + $0x140] sm:$0xff] %v396_v40  ;;  %399 = vst [vmem:[%s1804_s30 + $0x148] sm:$0xff] %v398_v41  ;;  %v400_v42 = vld [vmem:[%s1799_s29 + $0x2a0] sm:$0xff]  ;;  %v402_v43 = vld [vmem:[%s1799_s29 + $0x2b0] sm:$0xff] }
  0x2a   : > { %v404_v44 = vld [vmem:[%s1799_s29 + $0x2c0] sm:$0xff]  ;;  %401 = vst [vmem:[%s1804_s30 + $0x150] sm:$0xff] %v400_v42  ;;  %403 = vst [vmem:[%s1804_s30 + $0x158] sm:$0xff] %v402_v43  ;;  %v406_v45 = vld [vmem:[%s1799_s29 + $0x2d0] sm:$0xff] }
  0x2b   : > { %405 = vst [vmem:[%s1804_s30 + $0x160] sm:$0xff] %v404_v44  ;;  %v408_v46 = vld [vmem:[%s1799_s29 + $0x2e0] sm:$0xff]  ;;  %v410_v47 = vld [vmem:[%s1799_s29 + $0x2f0] sm:$0xff]  ;;  %407 = vst [vmem:[%s1804_s30 + $0x168] sm:$0xff] %v406_v45 }
  0x2c   : > { %409 = vst [vmem:[%s1804_s30 + $0x170] sm:$0xff] %v408_v46  ;;  %411 = vst [vmem:[%s1804_s30 + $0x178] sm:$0xff] %v410_v47  ;;  %v412_v48 = vld [vmem:[%s1799_s29 + $0x300] sm:$0xff]  ;;  %v414_v49 = vld [vmem:[%s1799_s29 + $0x310] sm:$0xff] }
  0x2d   : > { %v416_v50 = vld [vmem:[%s1799_s29 + $0x320] sm:$0xff]  ;;  %413 = vst [vmem:[%s1804_s30 + $0x180] sm:$0xff] %v412_v48  ;;  %415 = vst [vmem:[%s1804_s30 + $0x188] sm:$0xff] %v414_v49  ;;  %v418_v51 = vld [vmem:[%s1799_s29 + $0x330] sm:$0xff] }
  0x2e   : > { %417 = vst [vmem:[%s1804_s30 + $0x190] sm:$0xff] %v416_v50  ;;  %v420_v52 = vld [vmem:[%s1799_s29 + $0x340] sm:$0xff]  ;;  %v422_v53 = vld [vmem:[%s1799_s29 + $0x350] sm:$0xff]  ;;  %419 = vst [vmem:[%s1804_s30 + $0x198] sm:$0xff] %v418_v51 }
  0x2f   : > { %421 = vst [vmem:[%s1804_s30 + $0x1a0] sm:$0xff] %v420_v52  ;;  %423 = vst [vmem:[%s1804_s30 + $0x1a8] sm:$0xff] %v422_v53  ;;  %v424_v54 = vld [vmem:[%s1799_s29 + $0x360] sm:$0xff]  ;;  %v426_v55 = vld [vmem:[%s1799_s29 + $0x370] sm:$0xff] }
  0x30   : > { %v428_v56 = vld [vmem:[%s1799_s29 + $0x380] sm:$0xff]  ;;  %425 = vst [vmem:[%s1804_s30 + $0x1b0] sm:$0xff] %v424_v54  ;;  %427 = vst [vmem:[%s1804_s30 + $0x1b8] sm:$0xff] %v426_v55  ;;  %v430_v57 = vld [vmem:[%s1799_s29 + $0x390] sm:$0xff] }
  0x31   : > { %429 = vst [vmem:[%s1804_s30 + $0x1c0] sm:$0xff] %v428_v56  ;;  %v432_v58 = vld [vmem:[%s1799_s29 + $0x3a0] sm:$0xff]  ;;  %v434_v59 = vld [vmem:[%s1799_s29 + $0x3b0] sm:$0xff]  ;;  %431 = vst [vmem:[%s1804_s30 + $0x1c8] sm:$0xff] %v430_v57 }
  0x32   : > { %433 = vst [vmem:[%s1804_s30 + $0x1d0] sm:$0xff] %v432_v58  ;;  %435 = vst [vmem:[%s1804_s30 + $0x1d8] sm:$0xff] %v434_v59  ;;  %v436_v60 = vld [vmem:[%s1799_s29 + $0x3c0] sm:$0xff]  ;;  %v438_v61 = vld [vmem:[%s1799_s29 + $0x3d0] sm:$0xff] }
  0x33   : > { %v440_v62 = vld [vmem:[%s1799_s29 + $0x3e0] sm:$0xff]  ;;  %437 = vst [vmem:[%s1804_s30 + $0x1e0] sm:$0xff] %v436_v60  ;;  %439 = vst [vmem:[%s1804_s30 + $0x1e8] sm:$0xff] %v438_v61  ;;  %v442_v63 = vld [vmem:[%s1799_s29 + $0x3f0] sm:$0xff] }
  0x34   : > { %441 = vst [vmem:[%s1804_s30 + $0x1f0] sm:$0xff] %v440_v62  ;;  %443 = vst [vmem:[%s1804_s30 + $0x1f8] sm:$0xff] %v442_v63 }
  0x35 PF: > { %p1440_p7 = scmp.ge.s32.totalorder %s1731_s17, 1  ;;  %p448_p8 = scmp.lt.s32.totalorder %s1731_s17, 3 }
  0x37   : > { %p449_p9 = pnand %p1440_p7, %p448_p8 }
  0x38   : > { %s455_s5 = sand.u32 (!%p449_p9), 1, %s1723_s15   ;;  %v1687_v0 = vld [vmem:[%s2151_s0 + $0x4] ss:$16 sps:$4 sm:$0xff] (!%p449_p9)   ;;  %v1733_v1 = vmov (!%p449_p9), 0   ;;  %v1690_v2 = vld [vmem:[%s2151_s0 + $0xc] ss:$16 sps:$4 sm:$0xff] (!%p449_p9)  }
  0x39   : > { %452 = sbr.rel (%p449_p9) target bundleno = 383 (0x17f), region = 70  ;;  %s1441_s6 = sshll.u32 (!%p449_p9), %s455_s5, 9  ;;  %1588 = vset.pattern.permute.xlu1 (!%p449_p9), %v1733_v1  ;;  %1587 = vset.pattern.permute.xlu0 (!%p449_p9), %v1733_v1  ;;  %v1109_v57 = vld [vmem:[%s2153_s2 + $0x10] sm:$0xff] (!%p449_p9)  ;;  %v1107_v58 = vld [vmem:[%s2153_s2] sm:$0xff] (!%p449_p9)  ;;  %v1110_v61 = vld [vmem:[%s2153_s2 + $0x18] sm:$0xff] (!%p449_p9) }
  0x3a   : > { %s1942_s11 = scalar_lea.vmem (!%p449_p9), [#allocation2], %s1441_s6  ;;  %993 = vmatprep.mubr.bf16.mxu1 (!%p449_p9), %v1687_v0  ;;  %1066 = vmatprep.mubr.bf16.mxu0 (!%p449_p9), %v1690_v2  ;;  %v1108_v62 = vld [vmem:[%s2153_s2 + $0x8] sm:$0xff] (!%p449_p9)  ;;  %s1442_s25 = sshll.u32 (!%p449_p9), %s455_s5, 6 }
  0x3b   : > { %v1589_v3 = vld [vmem:[%s1942_s11 + $0x4] ss:$8 sps:$4 sm:$0xff] (!%p449_p9)   ;;  %v1593_v5 = vld [vmem:[%s1942_s11] ss:$8 sps:$4 sm:$0xff] (!%p449_p9)   ;;  %v1595_v7 = vld [vmem:[%s1942_s11 + $0x14] ss:$8 sps:$4 sm:$0xff] (!%p449_p9)   ;;  %1127 = vperm.xlu1 (!%p449_p9), %1588, %v1109_v57   ;;  %1117 = vperm.xlu0 (!%p449_p9), %1587, %v1107_v58  }
  0x3c   : > { %v1591_v4 = vld [vmem:[%s1942_s11 + $0x104] ss:$8 sps:$4 sm:$0xff] (!%p449_p9)   ;;  %961 = vmatprep.subr.bf16.mxu1 (!%p449_p9), %v1589_v3  ;;  %v1594_v6 = vld [vmem:[%s1942_s11 + $0x100] ss:$8 sps:$4 sm:$0xff] (!%p449_p9)   ;;  %v1597_v8 = vld [vmem:[%s1942_s11 + $0x114] ss:$8 sps:$4 sm:$0xff] (!%p449_p9)  }
  0x3d   : > { %1034 = vmatprep.subr.bf16.mxu0 (!%p449_p9), %v1591_v4  ;;  %962 = vmatpush1.bf16.msra.mxu1 (!%p449_p9), %v1593_v5  ;;  %v1599_v9 = vld [vmem:[%s1942_s11 + $0x10] ss:$8 sps:$4 sm:$0xff] (!%p449_p9)   ;;  %v1601_v11 = vld [vmem:[%s1942_s11 + $0x24] ss:$8 sps:$4 sm:$0xff] (!%p449_p9)   ;;  %v1605_v13 = vld [vmem:[%s1942_s11 + $0x20] ss:$8 sps:$4 sm:$0xff] (!%p449_p9)  }
  0x3e   : > { %1035 = vmatpush1.bf16.msra.mxu0 (!%p449_p9), %v1594_v6  ;;  %963 = vmatprep.subr.bf16.mxu1 (!%p449_p9), %v1595_v7  ;;  %v1600_v10 = vld [vmem:[%s1942_s11 + $0x110] ss:$8 sps:$4 sm:$0xff] (!%p449_p9)   ;;  %v1603_v12 = vld [vmem:[%s1942_s11 + $0x124] ss:$8 sps:$4 sm:$0xff] (!%p449_p9)   ;;  %v1606_v14 = vld [vmem:[%s1942_s11 + $0x120] ss:$8 sps:$4 sm:$0xff] (!%p449_p9)  }
  0x3f   : > { %1036 = vmatprep.subr.bf16.mxu0 (!%p449_p9), %v1597_v8  ;;  %v1607_v15 = vld [vmem:[%s1942_s11 + $0x34] ss:$8 sps:$4 sm:$0xff] (!%p449_p9)   ;;  %v1611_v17 = vld [vmem:[%s1942_s11 + $0x30] ss:$8 sps:$4 sm:$0xff] (!%p449_p9)   ;;  %v1613_v19 = vld [vmem:[%s1942_s11 + $0x44] ss:$8 sps:$4 sm:$0xff] (!%p449_p9)   ;;  %1132 = vperm.xlu1 (!%p449_p9), %1588, %v1110_v61  }
  0x40   : > { %v1609_v16 = vld [vmem:[%s1942_s11 + $0x134] ss:$8 sps:$4 sm:$0xff]   ;;  %v1612_v18 = vld [vmem:[%s1942_s11 + $0x130] ss:$8 sps:$4 sm:$0xff]   ;;  %v1615_v20 = vld [vmem:[%s1942_s11 + $0x144] ss:$8 sps:$4 sm:$0xff]   ;;  %1122 = vperm.xlu0 %1587, %v1108_v62  }
  0x41   : > { %964 = vmatpush1.bf16.msra.mxu1 %v1599_v9  ;;  %v1617_v21 = vld [vmem:[%s1942_s11 + $0x40] ss:$8 sps:$4 sm:$0xff]   ;;  %v1619_v23 = vld [vmem:[%s1942_s11 + $0x54] ss:$8 sps:$4 sm:$0xff]   ;;  %v1623_v25 = vld [vmem:[%s1942_s11 + $0x50] ss:$8 sps:$4 sm:$0xff]  }
  0x42   : > { %1037 = vmatpush1.bf16.msra.mxu0 %v1600_v10  ;;  %965 = vmatprep.subr.bf16.mxu1 %v1601_v11  ;;  %v1618_v22 = vld [vmem:[%s1942_s11 + $0x140] ss:$8 sps:$4 sm:$0xff]   ;;  %v1621_v24 = vld [vmem:[%s1942_s11 + $0x154] ss:$8 sps:$4 sm:$0xff]   ;;  %v1624_v26 = vld [vmem:[%s1942_s11 + $0x150] ss:$8 sps:$4 sm:$0xff]  }
  0x43   : > { %1038 = vmatprep.subr.bf16.mxu0 %v1603_v12  ;;  %v1625_v27 = vld [vmem:[%s1942_s11 + $0x64] ss:$8 sps:$4 sm:$0xff]   ;;  %v1629_v29 = vld [vmem:[%s1942_s11 + $0x60] ss:$8 sps:$4 sm:$0xff]   ;;  %v1631_v31 = vld [vmem:[%s1942_s11 + $0x74] ss:$8 sps:$4 sm:$0xff]  }
  0x44   : > { %v1627_v28 = vld [vmem:[%s1942_s11 + $0x164] ss:$8 sps:$4 sm:$0xff]   ;;  %v1630_v30 = vld [vmem:[%s1942_s11 + $0x160] ss:$8 sps:$4 sm:$0xff]   ;;  %v1633_v32 = vld [vmem:[%s1942_s11 + $0x174] ss:$8 sps:$4 sm:$0xff]  }
  0x45   : > { %966 = vmatpush1.bf16.msra.mxu1 %v1605_v13  ;;  %v1635_v33 = vld [vmem:[%s1942_s11 + $0x70] ss:$8 sps:$4 sm:$0xff]   ;;  %v1637_v35 = vld [vmem:[%s1942_s11 + $0x84] ss:$8 sps:$4 sm:$0xff]   ;;  %v1641_v37 = vld [vmem:[%s1942_s11 + $0x80] ss:$8 sps:$4 sm:$0xff]  }
  0x46   : > { %1039 = vmatpush1.bf16.msra.mxu0 %v1606_v14  ;;  %967 = vmatprep.subr.bf16.mxu1 %v1607_v15  ;;  %v1636_v34 = vld [vmem:[%s1942_s11 + $0x170] ss:$8 sps:$4 sm:$0xff]   ;;  %v1639_v36 = vld [vmem:[%s1942_s11 + $0x184] ss:$8 sps:$4 sm:$0xff]   ;;  %v1642_v38 = vld [vmem:[%s1942_s11 + $0x180] ss:$8 sps:$4 sm:$0xff]  }
  0x47   : > { %1040 = vmatprep.subr.bf16.mxu0 %v1609_v16  ;;  %v1643_v39 = vld [vmem:[%s1942_s11 + $0x94] ss:$8 sps:$4 sm:$0xff]   ;;  %v1647_v41 = vld [vmem:[%s1942_s11 + $0x90] ss:$8 sps:$4 sm:$0xff]   ;;  %v1649_v43 = vld [vmem:[%s1942_s11 + $0xa4] ss:$8 sps:$4 sm:$0xff]  }
  0x48   : > { %v1645_v40 = vld [vmem:[%s1942_s11 + $0x194] ss:$8 sps:$4 sm:$0xff]   ;;  %v1648_v42 = vld [vmem:[%s1942_s11 + $0x190] ss:$8 sps:$4 sm:$0xff]   ;;  %v1651_v44 = vld [vmem:[%s1942_s11 + $0x1a4] ss:$8 sps:$4 sm:$0xff]  }
  0x49   : > { %968 = vmatpush1.bf16.msra.mxu1 %v1611_v17  ;;  %v1653_v45 = vld [vmem:[%s1942_s11 + $0xa0] ss:$8 sps:$4 sm:$0xff]   ;;  %v1655_v47 = vld [vmem:[%s1942_s11 + $0xb4] ss:$8 sps:$4 sm:$0xff]   ;;  %v1659_v49 = vld [vmem:[%s1942_s11 + $0xb0] ss:$8 sps:$4 sm:$0xff]  }
  0x4a   : > { %1041 = vmatpush1.bf16.msra.mxu0 %v1612_v18  ;;  %969 = vmatprep.subr.bf16.mxu1 %v1613_v19  ;;  %v1654_v46 = vld [vmem:[%s1942_s11 + $0x1a0] ss:$8 sps:$4 sm:$0xff]   ;;  %v1657_v48 = vld [vmem:[%s1942_s11 + $0x1b4] ss:$8 sps:$4 sm:$0xff]   ;;  %v1660_v50 = vld [vmem:[%s1942_s11 + $0x1b0] ss:$8 sps:$4 sm:$0xff]  }
  0x4b   : > { %1042 = vmatprep.subr.bf16.mxu0 %v1615_v20  ;;  %v1661_v51 = vld [vmem:[%s1942_s11 + $0xc4] ss:$8 sps:$4 sm:$0xff]   ;;  %v1665_v53 = vld [vmem:[%s1942_s11 + $0xc0] ss:$8 sps:$4 sm:$0xff]   ;;  %v1667_v55 = vld [vmem:[%s1942_s11 + $0xd4] ss:$8 sps:$4 sm:$0xff]  }
  0x4c   : > { %v1663_v52 = vld [vmem:[%s1942_s11 + $0x1c4] ss:$8 sps:$4 sm:$0xff]   ;;  %v1666_v54 = vld [vmem:[%s1942_s11 + $0x1c0] ss:$8 sps:$4 sm:$0xff]   ;;  %v1669_v56 = vld [vmem:[%s1942_s11 + $0x1d4] ss:$8 sps:$4 sm:$0xff]  }
  0x4d   : > { %970 = vmatpush1.bf16.msra.mxu1 %v1617_v21  ;;  %v1671_v59 = vld [vmem:[%s1942_s11 + $0xd0] ss:$8 sps:$4 sm:$0xff]   ;;  %v1673_v63 = vld [vmem:[%s1942_s11 + $0xe4] ss:$8 sps:$4 sm:$0xff]   ;;  %v1677_v1 = vld [vmem:[%s1942_s11 + $0xe0] ss:$8 sps:$4 sm:$0xff]  }
  0x4e   : > { %1043 = vmatpush1.bf16.msra.mxu0 %v1618_v22  ;;  %971 = vmatprep.subr.bf16.mxu1 %v1619_v23  ;;  %v1672_v60 = vld [vmem:[%s1942_s11 + $0x1d0] ss:$8 sps:$4 sm:$0xff]   ;;  %v1675_v0 = vld [vmem:[%s1942_s11 + $0x1e4] ss:$8 sps:$4 sm:$0xff]   ;;  %v1678_v2 = vld [vmem:[%s1942_s11 + $0x1e0] ss:$8 sps:$4 sm:$0xff]  }
  0x4f   : > { %1044 = vmatprep.subr.bf16.mxu0 %v1621_v24  ;;  %v1112_v3 = vld [vmem:[%s2153_s2 + $0x28] sm:$0xff]  ;;  %v1111_v4 = vld [vmem:[%s2153_s2 + $0x20] sm:$0xff]  ;;  %v1679_v5 = vld [vmem:[%s1942_s11 + $0xf4] ss:$8 sps:$4 sm:$0xff]   ;;  %s2108_s15 = scalar_lea.vmem [#allocation3], %s1442_s25  ;;  %s1545_s5 = sshll.u32 (%p1789_p5), %s1433_s18, 3 }
  0x50   : > { %v1681_v6 = vld [vmem:[%s1942_s11 + $0x1f4] ss:$8 sps:$4 sm:$0xff]   ;;  %v1683_v7 = vld [vmem:[%s1942_s11 + $0xf0] ss:$8 sps:$4 sm:$0xff]   ;;  %1142 = vperm.xlu1 %1588, %v1112_v3   ;;  %1137 = vperm.xlu0 %1587, %v1111_v4   ;;  %v1172_v15 = vld [vmem:[%s2154_s3 + $0x8] sm:$0xff]  ;;  %s1316_s28 = scalar_lea.vmem (%p1789_p5), %s2155_s4, %s1545_s5 }
  0x51   : > { %972 = vmatpush1.bf16.msra.mxu1 %v1623_v25  ;;  %v1684_v8 = vld [vmem:[%s1942_s11 + $0x1f0] ss:$8 sps:$4 sm:$0xff]   ;;  %v1691_v13 = vld [vmem:[%s2151_s0 + $0x24] ss:$16 sps:$4 sm:$0xff]   ;;  %v1693_v14 = vld [vmem:[%s2151_s0 + $0x2c] ss:$16 sps:$4 sm:$0xff]  }
  0x52   : > { %1045 = vmatpush1.bf16.msra.mxu0 %v1624_v26  ;;  %973 = vmatprep.subr.bf16.mxu1 %v1625_v27  ;;  %v1114_v9 = vld [vmem:[%s2153_s2 + $0x38] sm:$0xff]  ;;  %v1113_v10 = vld [vmem:[%s2153_s2 + $0x30] sm:$0xff]  ;;  %v1171_v16 = vld [vmem:[%s2154_s3] sm:$0xff] }
  0x53   : > { %1046 = vmatprep.subr.bf16.mxu0 %v1627_v28  ;;  %v1685_v11 = vld [vmem:[%s2151_s0] ss:$16 sps:$4 sm:$0xff]   ;;  %v1688_v12 = vld [vmem:[%s2151_s0 + $0x8] ss:$16 sps:$4 sm:$0xff]   ;;  %v1697_v21 = vld [vmem:[%s2151_s0 + $0x44] ss:$16 sps:$4 sm:$0xff]  }
  0x54   : > { %1152 = vperm.xlu1 %1588, %v1114_v9   ;;  %1147 = vperm.xlu0 %1587, %v1113_v10   ;;  %v1174_v17 = vld [vmem:[%s2154_s3 + $0x18] sm:$0xff]  ;;  %v1173_v18 = vld [vmem:[%s2154_s3 + $0x10] sm:$0xff]  ;;  %v1176_v23 = vld [vmem:[%s2154_s3 + $0x28] sm:$0xff] }
  0x55   : > { %974 = vmatpush1.bf16.msra.mxu1 %v1629_v29  ;;  %v1695_v19 = vld [vmem:[%s2151_s0 + $0x20] ss:$16 sps:$4 sm:$0xff]   ;;  %v1696_v20 = vld [vmem:[%s2151_s0 + $0x28] ss:$16 sps:$4 sm:$0xff]   ;;  %v1699_v22 = vld [vmem:[%s2151_s0 + $0x4c] ss:$16 sps:$4 sm:$0xff]  }
  0x56   : > { %1047 = vmatpush1.bf16.msra.mxu0 %v1630_v30  ;;  %975 = vmatprep.subr.bf16.mxu1 %v1631_v31  ;;  %v1175_v24 = vld [vmem:[%s2154_s3 + $0x20] sm:$0xff]  ;;  %v1178_v25 = vld [vmem:[%s2154_s3 + $0x38] sm:$0xff]  ;;  %v1177_v26 = vld [vmem:[%s2154_s3 + $0x30] sm:$0xff] }
  0x57   : > { %1048 = vmatprep.subr.bf16.mxu0 %v1633_v32  ;;  %v1701_v27 = vld [vmem:[%s2151_s0 + $0x40] ss:$16 sps:$4 sm:$0xff]   ;;  %v1702_v28 = vld [vmem:[%s2151_s0 + $0x48] ss:$16 sps:$4 sm:$0xff]   ;;  %v1703_v29 = vld [vmem:[%s2151_s0 + $0x64] ss:$16 sps:$4 sm:$0xff]  }
  0x58   : > { %1186 = vperm.xlu1 %1588, %v1172_v15   ;;  %1181 = vperm.xlu0 %1587, %v1171_v16   ;;  %v1705_v30 = vld [vmem:[%s2151_s0 + $0x6c] ss:$16 sps:$4 sm:$0xff]   ;;  %v1707_v31 = vld [vmem:[%s2151_s0 + $0x60] ss:$16 sps:$4 sm:$0xff]   ;;  %v1708_v32 = vld [vmem:[%s2151_s0 + $0x68] ss:$16 sps:$4 sm:$0xff]  }
  0x59   : > { %976 = vmatpush1.bf16.msra.mxu1 %v1635_v33 }
  0x5a   : > { %1049 = vmatpush1.bf16.msra.mxu0 %v1636_v34  ;;  %977 = vmatprep.subr.bf16.mxu1 %v1637_v35 }
  0x5b   : > { %1050 = vmatprep.subr.bf16.mxu0 %v1639_v36 }
  0x5c   : > { %1196 = vperm.xlu1 %1588, %v1174_v17   ;;  %1191 = vperm.xlu0 %1587, %v1173_v18  }
  0x5d   : > { %978 = vmatpush1.bf16.msra.mxu1 %v1641_v37 }
  0x5e   : > { %1051 = vmatpush1.bf16.msra.mxu0 %v1642_v38  ;;  %979 = vmatprep.subr.bf16.mxu1 %v1643_v39 }
  0x5f   : > { %1052 = vmatprep.subr.bf16.mxu0 %v1645_v40 }
  0x60   : > { %1206 = vperm.xlu1 %1588, %v1176_v23   ;;  %1201 = vperm.xlu0 %1587, %v1175_v24  }
  0x61   : > { %980 = vmatpush1.bf16.msra.mxu1 %v1647_v41 }
  0x62   : > { %1053 = vmatpush1.bf16.msra.mxu0 %v1648_v42  ;;  %981 = vmatprep.subr.bf16.mxu1 %v1649_v43 }
  0x63   : > { %1054 = vmatprep.subr.bf16.mxu0 %v1651_v44 }
  0x64   : > { %1216 = vperm.xlu1 %1588, %v1178_v25   ;;  %1211 = vperm.xlu0 %1587, %v1177_v26  }
  0x65   : > { %982 = vmatpush1.bf16.msra.mxu1 %v1653_v45 }
  0x66   : > { %1055 = vmatpush1.bf16.msra.mxu0 %v1654_v46  ;;  %983 = vmatprep.subr.bf16.mxu1 %v1655_v47 }
  0x67   : > { %1056 = vmatprep.subr.bf16.mxu0 %v1657_v48 }
  0x69   : > { %984 = vmatpush1.bf16.msra.mxu1 %v1659_v49 }
  0x6a   : > { %1057 = vmatpush1.bf16.msra.mxu0 %v1660_v50  ;;  %985 = vmatprep.subr.bf16.mxu1 %v1661_v51 }
  0x6b   : > { %1058 = vmatprep.subr.bf16.mxu0 %v1663_v52 }
  0x6d   : > { %986 = vmatpush1.bf16.msra.mxu1 %v1665_v53 }
  0x6e   : > { %1059 = vmatpush1.bf16.msra.mxu0 %v1666_v54  ;;  %987 = vmatprep.subr.bf16.mxu1 %v1667_v55 }
  0x6f   : > { %1060 = vmatprep.subr.bf16.mxu0 %v1669_v56 }
  0x71   : > { %988 = vmatpush1.bf16.msra.mxu1 %v1671_v59 }
  0x72   : > { %1061 = vmatpush1.bf16.msra.mxu0 %v1672_v60  ;;  %989 = vmatprep.subr.bf16.mxu1 %v1673_v63 }
  0x73   : > { %1062 = vmatprep.subr.bf16.mxu0 %v1675_v0 }
  0x75   : > { %990 = vmatpush1.bf16.msra.mxu1 %v1677_v1 }
  0x76   : > { %1063 = vmatpush1.bf16.msra.mxu0 %v1678_v2  ;;  %991 = vmatprep.subr.bf16.mxu1 %v1679_v5 }
  0x77   : > { %1064 = vmatprep.subr.bf16.mxu0 %v1681_v6 }
  0x79   : > { %992 = vmatpush1.bf16.msra.mxu1 %v1683_v7 }
  0x7a   : > { %1065 = vmatpush1.bf16.msra.mxu0 %v1684_v8 }
  0x7c   : > { %994 = vmatmul.mubr.bf16.vlgmr.msra.gmra.mrb[0].mxu1 %v1685_v11 }
  0x7d   : > { %1067 = vmatmul.mubr.bf16.vlgmr.msra.gmra.mrb[0].mxu0 %v1688_v12  ;;  %1003 = vmatprep.mubr.bf16.mxu1 %v1691_v13 }
  0x7e   : > { %1076 = vmatprep.mubr.bf16.mxu0 %v1693_v14 }
  0x84   : > { %1004 = vmatmul.mubr.bf16.gmra.mrb[4].mxu1 %v1695_v19 }
  0x85   : > { %1077 = vmatmul.mubr.bf16.gmra.mrb[4].mxu0 %v1696_v20  ;;  %1013 = vmatprep.mubr.bf16.mxu1 %v1697_v21 }
  0x86   : > { %1086 = vmatprep.mubr.bf16.mxu0 %v1699_v22 }
  0x8c   : > { %1014 = vmatmul.mubr.bf16.gmra.mrb[8].mxu1 %v1701_v27 }
  0x8d   : > { %1087 = vmatmul.mubr.bf16.gmra.mrb[8].mxu0 %v1702_v28  ;;  %1023 = vmatprep.mubr.bf16.mxu1 %v1703_v29 }
  0x8e   : > { %1096 = vmatprep.mubr.bf16.mxu0 %v1705_v30 }
  0x94   : > { %1024 = vmatmul.mubr.bf16.gmra.mrb[12].mxu1 %v1707_v31 }
  0x95   : > { %1097 = vmatmul.mubr.bf16.gmra.mrb[12].mxu0 %v1708_v32 }
  0xba   : > { %v1118_v33 = vpop.permute.xlu0 %1117  ;;  %v1128_v34 = vpop.permute.xlu1 %1127 }
  0xbe   : > { %v1133_v36 = vpop.permute.xlu1 %1132 }
  0xbf   : > { %v1123_v35 = vpop.permute.xlu0 %1122 }
  0xcf   : > { %v2098_v37 = vpop.permute.xlu0 %1137  ;;  %v2100_v38 = vpop.permute.xlu1 %1142 }
  0xd3   : > { %v2102_v39 = vpop.permute.xlu0 %1147  ;;  %v2104_v40 = vpop.permute.xlu1 %1152 }
  0xd7   : > { %v1182_v53 = vpop.permute.xlu0 %1181  ;;  %v1187_v58 = vpop.permute.xlu1 %1186 }
  0xdb   : > { %v1192_v16 = vpop.permute.xlu0 %1191  ;;  %v1197_v22 = vpop.permute.xlu1 %1196 }
 0x14f   : > { %v995_v41 = vpop.f32.mrb[0].mxu1 }
 0x150   : > { %v1068_v42 = vpop.f32.mrb[0].mxu0  ;;  %v997_v44 = vpop.f32.mrb[1].mxu1 }
 0x151   : > { %v1069_v43 = vadd.f32 %v1068_v42, %v995_v41  ;;  %v1070_v45 = vpop.f32.mrb[1].mxu0  ;;  %v999_v47 = vpop.f32.mrb[2].mxu1 }
 0x152   : > { %v1071_v46 = vadd.f32 %v1070_v45, %v997_v44  ;;  %v1072_v48 = vpop.f32.mrb[2].mxu0  ;;  %v1001_v51 = vpop.f32.mrb[3].mxu1 }
 0x153   : > { %v1155_v49 = vmul.f32 %v1118_v33, %v1069_v43  ;;  %v1073_v50 = vadd.f32 %v1072_v48, %v999_v47  ;;  %v1074_v52 = vpop.f32.mrb[3].mxu0  ;;  %v1202_v48 = vpop.permute.xlu0 %1201 }
 0x154   : > { %v1156_v54 = vmul.f32 %v1118_v33, %v1071_v46  ;;  %v1075_v55 = vadd.f32 %v1074_v52, %v1001_v51 }
 0x155   : > { %v1219_v56 = vadd.f32 %v1182_v53, %v1155_v49  ;;  %v1157_v57 = vmul.f32 %v1123_v35, %v1073_v50 }
 0x156   : > { %v1220_v59 = vadd.f32 %v1182_v53, %v1156_v54  ;;  %v1158_v60 = vmul.f32 %v1123_v35, %v1075_v55  ;;  %v1207_v54 = vpop.permute.xlu1 %1206 }
 0x157   : > { %v1235_v61 = vmax.f32 %v1219_v56, 0.0  ;;  %v1221_v62 = vadd.f32 %v1187_v58, %v1157_v57  ;;  %v1005_v1 = vpop.f32.mrb[4].mxu1 }
 0x158   : > { %v1236_v63 = vmax.f32 %v1220_v59, 0.0  ;;  %v1222_v0 = vadd.f32 %v1187_v58, %v1158_v60  ;;  %v1078_v2 = vpop.f32.mrb[4].mxu0  ;;  %v1007_v5 = vpop.f32.mrb[5].mxu1 }
 0x159   : > { %v1237_v3 = vmax.f32 %v1221_v62, 0.0  ;;  %v1079_v4 = vadd.f32 %v1078_v2, %v1005_v1  ;;  %v1080_v6 = vpop.f32.mrb[5].mxu0  ;;  %v1009_v10 = vpop.f32.mrb[6].mxu1 }
 0x15a   : > { %v1537_v7 = vpack.c.bf16 %v1236_v63, %v1235_v61  ;;  %v1238_v8 = vmax.f32 %v1222_v0, 0.0  ;;  %v1081_v9 = vadd.f32 %v1080_v6, %v1007_v5  ;;  %v1082_v11 = vpop.f32.mrb[6].mxu0  ;;  %v1011_v14 = vpop.f32.mrb[7].mxu1 }
 0x15b   : > { %v1159_v12 = vmul.f32 %v1128_v34, %v1079_v4  ;;  %v1083_v13 = vadd.f32 %v1082_v11, %v1009_v10  ;;  %v1084_v15 = vpop.f32.mrb[7].mxu0  ;;  %v1212_v10 = vpop.permute.xlu0 %1211 }
 0x15c   : > { %1299 = vst [vmem:[%s2108_s15] sm:$0xff] %v1537_v7  ;;  %v1538_v17 = vpack.c.bf16 %v1238_v8, %v1237_v3  ;;  %v1160_v18 = vmul.f32 %v1128_v34, %v1081_v9  ;;  %v1085_v19 = vadd.f32 %v1084_v15, %v1011_v14 }
 0x15d   : > { %v1223_v20 = vadd.f32 %v1192_v16, %v1159_v12  ;;  %v1161_v21 = vmul.f32 %v1133_v36, %v1083_v13 }
 0x15e   : > { %1300 = vst [vmem:[%s2108_s15 + $0x8] sm:$0xff] %v1538_v17  ;;  %v1224_v23 = vadd.f32 %v1192_v16, %v1160_v18  ;;  %v1162_v24 = vmul.f32 %v1133_v36, %v1085_v19  ;;  %v1217_v16 = vpop.permute.xlu1 %1216 }
 0x15f   : > { %v1239_v25 = vmax.f32 %v1223_v20, 0.0  ;;  %v1225_v26 = vadd.f32 %v1197_v22, %v1161_v21  ;;  %v1015_v29 = vpop.f32.mrb[8].mxu1 }
 0x160   : > { %v1240_v27 = vmax.f32 %v1224_v23, 0.0  ;;  %v1226_v28 = vadd.f32 %v1197_v22, %v1162_v24  ;;  %v1088_v30 = vpop.f32.mrb[8].mxu0  ;;  %v1017_v33 = vpop.f32.mrb[9].mxu1 }
 0x161   : > { %v1241_v31 = vmax.f32 %v1225_v26, 0.0  ;;  %v1089_v32 = vadd.f32 %v1088_v30, %v1015_v29  ;;  %v1090_v35 = vpop.f32.mrb[9].mxu0  ;;  %v1019_v43 = vpop.f32.mrb[10].mxu1 }
 0x162   : > { %v1539_v41 = vpack.c.bf16 %v1240_v27, %v1239_v25  ;;  %v1242_v34 = vmax.f32 %v1226_v28, 0.0  ;;  %v1091_v42 = vadd.f32 %v1090_v35, %v1017_v33  ;;  %v1092_v44 = vpop.f32.mrb[10].mxu0  ;;  %v1021_v46 = vpop.f32.mrb[11].mxu1 }
 0x163   : > { %v1163_v45 = vmul.f32 %v2098_v37, %v1089_v32  ;;  %v1093_v36 = vadd.f32 %v1092_v44, %v1019_v43  ;;  %v1094_v47 = vpop.f32.mrb[11].mxu0 }
 0x164   : > { %1301 = vst [vmem:[%s2108_s15 + $0x10] sm:$0xff] %v1539_v41  ;;  %v1540_v49 = vpack.c.bf16 %v1242_v34, %v1241_v31  ;;  %v1164_v50 = vmul.f32 %v2098_v37, %v1091_v42  ;;  %v1095_v51 = vadd.f32 %v1094_v47, %v1021_v46 }
 0x165   : > { %v1227_v52 = vadd.f32 %v1202_v48, %v1163_v45  ;;  %v1165_v53 = vmul.f32 %v2100_v38, %v1093_v36 }
 0x166   : > { %1302 = vst [vmem:[%s2108_s15 + $0x18] sm:$0xff] %v1540_v49  ;;  %v1228_v55 = vadd.f32 %v1202_v48, %v1164_v50  ;;  %v1166_v56 = vmul.f32 %v2100_v38, %v1095_v51 }
 0x167   : > { %v1243_v57 = vmax.f32 %v1227_v52, 0.0  ;;  %v1229_v58 = vadd.f32 %v1207_v54, %v1165_v53  ;;  %v1025_v61 = vpop.f32.mrb[12].mxu1 }
 0x168   : > { %v1244_v59 = vmax.f32 %v1228_v55, 0.0  ;;  %v1230_v60 = vadd.f32 %v1207_v54, %v1166_v56  ;;  %v1098_v62 = vpop.f32.mrb[12].mxu0  ;;  %v1027_v1 = vpop.f32.mrb[13].mxu1 }
 0x169   : > { %v1245_v63 = vmax.f32 %v1229_v58, 0.0  ;;  %v1099_v0 = vadd.f32 %v1098_v62, %v1025_v61  ;;  %v1100_v37 = vpop.f32.mrb[13].mxu0  ;;  %v1029_v5 = vpop.f32.mrb[14].mxu1 }
 0x16a   : > { %v1541_v2 = vpack.c.bf16 %v1244_v59, %v1243_v57  ;;  %v1246_v3 = vmax.f32 %v1230_v60, 0.0  ;;  %v1101_v4 = vadd.f32 %v1100_v37, %v1027_v1  ;;  %v1102_v6 = vpop.f32.mrb[14].mxu0  ;;  %v1031_v8 = vpop.f32.mrb[15].mxu1 }
 0x16b   : > { %v1167_v7 = vmul.f32 %v2102_v39, %v1099_v0  ;;  %v1103_v38 = vadd.f32 %v1102_v6, %v1029_v5  ;;  %v1104_v9 = vpop.f32.mrb[15].mxu0  ;;  %v1362_v27 = vld [vmem:[%s2108_s15 + $0x10] sm:$0xff] (%p1789_p5) }
 0x16c   : > { %1303 = vst [vmem:[%s2108_s15 + $0x20] sm:$0xff] %v1541_v2  ;;  %v1542_v11 = vpack.c.bf16 %v1246_v3, %v1245_v63  ;;  %v1168_v12 = vmul.f32 %v2102_v39, %v1101_v4  ;;  %v1105_v13 = vadd.f32 %v1104_v9, %v1031_v8  ;;  %v1358_v39 = vld [vmem:[%s2108_s15] sm:$0xff] (%p1789_p5)  ;;  %1363 = vst [vmem:[%s1316_s28 + $0x20] sm:$0xff] (%p1789_p5), %v1362_v27 }
 0x16d   : > { %v1231_v14 = vadd.f32 %v1212_v10, %v1167_v7  ;;  %v1169_v15 = vmul.f32 %v2104_v40, %v1103_v38  ;;  %v1364_v28 = vld [vmem:[%s2108_s15 + $0x18] sm:$0xff] (%p1789_p5)  ;;  %1359 = vst [vmem:[%s1316_s28] sm:$0xff] (%p1789_p5), %v1358_v39 }
 0x16e   : > { %1304 = vst [vmem:[%s2108_s15 + $0x28] sm:$0xff] %v1542_v11  ;;  %v1232_v17 = vadd.f32 %v1212_v10, %v1168_v12  ;;  %v1170_v18 = vmul.f32 %v2104_v40, %v1105_v13  ;;  %v1360_v40 = vld [vmem:[%s2108_s15 + $0x8] sm:$0xff] (%p1789_p5)  ;;  %1365 = vst [vmem:[%s1316_s28 + $0x30] sm:$0xff] (%p1789_p5), %v1364_v28 }
 0x16f   : > { %v1247_v19 = vmax.f32 %v1231_v14, 0.0  ;;  %v1233_v20 = vadd.f32 %v1217_v16, %v1169_v15  ;;  %1361 = vst [vmem:[%s1316_s28 + $0x10] sm:$0xff] (%p1789_p5), %v1360_v40 }
 0x170   : > { %v1248_v21 = vmax.f32 %v1232_v17, 0.0  ;;  %v1234_v22 = vadd.f32 %v1217_v16, %v1170_v18  ;;  %1313 = sbr.rel (!%p1789_p5) target bundleno = 383 (0x17f), region = 78 }
 0x171   : > { %v1249_v23 = vmax.f32 %v1233_v20, 0.0 }
 0x172   : > { %v1543_v24 = vpack.c.bf16 %v1248_v21, %v1247_v19  ;;  %v1250_v25 = vmax.f32 %v1234_v22, 0.0 }
 0x173   : > { %v1366_v29 = vld [vmem:[%s2108_s15 + $0x20] sm:$0xff] (%p1789_p5) }
 0x174   : > { %1305 = vst [vmem:[%s2108_s15 + $0x30] sm:$0xff] %v1543_v24  ;;  %v1544_v26 = vpack.c.bf16 %v1250_v25, %v1249_v23  ;;  %1367 = vst [vmem:[%s1316_s28 + $0x40] sm:$0xff] (%p1789_p5), %v1366_v29 }
 0x175   : > { %v1368_v30 = vld [vmem:[%s2108_s15 + $0x28] sm:$0xff] (%p1789_p5) }
 0x176   : > { %1306 = vst [vmem:[%s2108_s15 + $0x38] sm:$0xff] %v1544_v26  ;;  %1369 = vst [vmem:[%s1316_s28 + $0x50] sm:$0xff] (%p1789_p5), %v1368_v30 }
 0x17b   : > { %v1370_v31 = vld [vmem:[%s2108_s15 + $0x30] sm:$0xff] }
 0x17c   : > { %1371 = vst [vmem:[%s1316_s28 + $0x60] sm:$0xff] %v1370_v31 }
 0x17d   : > { %v1372_v32 = vld [vmem:[%s2108_s15 + $0x38] sm:$0xff] }
 0x17e   : > { %1373 = vst [vmem:[%s1316_s28 + $0x70] sm:$0xff] %v1372_v32 }
 0x17f PF: > { %p11_p10 = scmp.ge.s32.totalorder %s1776_s19, 4   ;;  %s2157_s15 = smov %s1727_s16 }
 0x180   : > { %s2158_s16 = smov %s1787_s22  ;;  %s2159_s17 = smov %s1776_s19 }
 0x181   :  { %13 = sbr.rel (!%p11_p10) target bundleno = 2 (0x2), region = 147 }

// kernel: advantage_forward.7
= control target key start
LH: loop header
LB: loop body
LE: loop exit
PB: predicated region body
PF: predicated region fallthrough
CT: control target
= control target key end

     0   :  { %v1486_v1 = vmov 0   ;;  %vm1134_vm0 = vcmask 584704   ;;  %s1922_s1 = inlined_call_operand.vmem [shape: bf16[1024,72], index: 1, kind: input, shape index: {}]   ;;  %s1923_s0 = inlined_call_operand.vmem [shape: bf16[64,1024], index: 0, kind: input, shape index: {}]   ;;  %s1924_s2 = inlined_call_operand.vmem [shape: f32[64,1], index: 2, kind: input, shape index: {}]   ;;  %s1925_s3 = inlined_call_operand.vmem [shape: f32[64,1], index: 3, kind: input, shape index: {}]   ;;  %s1926_s4 = inlined_call_operand.vmem [shape: bf16[64,72], index: 4, kind: output, shape index: {}]  }
   0x1   :  { %v1422_v0 = vld [vmem:[%s1922_s1 + $0x40] sm:$0xff]   ;;  %1421 = vset.pattern.permute.xlu1 %v1486_v1  ;;  %1420 = vset.pattern.permute.xlu0 %v1486_v1  ;;  %v1426_v5 = vld [vmem:[%s1922_s1 + $0x48] sm:$0xff]   ;;  %v1430_v9 = vld [vmem:[%s1922_s1 + $0x50] sm:$0xff]  }
   0x2   :  { %v1423_v2 = vld [vmem:[%s1922_s1 + $0xc0] sm:$0xff]   ;;  %1259 = vmatprep.subr.bf16.mxu0 %v1422_v0  ;;  %v1427_v6 = vld [vmem:[%s1922_s1 + $0xc8] sm:$0xff]   ;;  %v1431_v10 = vld [vmem:[%s1922_s1 + $0xd0] sm:$0xff]  }
   0x3   :  { %v1424_v3 = vld [vmem:[%s1922_s1] sm:$0xff]   ;;  %1299 = vmatprep.subr.bf16.mxu1 %v1423_v2  ;;  %v1428_v7 = vld [vmem:[%s1922_s1 + $0x8] sm:$0xff]   ;;  %v1432_v11 = vld [vmem:[%s1922_s1 + $0x10] sm:$0xff]  }
   0x4   :  { %v1425_v4 = vld [vmem:[%s1922_s1 + $0x80] sm:$0xff]   ;;  %1260 = vmatpush3.bf16.msra.mxu0 %v1424_v3  ;;  %v1429_v8 = vld [vmem:[%s1922_s1 + $0x88] sm:$0xff]   ;;  %v1433_v12 = vld [vmem:[%s1922_s1 + $0x90] sm:$0xff]  }
   0x5   :  { %1300 = vmatpush3.bf16.msra.mxu1 %v1425_v4  ;;  %1261 = vmatprep.subr.bf16.mxu0 %v1426_v5  ;;  %v1434_v13 = vld [vmem:[%s1922_s1 + $0x58] sm:$0xff]   ;;  %v1438_v17 = vld [vmem:[%s1922_s1 + $0x60] sm:$0xff]   ;;  %v1442_v21 = vld [vmem:[%s1922_s1 + $0x68] sm:$0xff]  }
   0x6   :  { %1301 = vmatprep.subr.bf16.mxu1 %v1427_v6  ;;  %v1435_v14 = vld [vmem:[%s1922_s1 + $0xd8] sm:$0xff]   ;;  %v1439_v18 = vld [vmem:[%s1922_s1 + $0xe0] sm:$0xff]   ;;  %v1443_v22 = vld [vmem:[%s1922_s1 + $0xe8] sm:$0xff]  }
   0x7   :  { %v1436_v15 = vld [vmem:[%s1922_s1 + $0x18] sm:$0xff]   ;;  %v1440_v19 = vld [vmem:[%s1922_s1 + $0x20] sm:$0xff]   ;;  %v1444_v23 = vld [vmem:[%s1922_s1 + $0x28] sm:$0xff]  }
   0x8   :  { %1262 = vmatpush3.bf16.msra.mxu0 %v1428_v7  ;;  %v1437_v16 = vld [vmem:[%s1922_s1 + $0x98] sm:$0xff]   ;;  %v1441_v20 = vld [vmem:[%s1922_s1 + $0xa0] sm:$0xff]   ;;  %v1445_v24 = vld [vmem:[%s1922_s1 + $0xa8] sm:$0xff]  }
   0x9   :  { %1302 = vmatpush3.bf16.msra.mxu1 %v1429_v8  ;;  %1263 = vmatprep.subr.bf16.mxu0 %v1430_v9  ;;  %v1446_v25 = vld [vmem:[%s1922_s1 + $0x70] sm:$0xff]   ;;  %v1450_v29 = vld [vmem:[%s1922_s1 + $0x78] sm:$0xff]   ;;  %v18_v33 = vld [vmem:[%s1923_s0] sm:$0xff] }
   0xa   :  { %1303 = vmatprep.subr.bf16.mxu1 %v1431_v10  ;;  %v1447_v26 = vld [vmem:[%s1922_s1 + $0xf0] sm:$0xff]   ;;  %v1451_v30 = vld [vmem:[%s1922_s1 + $0xf8] sm:$0xff]   ;;  %v22_v34 = vld [vmem:[%s1923_s0 + $0x20] sm:$0xff] }
   0xb   :  { %v1448_v27 = vld [vmem:[%s1922_s1 + $0x30] sm:$0xff]   ;;  %v1452_v31 = vld [vmem:[%s1922_s1 + $0x38] sm:$0xff]   ;;  %v19_v35 = vld [vmem:[%s1923_s0 + $0x8] sm:$0xff]  ;;  %v1147_v36 = vcombine.low %v18_v33, %v22_v34  ;;  %v1148_v37 = vcombine.high %v18_v33, %v22_v34 }
   0xc   :  { %1264 = vmatpush3.bf16.msra.mxu0 %v1432_v11  ;;  %v1449_v28 = vld [vmem:[%s1922_s1 + $0xb0] sm:$0xff]   ;;  %v1453_v32 = vld [vmem:[%s1922_s1 + $0xb8] sm:$0xff]   ;;  %v23_v38 = vld [vmem:[%s1923_s0 + $0x28] sm:$0xff] }
   0xd   :  { %1304 = vmatpush3.bf16.msra.mxu1 %v1433_v12  ;;  %1265 = vmatprep.subr.bf16.mxu0 %v1434_v13  ;;  %v1149_v39 = vcombine.low %v19_v35, %v23_v38  ;;  %v1150_v40 = vcombine.high %v19_v35, %v23_v38  ;;  %v1454_v41 = vld [vmem:[%s1922_s1 + $0x140] sm:$0xff]   ;;  %v1458_v45 = vld [vmem:[%s1922_s1 + $0x148] sm:$0xff]   ;;  %v1462_v57 = vld [vmem:[%s1922_s1 + $0x150] sm:$0xff]  }
   0xe   :  { %1305 = vmatprep.subr.bf16.mxu1 %v1435_v14  ;;  %754 = vmatprep.mubr.bf16.mxu0 %v1148_v37  ;;  %v1455_v42 = vld [vmem:[%s1922_s1 + $0x1c0] sm:$0xff]   ;;  %v1459_v46 = vld [vmem:[%s1922_s1 + $0x1c8] sm:$0xff]   ;;  %v1463_v58 = vld [vmem:[%s1922_s1 + $0x1d0] sm:$0xff]  }
   0xf   :  { %819 = vmatprep.mubr.bf16.mxu1 %v1150_v40  ;;  %v1456_v43 = vld [vmem:[%s1922_s1 + $0x100] sm:$0xff]   ;;  %v1460_v47 = vld [vmem:[%s1922_s1 + $0x108] sm:$0xff]   ;;  %v1464_v59 = vld [vmem:[%s1922_s1 + $0x110] sm:$0xff]  }
  0x10   :  { %1266 = vmatpush3.bf16.msra.mxu0 %v1436_v15  ;;  %v1457_v44 = vld [vmem:[%s1922_s1 + $0x180] sm:$0xff]   ;;  %v1461_v48 = vld [vmem:[%s1922_s1 + $0x188] sm:$0xff]   ;;  %v1465_v60 = vld [vmem:[%s1922_s1 + $0x190] sm:$0xff]  }
  0x11   :  { %1306 = vmatpush3.bf16.msra.mxu1 %v1437_v16  ;;  %1267 = vmatprep.subr.bf16.mxu0 %v1438_v17  ;;  %v26_v49 = vld [vmem:[%s1923_s0 + $0x40] sm:$0xff]  ;;  %v27_v52 = vld [vmem:[%s1923_s0 + $0x48] sm:$0xff]  ;;  %v1466_v61 = vld [vmem:[%s1922_s1 + $0x158] sm:$0xff]  }
  0x12   :  { %1307 = vmatprep.subr.bf16.mxu1 %v1439_v18  ;;  %v30_v50 = vld [vmem:[%s1923_s0 + $0x60] sm:$0xff]  ;;  %v31_v53 = vld [vmem:[%s1923_s0 + $0x68] sm:$0xff]  ;;  %v1467_v62 = vld [vmem:[%s1922_s1 + $0x1d8] sm:$0xff]  }
  0x13   :  { %v1156_v51 = vcombine.high %v26_v49, %v30_v50  ;;  %v1155_v54 = vcombine.low %v26_v49, %v30_v50  ;;  %v1158_v55 = vcombine.high %v27_v52, %v31_v53  ;;  %v1157_v56 = vcombine.low %v27_v52, %v31_v53  ;;  %v1468_v63 = vld [vmem:[%s1922_s1 + $0x118] sm:$0xff]   ;;  %v34_v1 = vld [vmem:[%s1923_s0 + $0x80] sm:$0xff]  ;;  %v35_v3 = vld [vmem:[%s1923_s0 + $0x88] sm:$0xff] }
  0x14   :  { %1268 = vmatpush3.bf16.msra.mxu0 %v1440_v19  ;;  %v1469_v0 = vld [vmem:[%s1922_s1 + $0x198] sm:$0xff]   ;;  %v38_v2 = vld [vmem:[%s1923_s0 + $0xa0] sm:$0xff]  ;;  %v39_v4 = vld [vmem:[%s1923_s0 + $0xa8] sm:$0xff] }
  0x15   :  { %1308 = vmatpush3.bf16.msra.mxu1 %v1441_v20  ;;  %1269 = vmatprep.subr.bf16.mxu0 %v1442_v21  ;;  %v1164_v5 = vcombine.high %v34_v1, %v38_v2  ;;  %v1166_v6 = vcombine.high %v35_v3, %v39_v4  ;;  %v1163_v7 = vcombine.low %v34_v1, %v38_v2  ;;  %v1470_v9 = vld [vmem:[%s1922_s1 + $0x160] sm:$0xff]   ;;  %v1474_v13 = vld [vmem:[%s1922_s1 + $0x168] sm:$0xff]   ;;  %v20_v33 = vld [vmem:[%s1923_s0 + $0x10] sm:$0xff] }
  0x16   :  { %1309 = vmatprep.subr.bf16.mxu1 %v1443_v22  ;;  %v1165_v8 = vcombine.low %v35_v3, %v39_v4  ;;  %v1471_v10 = vld [vmem:[%s1922_s1 + $0x1e0] sm:$0xff]   ;;  %v1475_v14 = vld [vmem:[%s1922_s1 + $0x1e8] sm:$0xff]   ;;  %v24_v34 = vld [vmem:[%s1923_s0 + $0x30] sm:$0xff] }
  0x17   :  { %v1472_v11 = vld [vmem:[%s1922_s1 + $0x120] sm:$0xff]   ;;  %v1476_v15 = vld [vmem:[%s1922_s1 + $0x128] sm:$0xff]   ;;  %v1151_v35 = vcombine.low %v20_v33, %v24_v34  ;;  %v21_v37 = vld [vmem:[%s1923_s0 + $0x18] sm:$0xff] }
  0x18   :  { %1270 = vmatpush3.bf16.msra.mxu0 %v1444_v23  ;;  %v1473_v12 = vld [vmem:[%s1922_s1 + $0x1a0] sm:$0xff]   ;;  %v1477_v16 = vld [vmem:[%s1922_s1 + $0x1a8] sm:$0xff]   ;;  %v25_v38 = vld [vmem:[%s1923_s0 + $0x38] sm:$0xff] }
  0x19   :  { %1310 = vmatpush3.bf16.msra.mxu1 %v1445_v24  ;;  %1271 = vmatprep.subr.bf16.mxu0 %v1446_v25  ;;  %v42_v17 = vld [vmem:[%s1923_s0 + $0xc0] sm:$0xff]  ;;  %v43_v19 = vld [vmem:[%s1923_s0 + $0xc8] sm:$0xff]  ;;  %v1478_v25 = vld [vmem:[%s1922_s1 + $0x170] sm:$0xff]   ;;  %v1153_v40 = vcombine.low %v21_v37, %v25_v38 }
  0x1a   :  { %1311 = vmatprep.subr.bf16.mxu1 %v1447_v26  ;;  %v46_v18 = vld [vmem:[%s1923_s0 + $0xe0] sm:$0xff]  ;;  %v47_v21 = vld [vmem:[%s1923_s0 + $0xe8] sm:$0xff]  ;;  %v1479_v26 = vld [vmem:[%s1922_s1 + $0x1f0] sm:$0xff]  }
  0x1b   :  { %v1172_v20 = vcombine.high %v42_v17, %v46_v18  ;;  %v1171_v22 = vcombine.low %v42_v17, %v46_v18  ;;  %v1174_v23 = vcombine.high %v43_v19, %v47_v21  ;;  %v1173_v24 = vcombine.low %v43_v19, %v47_v21  ;;  %v40_v49 = vld [vmem:[%s1923_s0 + $0xb0] sm:$0xff]  ;;  %v982_v50 = vld [vmem:[%s1924_s2] sm:$0xff]  ;;  %v41_v52 = vld [vmem:[%s1923_s0 + $0xb8] sm:$0xff] }
  0x1c   :  { %1272 = vmatpush3.bf16.msra.mxu0 %v1448_v27  ;;  %v1480_v27 = vld [vmem:[%s1922_s1 + $0x130] sm:$0xff]   ;;  %992 = vperm.xlu0 %1420, %v982_v50   ;;  %v985_v53 = vld [vmem:[%s1924_s2 + $0x18] sm:$0xff] }
  0x1d   :  { %1312 = vmatpush3.bf16.msra.mxu1 %v1449_v28  ;;  %1273 = vmatprep.subr.bf16.mxu0 %v1450_v29  ;;  %v1481_v28 = vld [vmem:[%s1922_s1 + $0x1b0] sm:$0xff]   ;;  %v1482_v29 = vld [vmem:[%s1922_s1 + $0x178] sm:$0xff]  }
  0x1e   :  { %1313 = vmatprep.subr.bf16.mxu1 %v1451_v30  ;;  %v1483_v30 = vld [vmem:[%s1922_s1 + $0x1f8] sm:$0xff]   ;;  %v988_v3 = vld [vmem:[%s1924_s2 + $0x30] sm:$0xff] }
  0x1f   :  { %v989_v1 = vld [vmem:[%s1924_s2 + $0x38] sm:$0xff] }
  0x20   :  { %1274 = vmatpush3.bf16.msra.mxu0 %v1452_v31  ;;  %v1484_v31 = vld [vmem:[%s1922_s1 + $0x138] sm:$0xff]  }
  0x21   :  { %1314 = vmatpush3.bf16.msra.mxu1 %v1453_v32  ;;  %1339 = vmatprep.subr.bf16.mxu0 %v1454_v41  ;;  %v1485_v32 = vld [vmem:[%s1922_s1 + $0x1b8] sm:$0xff]   ;;  %v1154_v41 = vcombine.high %v21_v37, %v25_v38 }
  0x22   :  { %1379 = vmatprep.subr.bf16.mxu1 %v1455_v42  ;;  %v32_v42 = vld [vmem:[%s1923_s0 + $0x70] sm:$0xff] }
  0x23   :  { %755 = vmatmul.mubr.bf16.vlgmr.msra.gmra.mrb[0].mxu0 %v1147_v36  ;;  %v1152_v36 = vcombine.high %v20_v33, %v24_v34 }
  0x24   :  { %820 = vmatmul.mubr.bf16.vlgmr.msra.gmra.mrb[0].mxu1 %v1149_v39  ;;  %1340 = vmatpush3.bf16.msra.mxu0 %v1456_v43  ;;  %v28_v39 = vld [vmem:[%s1923_s0 + $0x50] sm:$0xff]  ;;  %v29_v43 = vld [vmem:[%s1923_s0 + $0x58] sm:$0xff] }
  0x25   :  { %1380 = vmatpush3.bf16.msra.mxu1 %v1457_v44  ;;  %1341 = vmatprep.subr.bf16.mxu0 %v1458_v45  ;;  %v33_v44 = vld [vmem:[%s1923_s0 + $0x78] sm:$0xff]  ;;  %v1160_v45 = vcombine.high %v28_v39, %v32_v42 }
  0x26   :  { %1381 = vmatprep.subr.bf16.mxu1 %v1459_v46  ;;  %762 = vmatprep.mubr.bf16.mxu0 %v1156_v51  ;;  %v1162_v46 = vcombine.high %v29_v43, %v33_v44  ;;  %v37_v51 = vld [vmem:[%s1923_s0 + $0x98] sm:$0xff] }
  0x27   :  { %827 = vmatprep.mubr.bf16.mxu1 %v1158_v55  ;;  %v983_v55 = vld [vmem:[%s1924_s2 + $0x8] sm:$0xff]  ;;  %v1169_v4 = vcombine.low %v37_v51, %v41_v52 }
  0x28   :  { %1342 = vmatpush3.bf16.msra.mxu0 %v1460_v47  ;;  %v984_v47 = vld [vmem:[%s1924_s2 + $0x10] sm:$0xff]  ;;  %997 = vperm.xlu0 %1420, %v983_v55  }
  0x29   :  { %1382 = vmatpush3.bf16.msra.mxu1 %v1461_v48  ;;  %1343 = vmatprep.subr.bf16.mxu0 %v1462_v57  ;;  %v36_v48 = vld [vmem:[%s1923_s0 + $0x90] sm:$0xff] }
  0x2a   :  { %1383 = vmatprep.subr.bf16.mxu1 %v1463_v58  ;;  %1002 = vperm.xlu1 %1421, %v984_v47   ;;  %v1168_v57 = vcombine.high %v36_v48, %v40_v49  ;;  %v1170_v58 = vcombine.high %v37_v51, %v41_v52  ;;  %v1167_v2 = vcombine.low %v36_v48, %v40_v49 }
  0x2b   :  { %763 = vmatmul.mubr.bf16.gmra.mrb[4].mxu0 %v1155_v54  ;;  %v1159_v54 = vcombine.low %v28_v39, %v32_v42 }
  0x2c   :  { %828 = vmatmul.mubr.bf16.gmra.mrb[4].mxu1 %v1157_v56  ;;  %1344 = vmatpush3.bf16.msra.mxu0 %v1464_v59  ;;  %v1161_v56 = vcombine.low %v29_v43, %v33_v44  ;;  %v987_v59 = vld [vmem:[%s1924_s2 + $0x28] sm:$0xff] }
  0x2d   :  { %1384 = vmatpush3.bf16.msra.mxu1 %v1465_v60  ;;  %1345 = vmatprep.subr.bf16.mxu0 %v1466_v61  ;;  %v986_v60 = vld [vmem:[%s1924_s2 + $0x20] sm:$0xff]  ;;  %v44_v61 = vld [vmem:[%s1923_s0 + $0xd0] sm:$0xff] }
  0x2e   :  { %1385 = vmatprep.subr.bf16.mxu1 %v1467_v62  ;;  %770 = vmatprep.mubr.bf16.mxu0 %v1164_v5  ;;  %v48_v62 = vld [vmem:[%s1923_s0 + $0xf0] sm:$0xff] }
  0x2f   :  { %835 = vmatprep.mubr.bf16.mxu1 %v1166_v6  ;;  %1007 = vperm.xlu1 %1421, %v985_v53   ;;  %v1176_v5 = vcombine.high %v44_v61, %v48_v62 }
  0x30   :  { %1346 = vmatpush3.bf16.msra.mxu0 %v1468_v63  ;;  %v45_v63 = vld [vmem:[%s1923_s0 + $0xd8] sm:$0xff]  ;;  %1012 = vperm.xlu0 %1420, %v986_v60  }
  0x31   :  { %1386 = vmatpush3.bf16.msra.mxu1 %v1469_v0  ;;  %1347 = vmatprep.subr.bf16.mxu0 %v1470_v9  ;;  %v49_v0 = vld [vmem:[%s1923_s0 + $0xf8] sm:$0xff] }
  0x32   :  { %1387 = vmatprep.subr.bf16.mxu1 %v1471_v10  ;;  %v1178_v6 = vcombine.high %v45_v63, %v49_v0  ;;  %v1041_v9 = vld [vmem:[%s1925_s3 + $0x18] sm:$0xff]  ;;  %v1175_v10 = vcombine.low %v44_v61, %v48_v62 }
  0x33   :  { %771 = vmatmul.mubr.bf16.gmra.mrb[8].mxu0 %v1163_v7  ;;  %1017 = vperm.xlu1 %1421, %v987_v59   ;;  %v1039_v7 = vld [vmem:[%s1925_s3 + $0x8] sm:$0xff] }
  0x34   :  { %836 = vmatmul.mubr.bf16.gmra.mrb[8].mxu1 %v1165_v8  ;;  %1348 = vmatpush3.bf16.msra.mxu0 %v1472_v11  ;;  %v1038_v8 = vld [vmem:[%s1925_s3] sm:$0xff]  ;;  %v1040_v11 = vld [vmem:[%s1925_s3 + $0x10] sm:$0xff] }
  0x35   :  { %1388 = vmatpush3.bf16.msra.mxu1 %v1473_v12  ;;  %1349 = vmatprep.subr.bf16.mxu0 %v1474_v13  ;;  %v1177_v12 = vcombine.low %v45_v63, %v49_v0  ;;  %v1043_v13 = vld [vmem:[%s1925_s3 + $0x28] sm:$0xff] }
  0x36   :  { %1389 = vmatprep.subr.bf16.mxu1 %v1475_v14  ;;  %778 = vmatprep.mubr.bf16.mxu0 %v1172_v20  ;;  %v1042_v14 = vld [vmem:[%s1925_s3 + $0x20] sm:$0xff] }
  0x37   :  { %843 = vmatprep.mubr.bf16.mxu1 %v1174_v23  ;;  %1027 = vperm.xlu1 %1421, %v989_v1  }
  0x38   :  { %1350 = vmatpush3.bf16.msra.mxu0 %v1476_v15  ;;  %1022 = vperm.xlu0 %1420, %v988_v3   ;;  %v1045_v15 = vld [vmem:[%s1925_s3 + $0x38] sm:$0xff] }
  0x39   :  { %1390 = vmatpush3.bf16.msra.mxu1 %v1477_v16  ;;  %1351 = vmatprep.subr.bf16.mxu0 %v1478_v25  ;;  %v1044_v16 = vld [vmem:[%s1925_s3 + $0x30] sm:$0xff] }
  0x3a   :  { %1391 = vmatprep.subr.bf16.mxu1 %v1479_v26 }
  0x3b   :  { %779 = vmatmul.mubr.bf16.gmra.mrb[12].mxu0 %v1171_v22  ;;  %1053 = vperm.xlu1 %1421, %v1039_v7  }
  0x3c   :  { %844 = vmatmul.mubr.bf16.gmra.mrb[12].mxu1 %v1173_v24  ;;  %1352 = vmatpush3.bf16.msra.mxu0 %v1480_v27 }
  0x3d   :  { %1392 = vmatpush3.bf16.msra.mxu1 %v1481_v28  ;;  %1353 = vmatprep.subr.bf16.mxu0 %v1482_v29 }
  0x3e   :  { %1393 = vmatprep.subr.bf16.mxu1 %v1483_v30  ;;  %884 = vmatprep.mubr.bf16.mxu0 %v1152_v36 }
  0x3f   :  { %949 = vmatprep.mubr.bf16.mxu1 %v1154_v41  ;;  %1048 = vperm.xlu0 %1420, %v1038_v8  }
  0x40   :  { %1354 = vmatpush3.bf16.msra.mxu0 %v1484_v31  ;;  %1063 = vperm.xlu1 %1421, %v1041_v9  }
  0x41   :  { %1394 = vmatpush3.bf16.msra.mxu1 %v1485_v32 }
  0x43   :  { %885 = vmatmul.mubr.bf16.vlgmr.msra.gmra.mrb[16].mxu0 %v1151_v35  ;;  %1058 = vperm.xlu0 %1420, %v1040_v11  }
  0x44   :  { %950 = vmatmul.mubr.bf16.vlgmr.msra.gmra.mrb[16].mxu1 %v1153_v40  ;;  %892 = vmatprep.mubr.bf16.mxu0 %v1160_v45 }
  0x45   :  { %957 = vmatprep.mubr.bf16.mxu1 %v1162_v46  ;;  %1073 = vperm.xlu1 %1421, %v1043_v13  }
  0x47   :  { %1068 = vperm.xlu0 %1420, %v1042_v14  }
  0x49   :  { %1083 = vperm.xlu1 %1421, %v1045_v15  }
  0x4b   :  { %893 = vmatmul.mubr.bf16.gmra.mrb[20].mxu0 %v1159_v54  ;;  %1078 = vperm.xlu0 %1420, %v1044_v16  }
  0x4c   :  { %958 = vmatmul.mubr.bf16.gmra.mrb[20].mxu1 %v1161_v56  ;;  %900 = vmatprep.mubr.bf16.mxu0 %v1168_v57 }
  0x4d   :  { %965 = vmatprep.mubr.bf16.mxu1 %v1170_v58 }
  0x53   :  { %901 = vmatmul.mubr.bf16.gmra.mrb[24].mxu0 %v1167_v2 }
  0x54   :  { %966 = vmatmul.mubr.bf16.gmra.mrb[24].mxu1 %v1169_v4  ;;  %908 = vmatprep.mubr.bf16.mxu0 %v1176_v5 }
  0x55   :  { %973 = vmatprep.mubr.bf16.mxu1 %v1178_v6 }
  0x5b   :  { %909 = vmatmul.mubr.bf16.gmra.mrb[28].mxu0 %v1175_v10 }
  0x5c   :  { %974 = vmatmul.mubr.bf16.gmra.mrb[28].mxu1 %v1177_v12 }
  0x9b   :  { %v1852_v33 = vpop.permute.xlu0 %992 }
  0xa7   :  { %v998_v48 = vpop.permute.xlu0 %997 }
  0xa9   :  { %v1850_v31 = vpop.permute.xlu1 %1002 }
  0xae   :  { %v1858_v47 = vpop.permute.xlu1 %1007 }
  0xaf   :  { %v1866_v0 = vpop.permute.xlu0 %1012 }
  0xb2   :  { %v1864_v63 = vpop.permute.xlu1 %1017 }
  0xb6   :  { %v1872_v15 = vpop.permute.xlu1 %1027 }
  0xb7   :  { %v1874_v16 = vpop.permute.xlu0 %1022 }
  0xf6   :  { %v1275_v17 = vpop.f32.mrb[0].mxu0 }
  0xf7   :  { %v1315_v18 = vpop.f32.mrb[0].mxu1  ;;  %v1276_v19 = vpop.f32.mrb[1].mxu0 }
  0xf8   :  { %v1277_v20 = vadd.f32 %v1276_v19, %v1275_v17  ;;  %v1316_v21 = vpop.f32.mrb[1].mxu1  ;;  %v1278_v22 = vpop.f32.mrb[2].mxu0 }
  0xf9   :  { %v1317_v23 = vadd.f32 %v1316_v21, %v1315_v18  ;;  %v1318_v24 = vpop.f32.mrb[2].mxu1  ;;  %v1279_v25 = vpop.f32.mrb[3].mxu0 }
  0xfa   :  { %v1280_v26 = vadd.f32 %v1279_v25, %v1278_v22  ;;  %v1319_v27 = vpop.f32.mrb[3].mxu1 }
  0xfb   :  { %v822_v28 = vadd.f32 %v1317_v23, %v1277_v20  ;;  %v1320_v29 = vadd.f32 %v1319_v27, %v1318_v24 }
  0xfd   :  { %v1848_v30 = vadd.f32 %v1320_v29, %v1280_v26 }
  0xfe   :  { %v1281_v32 = vpop.f32.mrb[4].mxu0 }
  0xff   :  { %v1321_v34 = vpop.f32.mrb[4].mxu1  ;;  %v1282_v35 = vpop.f32.mrb[5].mxu0 }
 0x100   :  { %v1283_v36 = vadd.f32 %v1282_v35, %v1281_v32  ;;  %v1322_v37 = vpop.f32.mrb[5].mxu1  ;;  %v1284_v38 = vpop.f32.mrb[6].mxu0 }
 0x101   :  { %v1323_v39 = vadd.f32 %v1322_v37, %v1321_v34  ;;  %v1324_v40 = vpop.f32.mrb[6].mxu1  ;;  %v1285_v41 = vpop.f32.mrb[7].mxu0 }
 0x102   :  { %v1286_v42 = vadd.f32 %v1285_v41, %v1284_v38  ;;  %v1325_v43 = vpop.f32.mrb[7].mxu1  ;;  %v1049_v37 = vpop.permute.xlu0 %1048 }
 0x103   :  { %v1854_v44 = vadd.f32 %v1323_v39, %v1283_v36  ;;  %v1326_v45 = vadd.f32 %v1325_v43, %v1324_v40  ;;  %v1054_v36 = vpop.permute.xlu1 %1053 }
 0x105   :  { %v1856_v46 = vadd.f32 %v1326_v45, %v1286_v42 }
 0x106   :  { %v1287_v49 = vpop.f32.mrb[8].mxu0 }
 0x107   :  { %v1327_v50 = vpop.f32.mrb[8].mxu1  ;;  %v1288_v51 = vpop.f32.mrb[9].mxu0 }
 0x108   :  { %v1328_v52 = vpop.f32.mrb[9].mxu1  ;;  %v1289_v53 = vadd.f32 %v1288_v51, %v1287_v49  ;;  %v1290_v55 = vpop.f32.mrb[10].mxu0 }
 0x109   :  { %v1329_v54 = vadd.f32 %v1328_v52, %v1327_v50  ;;  %v1330_v56 = vpop.f32.mrb[10].mxu1  ;;  %v1291_v57 = vpop.f32.mrb[11].mxu0 }
 0x10a   :  { %v1331_v58 = vpop.f32.mrb[11].mxu1  ;;  %v1292_v60 = vadd.f32 %v1291_v57, %v1290_v55 }
 0x10b   :  { %v1860_v59 = vadd.f32 %v1329_v54, %v1289_v53  ;;  %v1332_v61 = vadd.f32 %v1331_v58, %v1330_v56 }
 0x10d   :  { %v1862_v62 = vadd.f32 %v1332_v61, %v1292_v60 }
 0x10e   :  { %v1293_v1 = vpop.f32.mrb[12].mxu0 }
 0x10f   :  { %v1333_v2 = vpop.f32.mrb[12].mxu1  ;;  %v1294_v3 = vpop.f32.mrb[13].mxu0 }
 0x110   :  { %v1295_v4 = vadd.f32 %v1294_v3, %v1293_v1  ;;  %v1334_v5 = vpop.f32.mrb[13].mxu1  ;;  %v1296_v6 = vpop.f32.mrb[14].mxu0 }
 0x111   :  { %v1335_v7 = vadd.f32 %v1334_v5, %v1333_v2  ;;  %v1336_v8 = vpop.f32.mrb[14].mxu1  ;;  %v1297_v9 = vpop.f32.mrb[15].mxu0 }
 0x112   :  { %v1298_v10 = vadd.f32 %v1297_v9, %v1296_v6  ;;  %v1337_v11 = vpop.f32.mrb[15].mxu1  ;;  %v1059_v2 = vpop.permute.xlu0 %1058 }
 0x113   :  { %v1868_v12 = vadd.f32 %v1335_v7, %v1295_v4  ;;  %v1338_v13 = vadd.f32 %v1337_v11, %v1336_v8 }
 0x115   :  { %v1870_v14 = vadd.f32 %v1338_v13, %v1298_v10 }
 0x116   :  { %v1355_v17 = vpop.f32.mrb[16].mxu0 }
 0x117   :  { %v1395_v18 = vpop.f32.mrb[16].mxu1  ;;  %v1356_v19 = vpop.f32.mrb[17].mxu0 }
 0x118   :  { %v1357_v20 = vadd.f32 %v1356_v19, %v1355_v17  ;;  %v1396_v21 = vpop.f32.mrb[17].mxu1  ;;  %v1358_v22 = vpop.f32.mrb[18].mxu0 }
 0x119   :  { %v1397_v23 = vadd.f32 %v1396_v21, %v1395_v18  ;;  %v1398_v24 = vpop.f32.mrb[18].mxu1  ;;  %v1359_v25 = vpop.f32.mrb[19].mxu0 }
 0x11a   :  { %v887_v26 = vadd.f32 %v1357_v20, %v822_v28  ;;  %v1360_v27 = vadd.f32 %v1359_v25, %v1358_v22  ;;  %v1399_v29 = vpop.f32.mrb[19].mxu1 }
 0x11b   :  { %v1400_v32 = vadd.f32 %v1399_v29, %v1398_v24 }
 0x11c   :  { %v952_v34 = vadd.f32 %v1397_v23, %v887_v26  ;;  %v890_v35 = vadd.f32 %v1360_v27, %v1848_v30 }
 0x11e   :  { %v1030_v38 = vmul.f32 %v1852_v33, %v952_v34  ;;  %v955_v39 = vadd.f32 %v1400_v32, %v890_v35  ;;  %v1361_v40 = vpop.f32.mrb[20].mxu0 }
 0x11f   :  { %v1401_v41 = vpop.f32.mrb[20].mxu1  ;;  %v1362_v42 = vpop.f32.mrb[21].mxu0 }
 0x120   :  { %v1086_v43 = vadd.f32 %v1049_v37, %v1030_v38  ;;  %v1031_v45 = vmul.f32 %v998_v48, %v955_v39  ;;  %v1363_v49 = vadd.f32 %v1362_v42, %v1361_v40  ;;  %v1402_v50 = vpop.f32.mrb[21].mxu1  ;;  %v1364_v51 = vpop.f32.mrb[22].mxu0 }
 0x121   :  { %v1403_v28 = vadd.f32 %v1402_v50, %v1401_v41  ;;  %v1404_v52 = vpop.f32.mrb[22].mxu1  ;;  %v1365_v53 = vpop.f32.mrb[23].mxu0 }
 0x122   :  { %v1094_v54 = vmax.f32 %v1086_v43, 0.0  ;;  %v1087_v55 = vadd.f32 %v1054_v36, %v1031_v45  ;;  %v895_v30 = vadd.f32 %v1363_v49, %v1854_v44  ;;  %v1366_v56 = vadd.f32 %v1365_v53, %v1364_v51  ;;  %v1405_v57 = vpop.f32.mrb[23].mxu1  ;;  %v1064_v48 = vpop.permute.xlu1 %1063 }
 0x123   :  { %v1406_v33 = vadd.f32 %v1405_v57, %v1404_v52 }
 0x124   :  { %v1251_v58 = vpack.c.bf16 %v1094_v54, %v1094_v54  ;;  %v1095_v60 = vmax.f32 %v1087_v55, 0.0  ;;  %v960_v61 = vadd.f32 %v1403_v28, %v895_v30  ;;  %v898_v1 = vadd.f32 %v1366_v56, %v1856_v46 }
 0x126   :  { %1135 = vst.msk [vmem:[%s1926_s4] sm:$0xf] %vm1134_vm0, %v1251_v58  ;;  %v1252_v3 = vpack.c.bf16 %v1095_v60, %v1095_v60  ;;  %v1032_v4 = vmul.f32 %v1850_v31, %v960_v61  ;;  %v963_v44 = vadd.f32 %v1406_v33, %v898_v1  ;;  %v1367_v5 = vpop.f32.mrb[24].mxu0  ;;  %v1074_v29 = vpop.permute.xlu1 %1073 }
 0x127   :  { %v1407_v6 = vpop.f32.mrb[24].mxu1  ;;  %v1368_v7 = vpop.f32.mrb[25].mxu0 }
 0x128   :  { %1136 = vst.msk [vmem:[%s1926_s4 + $0x4] sm:$0xf] %vm1134_vm0, %v1252_v3  ;;  %v1088_v46 = vadd.f32 %v1059_v2, %v1032_v4  ;;  %v1033_v8 = vmul.f32 %v1858_v47, %v963_v44  ;;  %v1369_v9 = vadd.f32 %v1368_v7, %v1367_v5  ;;  %v1408_v10 = vpop.f32.mrb[25].mxu1  ;;  %v1370_v11 = vpop.f32.mrb[26].mxu0 }
 0x129   :  { %v1409_v13 = vadd.f32 %v1408_v10, %v1407_v6  ;;  %v1410_v17 = vpop.f32.mrb[26].mxu1  ;;  %v1371_v18 = vpop.f32.mrb[27].mxu0 }
 0x12a   :  { %v1096_v19 = vmax.f32 %v1088_v46, 0.0  ;;  %v1089_v31 = vadd.f32 %v1064_v48, %v1033_v8  ;;  %v903_v20 = vadd.f32 %v1369_v9, %v1860_v59  ;;  %v1372_v21 = vadd.f32 %v1371_v18, %v1370_v11  ;;  %v1411_v22 = vpop.f32.mrb[27].mxu1  ;;  %v1069_v47 = vpop.permute.xlu0 %1068 }
 0x12b   :  { %v1412_v23 = vadd.f32 %v1411_v22, %v1410_v17  ;;  %v1084_v60 = vpop.permute.xlu1 %1083 }
 0x12c   :  { %v1253_v24 = vpack.c.bf16 %v1096_v19, %v1096_v19  ;;  %v1097_v25 = vmax.f32 %v1089_v31, 0.0  ;;  %v968_v26 = vadd.f32 %v1409_v13, %v903_v20  ;;  %v906_v27 = vadd.f32 %v1372_v21, %v1862_v62 }
 0x12e   :  { %1137 = vst.msk [vmem:[%s1926_s4 + $0x8] sm:$0xf] %vm1134_vm0, %v1253_v24  ;;  %v1254_v32 = vpack.c.bf16 %v1097_v25, %v1097_v25  ;;  %v1034_v34 = vmul.f32 %v1866_v0, %v968_v26  ;;  %v971_v35 = vadd.f32 %v1412_v23, %v906_v27  ;;  %v1373_v59 = vpop.f32.mrb[28].mxu0  ;;  %v1079_v33 = vpop.permute.xlu0 %1078 }
 0x12f   :  { %v1413_v36 = vpop.f32.mrb[28].mxu1  ;;  %v1374_v37 = vpop.f32.mrb[29].mxu0 }
 0x130   :  { %1138 = vst.msk [vmem:[%s1926_s4 + $0xc] sm:$0xf] %vm1134_vm0, %v1254_v32  ;;  %v1090_v62 = vadd.f32 %v1069_v47, %v1034_v34  ;;  %v1035_v38 = vmul.f32 %v1864_v63, %v971_v35  ;;  %v1375_v39 = vadd.f32 %v1374_v37, %v1373_v59  ;;  %v1414_v40 = vpop.f32.mrb[29].mxu1  ;;  %v1376_v41 = vpop.f32.mrb[30].mxu0 }
 0x131   :  { %v1415_v42 = vadd.f32 %v1414_v40, %v1413_v36  ;;  %v1416_v43 = vpop.f32.mrb[30].mxu1  ;;  %v1377_v45 = vpop.f32.mrb[31].mxu0 }
 0x132   :  { %v1098_v49 = vmax.f32 %v1090_v62, 0.0  ;;  %v1091_v0 = vadd.f32 %v1074_v29, %v1035_v38  ;;  %v911_v50 = vadd.f32 %v1375_v39, %v1868_v12  ;;  %v1378_v51 = vadd.f32 %v1377_v45, %v1376_v41  ;;  %v1417_v28 = vpop.f32.mrb[31].mxu1 }
 0x133   :  { %v1418_v52 = vadd.f32 %v1417_v28, %v1416_v43 }
 0x134   :  { %v1255_v53 = vpack.c.bf16 %v1098_v49, %v1098_v49  ;;  %v1099_v54 = vmax.f32 %v1091_v0, 0.0  ;;  %v976_v55 = vadd.f32 %v1415_v42, %v911_v50  ;;  %v914_v30 = vadd.f32 %v1378_v51, %v1870_v14 }
 0x136   :  { %1139 = vst.msk [vmem:[%s1926_s4 + $0x10] sm:$0xf] %vm1134_vm0, %v1255_v53  ;;  %v1256_v63 = vpack.c.bf16 %v1099_v54, %v1099_v54  ;;  %v1036_v56 = vmul.f32 %v1874_v16, %v976_v55  ;;  %v979_v57 = vadd.f32 %v1418_v52, %v914_v30 }
 0x138   :  { %1140 = vst.msk [vmem:[%s1926_s4 + $0x14] sm:$0xf] %vm1134_vm0, %v1256_v63  ;;  %v1092_v12 = vadd.f32 %v1079_v33, %v1036_v56  ;;  %v1037_v58 = vmul.f32 %v1872_v15, %v979_v57 }
 0x13a   :  { %v1100_v14 = vmax.f32 %v1092_v12, 0.0  ;;  %v1093_v61 = vadd.f32 %v1084_v60, %v1037_v58 }
 0x13c   :  { %v1257_v1 = vpack.c.bf16 %v1100_v14, %v1100_v14  ;;  %v1101_v48 = vmax.f32 %v1093_v61, 0.0 }
 0x13e   :  { %1141 = vst.msk [vmem:[%s1926_s4 + $0x18] sm:$0xf] %vm1134_vm0, %v1257_v1  ;;  %v1258_v16 = vpack.c.bf16 %v1101_v48, %v1101_v48 }
 0x140   :  { %1142 = vst.msk [vmem:[%s1926_s4 + $0x1c] sm:$0xf] %vm1134_vm0, %v1258_v16 }

// kernel: advantage_forward.8
= control target key start
LH: loop header
LB: loop body
LE: loop exit
PB: predicated region body
PF: predicated region fallthrough
CT: control target
= control target key end

     0   :  { %v1174_v1 = vmov 0   ;;  %vm898_vm0 = vcmask 60416   ;;  %s1480_s1 = inlined_call_operand.vmem [shape: bf16[1024,8], index: 1, kind: input, shape index: {}]   ;;  %s1481_s0 = inlined_call_operand.vmem [shape: bf16[32,1024], index: 0, kind: input, shape index: {}]   ;;  %s1482_s2 = inlined_call_operand.vmem [shape: f32[32,1], index: 2, kind: input, shape index: {}]   ;;  %s1483_s3 = inlined_call_operand.vmem [shape: f32[32,1], index: 3, kind: input, shape index: {}]   ;;  %s1484_s4 = inlined_call_operand.vmem [shape: bf16[32,8], index: 4, kind: output, shape index: {}]  }
   0x1   :  { %v1110_v0 = vld [vmem:[%s1480_s1 + $0x40] sm:$0xff]   ;;  %1109 = vset.pattern.permute.xlu1 %v1174_v1  ;;  %1108 = vset.pattern.permute.xlu0 %v1174_v1  ;;  %v1114_v5 = vld [vmem:[%s1480_s1 + $0x48] sm:$0xff]   ;;  %v1118_v9 = vld [vmem:[%s1480_s1 + $0x50] sm:$0xff]  }
   0x2   :  { %v1111_v2 = vld [vmem:[%s1480_s1 + $0xc0] sm:$0xff]   ;;  %995 = vmatprep.subr.bf16.mxu0 %v1110_v0  ;;  %v1115_v6 = vld [vmem:[%s1480_s1 + $0xc8] sm:$0xff]   ;;  %v1119_v10 = vld [vmem:[%s1480_s1 + $0xd0] sm:$0xff]  }
   0x3   :  { %v1112_v3 = vld [vmem:[%s1480_s1] sm:$0xff]   ;;  %1023 = vmatprep.subr.bf16.mxu1 %v1111_v2  ;;  %v1116_v7 = vld [vmem:[%s1480_s1 + $0x8] sm:$0xff]   ;;  %v1120_v11 = vld [vmem:[%s1480_s1 + $0x10] sm:$0xff]  }
   0x4   :  { %v1113_v4 = vld [vmem:[%s1480_s1 + $0x80] sm:$0xff]   ;;  %996 = vmatpush3.bf16.msra.mxu0 %v1112_v3  ;;  %v1117_v8 = vld [vmem:[%s1480_s1 + $0x88] sm:$0xff]   ;;  %v1121_v12 = vld [vmem:[%s1480_s1 + $0x90] sm:$0xff]  }
   0x5   :  { %1024 = vmatpush3.bf16.msra.mxu1 %v1113_v4  ;;  %997 = vmatprep.subr.bf16.mxu0 %v1114_v5  ;;  %v1122_v13 = vld [vmem:[%s1480_s1 + $0x58] sm:$0xff]   ;;  %v1126_v17 = vld [vmem:[%s1480_s1 + $0x60] sm:$0xff]   ;;  %v1130_v21 = vld [vmem:[%s1480_s1 + $0x68] sm:$0xff]  }
   0x6   :  { %1025 = vmatprep.subr.bf16.mxu1 %v1115_v6  ;;  %v1123_v14 = vld [vmem:[%s1480_s1 + $0xd8] sm:$0xff]   ;;  %v1127_v18 = vld [vmem:[%s1480_s1 + $0xe0] sm:$0xff]   ;;  %v1131_v22 = vld [vmem:[%s1480_s1 + $0xe8] sm:$0xff]  }
   0x7   :  { %v1124_v15 = vld [vmem:[%s1480_s1 + $0x18] sm:$0xff]   ;;  %v1128_v19 = vld [vmem:[%s1480_s1 + $0x20] sm:$0xff]   ;;  %v1132_v23 = vld [vmem:[%s1480_s1 + $0x28] sm:$0xff]  }
   0x8   :  { %998 = vmatpush3.bf16.msra.mxu0 %v1116_v7  ;;  %v1125_v16 = vld [vmem:[%s1480_s1 + $0x98] sm:$0xff]   ;;  %v1129_v20 = vld [vmem:[%s1480_s1 + $0xa0] sm:$0xff]   ;;  %v1133_v24 = vld [vmem:[%s1480_s1 + $0xa8] sm:$0xff]  }
   0x9   :  { %1026 = vmatpush3.bf16.msra.mxu1 %v1117_v8  ;;  %999 = vmatprep.subr.bf16.mxu0 %v1118_v9  ;;  %v1134_v25 = vld [vmem:[%s1480_s1 + $0x70] sm:$0xff]   ;;  %v1138_v29 = vld [vmem:[%s1480_s1 + $0x78] sm:$0xff]   ;;  %v18_v33 = vld [vmem:[%s1481_s0] sm:$0xff] }
   0xa   :  { %1027 = vmatprep.subr.bf16.mxu1 %v1119_v10  ;;  %v1135_v26 = vld [vmem:[%s1480_s1 + $0xf0] sm:$0xff]   ;;  %v1139_v30 = vld [vmem:[%s1480_s1 + $0xf8] sm:$0xff]   ;;  %v22_v34 = vld [vmem:[%s1481_s0 + $0x20] sm:$0xff] }
   0xb   :  { %v1136_v27 = vld [vmem:[%s1480_s1 + $0x30] sm:$0xff]   ;;  %v1140_v31 = vld [vmem:[%s1480_s1 + $0x38] sm:$0xff]   ;;  %v19_v35 = vld [vmem:[%s1481_s0 + $0x8] sm:$0xff]  ;;  %v907_v36 = vcombine.low %v18_v33, %v22_v34  ;;  %v908_v37 = vcombine.high %v18_v33, %v22_v34 }
   0xc   :  { %1000 = vmatpush3.bf16.msra.mxu0 %v1120_v11  ;;  %v1137_v28 = vld [vmem:[%s1480_s1 + $0xb0] sm:$0xff]   ;;  %v1141_v32 = vld [vmem:[%s1480_s1 + $0xb8] sm:$0xff]   ;;  %v23_v38 = vld [vmem:[%s1481_s0 + $0x28] sm:$0xff] }
   0xd   :  { %1028 = vmatpush3.bf16.msra.mxu1 %v1121_v12  ;;  %1001 = vmatprep.subr.bf16.mxu0 %v1122_v13  ;;  %v909_v39 = vcombine.low %v19_v35, %v23_v38  ;;  %v910_v40 = vcombine.high %v19_v35, %v23_v38  ;;  %v1142_v41 = vld [vmem:[%s1480_s1 + $0x140] sm:$0xff]   ;;  %v1146_v45 = vld [vmem:[%s1480_s1 + $0x148] sm:$0xff]   ;;  %v1150_v49 = vld [vmem:[%s1480_s1 + $0x150] sm:$0xff]  }
   0xe   :  { %1029 = vmatprep.subr.bf16.mxu1 %v1123_v14  ;;  %658 = vmatprep.mubr.bf16.mxu0 %v908_v37  ;;  %v1143_v42 = vld [vmem:[%s1480_s1 + $0x1c0] sm:$0xff]   ;;  %v1147_v46 = vld [vmem:[%s1480_s1 + $0x1c8] sm:$0xff]   ;;  %v1151_v50 = vld [vmem:[%s1480_s1 + $0x1d0] sm:$0xff]  }
   0xf   :  { %707 = vmatprep.mubr.bf16.mxu1 %v910_v40  ;;  %v1144_v43 = vld [vmem:[%s1480_s1 + $0x100] sm:$0xff]   ;;  %v1148_v47 = vld [vmem:[%s1480_s1 + $0x108] sm:$0xff]   ;;  %v1152_v51 = vld [vmem:[%s1480_s1 + $0x110] sm:$0xff]  }
  0x10   :  { %1002 = vmatpush3.bf16.msra.mxu0 %v1124_v15  ;;  %v1145_v44 = vld [vmem:[%s1480_s1 + $0x180] sm:$0xff]   ;;  %v1149_v48 = vld [vmem:[%s1480_s1 + $0x188] sm:$0xff]   ;;  %v1153_v52 = vld [vmem:[%s1480_s1 + $0x190] sm:$0xff]  }
  0x11   :  { %1030 = vmatpush3.bf16.msra.mxu1 %v1125_v16  ;;  %1003 = vmatprep.subr.bf16.mxu0 %v1126_v17  ;;  %v1154_v53 = vld [vmem:[%s1480_s1 + $0x158] sm:$0xff]   ;;  %v1158_v57 = vld [vmem:[%s1480_s1 + $0x160] sm:$0xff]   ;;  %v27_v0 = vld [vmem:[%s1481_s0 + $0x48] sm:$0xff] }
  0x12   :  { %1031 = vmatprep.subr.bf16.mxu1 %v1127_v18  ;;  %v1155_v54 = vld [vmem:[%s1480_s1 + $0x1d8] sm:$0xff]   ;;  %v1159_v58 = vld [vmem:[%s1480_s1 + $0x1e0] sm:$0xff]   ;;  %v31_v1 = vld [vmem:[%s1481_s0 + $0x68] sm:$0xff] }
  0x13   :  { %v1156_v55 = vld [vmem:[%s1480_s1 + $0x118] sm:$0xff]   ;;  %v1160_v59 = vld [vmem:[%s1480_s1 + $0x120] sm:$0xff]   ;;  %v918_v3 = vcombine.high %v27_v0, %v31_v1  ;;  %v1162_v4 = vld [vmem:[%s1480_s1 + $0x168] sm:$0xff]   ;;  %v917_v5 = vcombine.low %v27_v0, %v31_v1 }
  0x14   :  { %1004 = vmatpush3.bf16.msra.mxu0 %v1128_v19  ;;  %v1157_v56 = vld [vmem:[%s1480_s1 + $0x198] sm:$0xff]   ;;  %v1161_v60 = vld [vmem:[%s1480_s1 + $0x1a0] sm:$0xff]   ;;  %v1163_v6 = vld [vmem:[%s1480_s1 + $0x1e8] sm:$0xff]  }
  0x15   :  { %1032 = vmatpush3.bf16.msra.mxu1 %v1129_v20  ;;  %1005 = vmatprep.subr.bf16.mxu0 %v1130_v21  ;;  %v26_v61 = vld [vmem:[%s1481_s0 + $0x40] sm:$0xff]  ;;  %v1164_v7 = vld [vmem:[%s1480_s1 + $0x128] sm:$0xff]   ;;  %v1166_v9 = vld [vmem:[%s1480_s1 + $0x170] sm:$0xff]  }
  0x16   :  { %1033 = vmatprep.subr.bf16.mxu1 %v1131_v22  ;;  %v30_v62 = vld [vmem:[%s1481_s0 + $0x60] sm:$0xff]  ;;  %v1165_v8 = vld [vmem:[%s1480_s1 + $0x1a8] sm:$0xff]   ;;  %v1167_v10 = vld [vmem:[%s1480_s1 + $0x1f0] sm:$0xff]  }
  0x17   :  { %v916_v63 = vcombine.high %v26_v61, %v30_v62  ;;  %v915_v2 = vcombine.low %v26_v61, %v30_v62  ;;  %v1168_v11 = vld [vmem:[%s1480_s1 + $0x130] sm:$0xff]   ;;  %v1170_v13 = vld [vmem:[%s1480_s1 + $0x178] sm:$0xff]   ;;  %v823_v34 = vld [vmem:[%s1482_s2 + $0x8] sm:$0xff] }
  0x18   :  { %1006 = vmatpush3.bf16.msra.mxu0 %v1132_v23  ;;  %v1169_v12 = vld [vmem:[%s1480_s1 + $0x1b0] sm:$0xff]   ;;  %v1171_v14 = vld [vmem:[%s1480_s1 + $0x1f8] sm:$0xff]   ;;  %v851_v37 = vld [vmem:[%s1483_s3 + $0x8] sm:$0xff] }
  0x19   :  { %1034 = vmatpush3.bf16.msra.mxu1 %v1133_v24  ;;  %1007 = vmatprep.subr.bf16.mxu0 %v1134_v25  ;;  %v1172_v15 = vld [vmem:[%s1480_s1 + $0x138] sm:$0xff]   ;;  %v20_v17 = vld [vmem:[%s1481_s0 + $0x10] sm:$0xff]  ;;  %v850_v38 = vld [vmem:[%s1483_s3] sm:$0xff] }
  0x1a   :  { %1035 = vmatprep.subr.bf16.mxu1 %v1135_v26  ;;  %v1173_v16 = vld [vmem:[%s1480_s1 + $0x1b8] sm:$0xff]   ;;  %v24_v18 = vld [vmem:[%s1481_s0 + $0x30] sm:$0xff] }
  0x1b   :  { %v21_v19 = vld [vmem:[%s1481_s0 + $0x18] sm:$0xff]  ;;  %v911_v21 = vcombine.low %v20_v17, %v24_v18  ;;  %v912_v22 = vcombine.high %v20_v17, %v24_v18  ;;  %v28_v25 = vld [vmem:[%s1481_s0 + $0x50] sm:$0xff] }
  0x1c   :  { %1008 = vmatpush3.bf16.msra.mxu0 %v1136_v27  ;;  %v25_v20 = vld [vmem:[%s1481_s0 + $0x38] sm:$0xff]  ;;  %v32_v26 = vld [vmem:[%s1481_s0 + $0x70] sm:$0xff] }
  0x1d   :  { %1036 = vmatpush3.bf16.msra.mxu1 %v1137_v28  ;;  %1009 = vmatprep.subr.bf16.mxu0 %v1138_v29  ;;  %v913_v23 = vcombine.low %v21_v19, %v25_v20  ;;  %v914_v24 = vcombine.high %v21_v19, %v25_v20  ;;  %v29_v27 = vld [vmem:[%s1481_s0 + $0x58] sm:$0xff]  ;;  %v920_v28 = vcombine.high %v28_v25, %v32_v26  ;;  %v852_v40 = vld [vmem:[%s1483_s3 + $0x10] sm:$0xff] }
  0x1e   :  { %1037 = vmatprep.subr.bf16.mxu1 %v1139_v30  ;;  %v33_v29 = vld [vmem:[%s1481_s0 + $0x78] sm:$0xff]  ;;  %v919_v35 = vcombine.low %v28_v25, %v32_v26 }
  0x1f   :  { %v922_v30 = vcombine.high %v29_v27, %v33_v29  ;;  %v825_v33 = vld [vmem:[%s1482_s2 + $0x18] sm:$0xff] }
  0x20   :  { %1010 = vmatpush3.bf16.msra.mxu0 %v1140_v31  ;;  %v824_v31 = vld [vmem:[%s1482_s2 + $0x10] sm:$0xff] }
  0x21   :  { %1038 = vmatpush3.bf16.msra.mxu1 %v1141_v32  ;;  %1051 = vmatprep.subr.bf16.mxu0 %v1142_v41  ;;  %v822_v32 = vld [vmem:[%s1482_s2] sm:$0xff] }
  0x22   :  { %1079 = vmatprep.subr.bf16.mxu1 %v1143_v42  ;;  %838 = vperm.xlu1 %1109, %v824_v31  }
  0x23   :  { %659 = vmatmul.mubr.bf16.vlgmr.msra.gmra.mrb[0].mxu0 %v907_v36  ;;  %828 = vperm.xlu0 %1108, %v822_v32   ;;  %v921_v36 = vcombine.low %v29_v27, %v33_v29 }
  0x24   :  { %708 = vmatmul.mubr.bf16.vlgmr.msra.gmra.mrb[0].mxu1 %v909_v39  ;;  %1052 = vmatpush3.bf16.msra.mxu0 %v1144_v43  ;;  %v853_v39 = vld [vmem:[%s1483_s3 + $0x18] sm:$0xff] }
  0x25   :  { %1080 = vmatpush3.bf16.msra.mxu1 %v1145_v44  ;;  %1053 = vmatprep.subr.bf16.mxu0 %v1146_v45 }
  0x26   :  { %1081 = vmatprep.subr.bf16.mxu1 %v1147_v46  ;;  %666 = vmatprep.mubr.bf16.mxu0 %v916_v63 }
  0x27   :  { %715 = vmatprep.mubr.bf16.mxu1 %v918_v3  ;;  %843 = vperm.xlu1 %1109, %v825_v33  }
  0x28   :  { %1054 = vmatpush3.bf16.msra.mxu0 %v1148_v47  ;;  %833 = vperm.xlu0 %1108, %v823_v34  }
  0x29   :  { %1082 = vmatpush3.bf16.msra.mxu1 %v1149_v48  ;;  %1055 = vmatprep.subr.bf16.mxu0 %v1150_v49 }
  0x2a   :  { %1083 = vmatprep.subr.bf16.mxu1 %v1151_v50 }
  0x2b   :  { %667 = vmatmul.mubr.bf16.gmra.mrb[4].mxu0 %v915_v2  ;;  %861 = vperm.xlu1 %1109, %v851_v37  }
  0x2c   :  { %1056 = vmatpush3.bf16.msra.mxu0 %v1152_v51  ;;  %716 = vmatmul.mubr.bf16.gmra.mrb[4].mxu1 %v917_v5 }
  0x2d   :  { %1084 = vmatpush3.bf16.msra.mxu1 %v1153_v52  ;;  %1057 = vmatprep.subr.bf16.mxu0 %v1154_v53 }
  0x2e   :  { %1085 = vmatprep.subr.bf16.mxu1 %v1155_v54  ;;  %756 = vmatprep.mubr.bf16.mxu0 %v912_v22 }
  0x2f   :  { %805 = vmatprep.mubr.bf16.mxu1 %v914_v24  ;;  %856 = vperm.xlu0 %1108, %v850_v38  }
  0x30   :  { %1058 = vmatpush3.bf16.msra.mxu0 %v1156_v55  ;;  %871 = vperm.xlu1 %1109, %v853_v39  }
  0x31   :  { %1086 = vmatpush3.bf16.msra.mxu1 %v1157_v56  ;;  %1059 = vmatprep.subr.bf16.mxu0 %v1158_v57 }
  0x32   :  { %1087 = vmatprep.subr.bf16.mxu1 %v1159_v58 }
  0x33   :  { %866 = vperm.xlu0 %1108, %v852_v40  }
  0x34   :  { %1060 = vmatpush3.bf16.msra.mxu0 %v1160_v59 }
  0x35   :  { %1088 = vmatpush3.bf16.msra.mxu1 %v1161_v60  ;;  %1061 = vmatprep.subr.bf16.mxu0 %v1162_v4 }
  0x36   :  { %1089 = vmatprep.subr.bf16.mxu1 %v1163_v6 }
  0x38   :  { %1062 = vmatpush3.bf16.msra.mxu0 %v1164_v7 }
  0x39   :  { %1090 = vmatpush3.bf16.msra.mxu1 %v1165_v8  ;;  %1063 = vmatprep.subr.bf16.mxu0 %v1166_v9 }
  0x3a   :  { %1091 = vmatprep.subr.bf16.mxu1 %v1167_v10 }
  0x3c   :  { %1064 = vmatpush3.bf16.msra.mxu0 %v1168_v11 }
  0x3d   :  { %1092 = vmatpush3.bf16.msra.mxu1 %v1169_v12  ;;  %1065 = vmatprep.subr.bf16.mxu0 %v1170_v13 }
  0x3e   :  { %1093 = vmatprep.subr.bf16.mxu1 %v1171_v14 }
  0x40   :  { %1066 = vmatpush3.bf16.msra.mxu0 %v1172_v15 }
  0x41   :  { %1094 = vmatpush3.bf16.msra.mxu1 %v1173_v16 }
  0x43   :  { %757 = vmatmul.mubr.bf16.vlgmr.msra.gmra.mrb[8].mxu0 %v911_v21 }
  0x44   :  { %806 = vmatmul.mubr.bf16.vlgmr.msra.gmra.mrb[8].mxu1 %v913_v23  ;;  %764 = vmatprep.mubr.bf16.mxu0 %v920_v28 }
  0x45   :  { %813 = vmatprep.mubr.bf16.mxu1 %v922_v30 }
  0x4b   :  { %765 = vmatmul.mubr.bf16.gmra.mrb[12].mxu0 %v919_v35 }
  0x4c   :  { %814 = vmatmul.mubr.bf16.gmra.mrb[12].mxu1 %v921_v36 }
  0xa1   :  { %v839_v4 = vpop.permute.xlu1 %838 }
  0xa2   :  { %v829_v5 = vpop.permute.xlu0 %828 }
  0xa6   :  { %v844_v7 = vpop.permute.xlu1 %843 }
  0xa7   :  { %v834_v8 = vpop.permute.xlu0 %833 }
  0xaa   :  { %v862_v24 = vpop.permute.xlu1 %861 }
  0xae   :  { %v857_v25 = vpop.permute.xlu0 %856 }
  0xf6   :  { %v1011_v41 = vpop.f32.mrb[0].mxu0 }
  0xf7   :  { %v1039_v42 = vpop.f32.mrb[0].mxu1  ;;  %v1012_v43 = vpop.f32.mrb[1].mxu0 }
  0xf8   :  { %v1013_v44 = vadd.f32 %v1012_v43, %v1011_v41  ;;  %v1040_v45 = vpop.f32.mrb[1].mxu1  ;;  %v1014_v46 = vpop.f32.mrb[2].mxu0 }
  0xf9   :  { %v1041_v47 = vadd.f32 %v1040_v45, %v1039_v42  ;;  %v1042_v48 = vpop.f32.mrb[2].mxu1  ;;  %v1015_v49 = vpop.f32.mrb[3].mxu0 }
  0xfa   :  { %v1016_v50 = vadd.f32 %v1015_v49, %v1014_v46  ;;  %v1043_v51 = vpop.f32.mrb[3].mxu1 }
  0xfb   :  { %v710_v52 = vadd.f32 %v1041_v47, %v1013_v44  ;;  %v1044_v53 = vadd.f32 %v1043_v51, %v1042_v48 }
  0xfd   :  { %v713_v54 = vadd.f32 %v1044_v53, %v1016_v50 }
  0xfe   :  { %v1017_v55 = vpop.f32.mrb[4].mxu0 }
  0xff   :  { %v1045_v56 = vpop.f32.mrb[4].mxu1  ;;  %v1018_v57 = vpop.f32.mrb[5].mxu0 }
 0x100   :  { %v1019_v58 = vadd.f32 %v1018_v57, %v1017_v55  ;;  %v1046_v59 = vpop.f32.mrb[5].mxu1  ;;  %v1020_v60 = vpop.f32.mrb[6].mxu0 }
 0x101   :  { %v1047_v61 = vadd.f32 %v1046_v59, %v1045_v56  ;;  %v1048_v62 = vpop.f32.mrb[6].mxu1  ;;  %v1021_v63 = vpop.f32.mrb[7].mxu0 }
 0x102   :  { %v1022_v0 = vadd.f32 %v1021_v63, %v1020_v60  ;;  %v1049_v1 = vpop.f32.mrb[7].mxu1  ;;  %v872_v55 = vpop.permute.xlu1 %871 }
 0x103   :  { %v718_v2 = vadd.f32 %v1047_v61, %v1019_v58  ;;  %v1050_v3 = vadd.f32 %v1049_v1, %v1048_v62 }
 0x105   :  { %v721_v6 = vadd.f32 %v1050_v3, %v1022_v0 }
 0x116   :  { %v1067_v9 = vpop.f32.mrb[8].mxu0 }
 0x117   :  { %v1095_v10 = vpop.f32.mrb[8].mxu1  ;;  %v1068_v11 = vpop.f32.mrb[9].mxu0 }
 0x118   :  { %v1096_v12 = vpop.f32.mrb[9].mxu1  ;;  %v1069_v13 = vadd.f32 %v1068_v11, %v1067_v9  ;;  %v1070_v15 = vpop.f32.mrb[10].mxu0 }
 0x119   :  { %v1097_v14 = vadd.f32 %v1096_v12, %v1095_v10  ;;  %v1098_v16 = vpop.f32.mrb[10].mxu1  ;;  %v1071_v17 = vpop.f32.mrb[11].mxu0 }
 0x11a   :  { %v1099_v18 = vpop.f32.mrb[11].mxu1  ;;  %v759_v19 = vadd.f32 %v1069_v13, %v710_v52  ;;  %v1072_v20 = vadd.f32 %v1071_v17, %v1070_v15  ;;  %v867_v52 = vpop.permute.xlu0 %866 }
 0x11b   :  { %v1100_v21 = vadd.f32 %v1099_v18, %v1098_v16 }
 0x11c   :  { %v808_v22 = vadd.f32 %v1097_v14, %v759_v19  ;;  %v762_v23 = vadd.f32 %v1072_v20, %v713_v54 }
 0x11e   :  { %v846_v26 = vmul.f32 %v829_v5, %v808_v22  ;;  %v811_v27 = vadd.f32 %v1100_v21, %v762_v23  ;;  %v1073_v28 = vpop.f32.mrb[12].mxu0 }
 0x11f   :  { %v1101_v29 = vpop.f32.mrb[12].mxu1  ;;  %v1074_v30 = vpop.f32.mrb[13].mxu0 }
 0x120   :  { %v1102_v31 = vpop.f32.mrb[13].mxu1  ;;  %v874_v32 = vadd.f32 %v857_v25, %v846_v26  ;;  %v847_v33 = vmul.f32 %v834_v8, %v811_v27  ;;  %v1075_v34 = vadd.f32 %v1074_v30, %v1073_v28  ;;  %v1076_v36 = vpop.f32.mrb[14].mxu0 }
 0x121   :  { %v1103_v35 = vadd.f32 %v1102_v31, %v1101_v29  ;;  %v1104_v37 = vpop.f32.mrb[14].mxu1  ;;  %v1077_v38 = vpop.f32.mrb[15].mxu0 }
 0x122   :  { %v1105_v39 = vpop.f32.mrb[15].mxu1  ;;  %v878_v40 = vmax.f32 %v874_v32, 0.0  ;;  %v875_v41 = vadd.f32 %v862_v24, %v847_v33  ;;  %v767_v42 = vadd.f32 %v1075_v34, %v718_v2  ;;  %v1078_v43 = vadd.f32 %v1077_v38, %v1076_v36 }
 0x123   :  { %v1106_v44 = vadd.f32 %v1105_v39, %v1104_v37 }
 0x124   :  { %v991_v45 = vpack.c.bf16 %v878_v40, %v878_v40  ;;  %v879_v46 = vmax.f32 %v875_v41, 0.0  ;;  %v816_v47 = vadd.f32 %v1103_v35, %v767_v42  ;;  %v770_v48 = vadd.f32 %v1078_v43, %v721_v6 }
 0x126   :  { %899 = vst.msk [vmem:[%s1484_s4] sm:$0xf] %vm898_vm0, %v991_v45  ;;  %v992_v49 = vpack.c.bf16 %v879_v46, %v879_v46  ;;  %v848_v50 = vmul.f32 %v839_v4, %v816_v47  ;;  %v819_v51 = vadd.f32 %v1106_v44, %v770_v48 }
 0x128   :  { %900 = vst.msk [vmem:[%s1484_s4 + $0x4] sm:$0xf] %vm898_vm0, %v992_v49  ;;  %v876_v53 = vadd.f32 %v867_v52, %v848_v50  ;;  %v849_v54 = vmul.f32 %v844_v7, %v819_v51 }
 0x12a   :  { %v880_v56 = vmax.f32 %v876_v53, 0.0  ;;  %v877_v57 = vadd.f32 %v872_v55, %v849_v54 }
 0x12c   :  { %v993_v58 = vpack.c.bf16 %v880_v56, %v880_v56  ;;  %v881_v59 = vmax.f32 %v877_v57, 0.0 }
 0x12e   :  { %901 = vst.msk [vmem:[%s1484_s4 + $0x8] sm:$0xf] %vm898_vm0, %v993_v58  ;;  %v994_v60 = vpack.c.bf16 %v881_v59, %v881_v59 }
 0x130   :  { %902 = vst.msk [vmem:[%s1484_s4 + $0xc] sm:$0xf] %vm898_vm0, %v994_v60 }

// kernel: advantage_forward.9
= control target key start
LH: loop header
LB: loop body
LE: loop exit
PB: predicated region body
PF: predicated region fallthrough
CT: control target
= control target key end

     0   :  { %v540_v0 = vmov 0.0|0.0   ;;  %vm541_vm0 = vmmov 0   ;;  %v542_v4 = vmov 0.0   ;;  %vm239_vm1 = vcmask 1043456   ;;  %s762_s1 = inlined_call_operand.vmem [shape: f32[128,128], index: 1, kind: input, shape index: {}]   ;;  %s763_s3 = inlined_call_operand.vmem [shape: f32[128,100], index: 3, kind: input, shape index: {}]   ;;  %s764_s0 = inlined_call_operand.vmem [shape: f32[8,128], index: 0, kind: input, shape index: {}]   ;;  %s765_s5 = inlined_call_operand.vmem [shape: f32[100,8], index: 5, kind: input, shape index: {}]   ;;  %s766_s2 = inlined_call_operand.vmem [shape: f32[1,128], index: 2, kind: input, shape index: {}]   ;;  %s767_s4 = inlined_call_operand.vmem [shape: f32[1,100], index: 4, kind: input, shape index: {}]   ;;  %s768_s6 = inlined_call_operand.vmem [shape: f32[1,8], index: 6, kind: input, shape index: {}]   ;;  %s769_s7 = inlined_call_operand.vmem [shape: f32[8,8], index: 7, kind: output, shape index: {}]  }
   0x1   :  { %471 = vmatprep.subr.bf16.mxu0 %v540_v0  ;;  %v27_v1 = vld [vmem:[%s762_s1] sm:$0xff]  ;;  %v28_v2 = vld [vmem:[%s762_s1 + $0x8] sm:$0xff]  ;;  %v29_v3 = vld [vmem:[%s762_s1 + $0x10] sm:$0xff]  ;;  %404 = vmatprep.mubr.msk.f32.mxu0 %vm541_vm0, %v542_v4  ;;  %vm235_vm2 = vcmask 818176   ;;  %vm313_vm3 = vcmask 64512  }
   0x2   :  { %v472_v5 = vpack.c.bf16 %v28_v2, %v27_v1  ;;  %v30_v6 = vld [vmem:[%s762_s1 + $0x18] sm:$0xff]  ;;  %495 = vmatprep.subr.bf16.mxu1 %v540_v0  ;;  %439 = vmatprep.mubr.msk.f32.mxu1 %vm541_vm0, %v542_v4  ;;  %v31_v8 = vld [vmem:[%s762_s1 + $0x20] sm:$0xff]  ;;  %v32_v9 = vld [vmem:[%s762_s1 + $0x28] sm:$0xff] }
   0x3   :  { %v475_v7 = vpack.c.bf16 %v30_v6, %v29_v3  ;;  %v121_v10 = vld [vmem:[%s763_s3] sm:$0xff]  ;;  %v122_v11 = vld [vmem:[%s763_s3 + $0x8] sm:$0xff]  ;;  %v123_v12 = vld [vmem:[%s763_s3 + $0x10] sm:$0xff]  ;;  %v478_v14 = vpack.c.bf16 %v32_v9, %v31_v8 }
   0x4   :  { %473 = vmatpush3.bf16.msra.mxu0 %v472_v5  ;;  %v124_v13 = vld [vmem:[%s763_s3 + $0x18] sm:$0xff]  ;;  %v496_v15 = vpack.c.bf16 %v122_v11, %v121_v10  ;;  %v33_v16 = vld [vmem:[%s762_s1 + $0x30] sm:$0xff]  ;;  %v125_v19 = vld [vmem:[%s763_s3 + $0x20] sm:$0xff] }
   0x5   :  { %474 = vmatprep.subr.bf16.mxu0 %v540_v0  ;;  %v34_v17 = vld [vmem:[%s762_s1 + $0x38] sm:$0xff]  ;;  %v499_v18 = vpack.c.bf16 %v124_v13, %v123_v12  ;;  %v126_v20 = vld [vmem:[%s763_s3 + $0x28] sm:$0xff]  ;;  %v35_v22 = vld [vmem:[%s762_s1 + $0x40] sm:$0xff] }
   0x6   :  { %497 = vmatpush3.bf16.msra.mxu1 %v496_v15  ;;  %v481_v21 = vpack.c.bf16 %v34_v17, %v33_v16  ;;  %v36_v23 = vld [vmem:[%s762_s1 + $0x48] sm:$0xff]  ;;  %v502_v24 = vpack.c.bf16 %v126_v20, %v125_v19  ;;  %v127_v25 = vld [vmem:[%s763_s3 + $0x30] sm:$0xff]  ;;  %v128_v26 = vld [vmem:[%s763_s3 + $0x38] sm:$0xff] }
   0x7   :  { %498 = vmatprep.subr.bf16.mxu1 %v540_v0  ;;  %v484_v27 = vpack.c.bf16 %v36_v23, %v35_v22  ;;  %v37_v28 = vld [vmem:[%s762_s1 + $0x50] sm:$0xff]  ;;  %v38_v29 = vld [vmem:[%s762_s1 + $0x58] sm:$0xff]  ;;  %v505_v30 = vpack.c.bf16 %v128_v26, %v127_v25  ;;  %v129_v31 = vld [vmem:[%s763_s3 + $0x40] sm:$0xff] }
   0x8   :  { %476 = vmatpush3.bf16.msra.mxu0 %v475_v7  ;;  %v130_v32 = vld [vmem:[%s763_s3 + $0x48] sm:$0xff]  ;;  %v487_v33 = vpack.c.bf16 %v38_v29, %v37_v28  ;;  %v39_v34 = vld [vmem:[%s762_s1 + $0x60] sm:$0xff]  ;;  %v131_v37 = vld [vmem:[%s763_s3 + $0x50] sm:$0xff] }
   0x9   :  { %477 = vmatprep.subr.bf16.mxu0 %v540_v0  ;;  %v40_v35 = vld [vmem:[%s762_s1 + $0x68] sm:$0xff]  ;;  %v508_v36 = vpack.c.bf16 %v130_v32, %v129_v31  ;;  %v132_v38 = vld [vmem:[%s763_s3 + $0x58] sm:$0xff]  ;;  %v41_v40 = vld [vmem:[%s762_s1 + $0x70] sm:$0xff] }
   0xa   :  { %500 = vmatpush3.bf16.msra.mxu1 %v499_v18  ;;  %v490_v39 = vpack.c.bf16 %v40_v35, %v39_v34  ;;  %v42_v41 = vld [vmem:[%s762_s1 + $0x78] sm:$0xff]  ;;  %v511_v42 = vpack.c.bf16 %v132_v38, %v131_v37  ;;  %v133_v43 = vld [vmem:[%s763_s3 + $0x60] sm:$0xff]  ;;  %v134_v44 = vld [vmem:[%s763_s3 + $0x68] sm:$0xff] }
   0xb   :  { %501 = vmatprep.subr.bf16.mxu1 %v540_v0  ;;  %v493_v45 = vpack.c.bf16 %v42_v41, %v41_v40  ;;  %v514_v46 = vpack.c.bf16 %v134_v44, %v133_v43  ;;  %v26_v47 = vld [vmem:[%s764_s0] sm:$0xff]  ;;  %v135_v48 = vld [vmem:[%s763_s3 + $0x70] sm:$0xff]  ;;  %v136_v49 = vld [vmem:[%s763_s3 + $0x78] sm:$0xff] }
   0xc   :  { %479 = vmatpush3.bf16.msra.mxu0 %v478_v14  ;;  %v517_v50 = vpack.c.bf16 %v136_v49, %v135_v48  ;;  %v215_v51 = vld [vmem:[%s765_s5] sm:$0xff]  ;;  %v216_v52 = vld [vmem:[%s765_s5 + $0x8] sm:$0xff]  ;;  %v217_v53 = vld [vmem:[%s765_s5 + $0x10] sm:$0xff] }
   0xd   :  { %480 = vmatprep.subr.bf16.mxu0 %v540_v0  ;;  %v520_v54 = vpack.c.bf16 %v216_v52, %v215_v51  ;;  %v218_v55 = vld [vmem:[%s765_s5 + $0x18] sm:$0xff]  ;;  %v219_v57 = vld [vmem:[%s765_s5 + $0x20] sm:$0xff]  ;;  %v220_v58 = vld [vmem:[%s765_s5 + $0x28] sm:$0xff] }
   0xe   :  { %503 = vmatpush3.bf16.msra.mxu1 %v502_v24  ;;  %v523_v56 = vpack.c.bf16 %v218_v55, %v217_v53  ;;  %v526_v59 = vpack.c.bf16 %v220_v58, %v219_v57  ;;  %v221_v60 = vld [vmem:[%s765_s5 + $0x30] sm:$0xff]  ;;  %v222_v61 = vld [vmem:[%s765_s5 + $0x38] sm:$0xff]  ;;  %v223_v63 = vld [vmem:[%s765_s5 + $0x40] sm:$0xff] }
   0xf   :  { %504 = vmatprep.subr.bf16.mxu1 %v540_v0  ;;  %v529_v62 = vpack.c.bf16 %v222_v61, %v221_v60  ;;  %v224_v1 = vld [vmem:[%s765_s5 + $0x48] sm:$0xff]  ;;  %v319_v3 = vld [vmem:[%s766_s2] ss:$0 sm:$0xff]  ;;  %v225_v9 = vld [vmem:[%s765_s5 + $0x50] sm:$0xff] }
  0x10   :  { %482 = vmatpush3.bf16.msra.mxu0 %v481_v21  ;;  %v532_v2 = vpack.c.bf16 %v224_v1, %v223_v63  ;;  %v226_v10 = vld [vmem:[%s765_s5 + $0x58] sm:$0xff]  ;;  %v320_v12 = vld [vmem:[%s767_s4] ss:$0 sm:$0xff] }
  0x11   :  { %483 = vmatprep.subr.bf16.mxu0 %v540_v0  ;;  %v535_v11 = vpack.c.bf16 %v226_v10, %v225_v9 }
  0x12   :  { %506 = vmatpush3.bf16.msra.mxu1 %v505_v30 }
  0x13   :  { %507 = vmatprep.subr.bf16.mxu1 %v540_v0 }
  0x14   :  { %485 = vmatpush3.bf16.msra.mxu0 %v484_v27 }
  0x15   :  { %486 = vmatprep.subr.bf16.mxu0 %v540_v0 }
  0x16   :  { %509 = vmatpush3.bf16.msra.mxu1 %v508_v36 }
  0x17   :  { %510 = vmatprep.subr.bf16.mxu1 %v540_v0 }
  0x18   :  { %488 = vmatpush3.bf16.msra.mxu0 %v487_v33 }
  0x19   :  { %489 = vmatprep.subr.bf16.mxu0 %v540_v0 }
  0x1a   :  { %512 = vmatpush3.bf16.msra.mxu1 %v511_v42 }
  0x1b   :  { %513 = vmatprep.subr.bf16.mxu1 %v540_v0 }
  0x1c   :  { %491 = vmatpush3.bf16.msra.mxu0 %v490_v39 }
  0x1d   :  { %492 = vmatprep.subr.bf16.mxu0 %v540_v0 }
  0x1e   :  { %515 = vmatpush3.bf16.msra.mxu1 %v514_v46 }
  0x1f   :  { %516 = vmatprep.subr.bf16.mxu1 %v540_v0 }
  0x20   :  { %494 = vmatpush3.bf16.msra.mxu0 %v493_v45 }
  0x21   :  { %519 = vmatprep.subr.bf16.mxu0 %v540_v0 }
  0x22   :  { %518 = vmatpush3.bf16.msra.mxu1 %v517_v50 }
  0x23   :  { %405 = vmatmul.mubr.f32.vlgmr.msra.gmra.mrb[0].mxu0 %v26_v47 }
  0x24   :  { %468 = vmatprep.mubr.msk.f32.mxu0 %vm541_vm0, %v542_v4  ;;  %521 = vmatpush3.bf16.msra.mxu0 %v520_v54 }
  0x25   :  { %522 = vmatprep.subr.bf16.mxu0 %v540_v0 }
  0x28   :  { %524 = vmatpush3.bf16.msra.mxu0 %v523_v56 }
  0x29   :  { %525 = vmatprep.subr.bf16.mxu0 %v540_v0 }
  0x2c   :  { %527 = vmatpush3.bf16.msra.mxu0 %v526_v59 }
  0x2d   :  { %528 = vmatprep.subr.bf16.mxu0 %v540_v0 }
  0x30   :  { %530 = vmatpush3.bf16.msra.mxu0 %v529_v62 }
  0x31   :  { %531 = vmatprep.subr.bf16.mxu0 %v540_v0 }
  0x34   :  { %533 = vmatpush3.bf16.msra.mxu0 %v532_v2 }
  0x35   :  { %534 = vmatprep.subr.bf16.mxu0 %v540_v0  ;;  %v227_v0 = vld [vmem:[%s765_s5 + $0x60] sm:$0xf] }
  0x38   :  { %536 = vmatpush3.bf16.msra.mxu0 %v535_v11 }
  0x39   :  { %466 = vmatprep.subr.mxu0 %v542_v4  ;;  %v321_v4 = vld [vmem:[%s768_s6] ss:$0 sm:$0xff] }
  0x3c   :  { %467 = vmatpush3.msk.msra.mxu0 %vm239_vm1, %v227_v0 }
  0xf6   :  { %v116_v5 = vpop.f32.mrb[0].mxu0 }
  0xf7   :  { %v117_v6 = vadd.f32 %v319_v3, %v116_v5  ;;  %v406_v7 = vpop.f32.mrb[1].mxu0 }
  0xf9   :  { %v120_v8 = vmax.f32 %v117_v6, 0.0 }
  0xfb   :  { %440 = vmatmul.mubr.f32.vlgmr.msra.gmra.mrb[0].mxu1 %v120_v8 }
 0x1ce   :  { %v210_v13 = vpop.f32.mrb[0].mxu1 }
 0x1cf   :  { %v211_v14 = vadd.f32 %v320_v12, %v210_v13  ;;  %v441_v15 = vpop.f32.mrb[1].mxu1 }
 0x1d1   :  { %v214_v16 = vmax.f32 %v211_v14, 0.0 }
 0x1d3   :  { %469 = vmatmul.mubr.msk.f32.vlgmr.msra.gmra.mrb[2].mxu0 %vm235_vm2, %v214_v16 }
 0x2a6   :  { %v309_v17 = vpop.f32.mrb[2].mxu0 }
 0x2a7   :  { %v310_v18 = vadd.f32 %v321_v4, %v309_v17  ;;  %v470_v19 = vpop.f32.mrb[3].mxu0 }
 0x2a9   :  { %314 = vst.msk [vmem:[%s769_s7] sm:$0xff] %vm313_vm3, %v310_v18 }

</bundles_post_ra>
